<compile_context>
chip_gen: v7x
topology: tpu7x:2x2x1
jax: 0.10.0
libtpu: 0.0.40
codegen_flags: <defaults>
</compile_context>

<pallas_src>
import jax
import jax.numpy as jnp
import numpy as np
from jax import lax
from jax.experimental import pallas as pl
from jax.experimental.pallas import tpu as pltpu

LANE = 128      # padded per-gate width (lane tile)
SUBLANE = 8     # padded batch (sublane tile)


# ----------------------------------------------------------------------------
# Fused kernel
# ----------------------------------------------------------------------------
def _make_fused_kernel(S, T, B, V):
    f32 = jnp.float32
    Bp = SUBLANE
    GP = LANE

    def kernel(enc_tok_ref, tgt_ref, db_ref, bs_ref,
               enc_ew_ref, enc_whh_ref, enc_bc_ref, enc_bhn_ref,
               dec_ew_ref, dec_whh_ref, dec_bc_ref, dec_bhn_ref,
               pol_wh_ref, pol_wdb_ref, pol_wbs_ref, pol_b_ref,
               wout_ref, bout_ref,
               proba_ref,
               enc_gi_s, dec_gi_s):
        iota_v = lax.broadcasted_iota(jnp.int32, (Bp, V), 1)

        def pad_rows_i32(x, rows):
            if x.shape[0] == Bp:
                return x
            return jnp.concatenate(
                [x, jnp.zeros((Bp - x.shape[0], rows), jnp.int32)], axis=0)

        # -------- in-kernel embedding "gather": one-hot @ (embed @ W_ih) -----
        enc_tok = pad_rows_i32(enc_tok_ref[...], S)          # [Bp, S] int32
        tgt_tok = pad_rows_i32(tgt_ref[...], T)              # [Bp, T] int32

        enc_oh = []
        for t in range(S):
            col = enc_tok[:, t:t + 1]                                    # [Bp,1]
            enc_oh.append(jnp.where(iota_v == col, 1.0, 0.0).astype(f32))
        enc_oh = jnp.concatenate(enc_oh, axis=0)                         # [S*Bp,V]

        dec_oh = []
        for t in range(T):
            if t == 0:
                # SOS_token == 0
                oh = jnp.where(iota_v == 0, 1.0, 0.0).astype(f32)
            else:
                col = tgt_tok[:, t - 1:t]
                oh = jnp.where(iota_v == col, 1.0, 0.0).astype(f32)
            dec_oh.append(oh)
        dec_oh = jnp.concatenate(dec_oh, axis=0)                         # [T*Bp,V]

        # Batched input-gate precompute (off the recurrence critical path).
        enc_gi_s[...] = (jnp.dot(enc_oh, enc_ew_ref[...],
                                 preferred_element_type=f32) + enc_bc_ref[...])
        dec_gi_s[...] = (jnp.dot(dec_oh, dec_ew_ref[...],
                                 preferred_element_type=f32) + dec_bc_ref[...])

        # Policy db/bs partial term (independent of the encoder recurrence).
        pol_db = (jnp.dot(db_ref[...], pol_wdb_ref[...], preferred_element_type=f32)
                  + jnp.dot(bs_ref[...], pol_wbs_ref[...], preferred_element_type=f32)
                  + pol_b_ref[...])                                      # [B, GP]
        if B < Bp:
            pol_db = jnp.concatenate(
                [pol_db, jnp.zeros((Bp - B, GP), f32)], axis=0)          # [Bp,GP]

        enc_bhn = enc_bhn_ref[...]                                       # [1, GP]
        dec_bhn = dec_bhn_ref[...]                                       # [1, GP]

        # -------- encoder GRU (serial, statically unrolled) -------------------
        h = jnp.zeros((Bp, GP), f32)
        for t in range(S):
            gi = enc_gi_s[pl.ds(t * Bp, Bp), :]                          # aligned
            gh = jnp.dot(h, enc_whh_ref[...], preferred_element_type=f32)
            r = jax.nn.sigmoid(gi[:, 0:GP] + gh[:, 0:GP])
            z = jax.nn.sigmoid(gi[:, GP:2 * GP] + gh[:, GP:2 * GP])
            n = jnp.tanh(gi[:, 2 * GP:3 * GP]
                         + r * (gh[:, 2 * GP:3 * GP] + enc_bhn))
            h = (1.0 - z) * n + z * h

        # -------- policy: decoder initial hidden ------------------------------
        h = jnp.tanh(jnp.dot(h, pol_wh_ref[...], preferred_element_type=f32)
                     + pol_db)

        # -------- decoder GRU; hidden states stay in vregs --------------------
        hs = []
        for t in range(T):
            gi = dec_gi_s[pl.ds(t * Bp, Bp), :]
            gh = jnp.dot(h, dec_whh_ref[...], preferred_element_type=f32)
            r = jax.nn.sigmoid(gi[:, 0:GP] + gh[:, 0:GP])
            z = jax.nn.sigmoid(gi[:, GP:2 * GP] + gh[:, GP:2 * GP])
            n = jnp.tanh(gi[:, 2 * GP:3 * GP]
                         + r * (gh[:, 2 * GP:3 * GP] + dec_bhn))
            h = (1.0 - z) * n + z * h
            hs.append(h)

        # -------- batched projection + log_softmax, batch-major output --------
        hs = jnp.concatenate(hs, axis=0)                                 # [T*Bp,GP]
        logits = (jnp.dot(hs, wout_ref[...], preferred_element_type=f32)
                  + bout_ref[...])                                       # [T*Bp,V]
        m = jnp.max(logits, axis=-1, keepdims=True)
        s = logits - m
        logp = s - jnp.log(jnp.sum(jnp.exp(s), axis=-1, keepdims=True))

        for b in range(B):
            rows = [logp[t * Bp + b: t * Bp + b + 1, :] for t in range(T)]
            proba_ref[pl.ds(b * T, T), :] = jnp.concatenate(rows, axis=0)

    return kernel


# ----------------------------------------------------------------------------
# One-time weight relayout (outside the per-call path)
# ----------------------------------------------------------------------------
def prepare_params(params, db_size, bs_size):
    f32 = jnp.float32
    H = params["enc_whh"].shape[0]
    GP = LANE

    def gate_pad(w):                        # [in, 3H] -> [in, 3*GP], zero pad
        w = w.astype(f32)
        blocks = [w[:, 0:H], w[:, H:2 * H], w[:, 2 * H:3 * H]]
        return jnp.concatenate(
            [jnp.pad(b, ((0, 0), (0, GP - H))) for b in blocks], axis=1)

    def prep_stream(embed, wih, whh, bih, bhh):
        ew = gate_pad(embed.astype(f32) @ wih.astype(f32))               # [V,3GP]
        whh_p = jnp.pad(gate_pad(whh), ((0, GP - H), (0, 0)))            # [GP,3GP]
        bc = gate_pad(jnp.concatenate(
            [bih[:, :2 * H] + bhh[:, :2 * H], bih[:, 2 * H:]], axis=1))  # [1,3GP]
        bhn = jnp.pad(bhh[:, 2 * H:].astype(f32), ((0, 0), (0, GP - H)))  # [1,GP]
        return ew, whh_p, bc, bhn

    enc_ew, enc_whh, enc_bc, enc_bhn = prep_stream(
        params["enc_embed"], params["enc_wih"], params["enc_whh"],
        params["enc_bih"], params["enc_bhh"])
    dec_ew, dec_whh, dec_bc, dec_bhn = prep_stream(
        params["dec_embed"], params["dec_wih"], params["dec_whh"],
        params["dec_bih"], params["dec_bhh"])

    pol_w = params["pol_w"].astype(f32)
    pol_wh = jnp.pad(pol_w[:H], ((0, GP - H), (0, GP - H)))              # [GP,GP]
    pol_wdb = jnp.pad(pol_w[H:H + db_size], ((0, 0), (0, GP - H)))       # [DB,GP]
    pol_wbs = jnp.pad(pol_w[H + db_size:H + db_size + bs_size],
                      ((0, 0), (0, GP - H)))                             # [BS,GP]
    pol_b = jnp.pad(params["pol_b"].astype(f32), ((0, 0), (0, GP - H)))  # [1,GP]

    wout = jnp.pad(params["dec_wout"].astype(f32), ((0, GP - H), (0, 0)))  # [GP,V]
    bout = params["dec_bout"].astype(f32)                                # [1,V]

    return {
        "enc_ew": enc_ew, "enc_whh": enc_whh, "enc_bc": enc_bc, "enc_bhn": enc_bhn,
        "dec_ew": dec_ew, "dec_whh": dec_whh, "dec_bc": dec_bc, "dec_bhn": dec_bhn,
        "pol_wh": pol_wh, "pol_wdb": pol_wdb, "pol_wbs": pol_wbs, "pol_b": pol_b,
        "wout": wout, "bout": bout,
    }


# ----------------------------------------------------------------------------
# Full forward (Pallas path)
# ----------------------------------------------------------------------------
def forward_pallas(prep, input_tensor, target_tensor, db_tensor, bs_tensor):
    B, S = input_tensor.shape
    _, T = target_tensor.shape
    V = prep["wout"].shape[1]
    assert B <= SUBLANE

    kernel = _make_fused_kernel(S, T, B, V)
    proba_flat = pl.pallas_call(
        kernel,
        out_shape=jax.ShapeDtypeStruct((B * T, V), jnp.float32),
        scratch_shapes=[
            pltpu.VMEM((S * SUBLANE, 3 * LANE), jnp.float32),   # encoder gi
            pltpu.VMEM((T * SUBLANE, 3 * LANE), jnp.float32),   # decoder gi
        ],
    )(input_tensor.astype(jnp.int32), target_tensor.astype(jnp.int32),
      db_tensor.astype(jnp.float32), bs_tensor.astype(jnp.float32),
      prep["enc_ew"], prep["enc_whh"], prep["enc_bc"], prep["enc_bhn"],
      prep["dec_ew"], prep["dec_whh"], prep["dec_bc"], prep["dec_bhn"],
      prep["pol_wh"], prep["pol_wdb"], prep["pol_wbs"], prep["pol_b"],
      prep["wout"], prep["bout"])

    # Kernel writes batch-major rows; this reshape is a pure metadata change.
    return proba_flat.reshape(B, T, V)


# ----------------------------------------------------------------------------
# Pure-JAX reference (for correctness check)
# ----------------------------------------------------------------------------
def gru_ref(x_seq, wih, whh, bih, bhh, h0):
    H = h0.shape[-1]

    def step(h, x):
        gi = x @ wih + bih
        gh = h @ whh + bhh
        r = jax.nn.sigmoid(gi[:, :H] + gh[:, :H])
        z = jax.nn.sigmoid(gi[:, H:2 * H] + gh[:, H:2 * H])
        n = jnp.tanh(gi[:, 2 * H:] + r * gh[:, 2 * H:])
        h_new = (1.0 - z) * n + z * h
        return h_new, h_new

    h_last, outs = jax.lax.scan(step, h0, x_seq)
    return outs, h_last


def forward_ref(params, input_tensor, target_tensor, db_tensor, bs_tensor):
    B, S = input_tensor.shape
    _, T = target_tensor.shape
    H = params["enc_whh"].shape[0]
    enc_emb = jnp.take(params["enc_embed"], input_tensor, axis=0)
    enc_emb = jnp.transpose(enc_emb, (1, 0, 2)).astype(jnp.float32)
    h0 = jnp.zeros((B, H), jnp.float32)
    _, enc_hidden = gru_ref(enc_emb, params["enc_wih"], params["enc_whh"],
                            params["enc_bih"], params["enc_bhh"], h0)
    pol_in = jnp.concatenate([enc_hidden, db_tensor, bs_tensor], axis=-1)
    dec_h0 = jnp.tanh(pol_in @ params["pol_w"] + params["pol_b"])
    sos = jnp.zeros((B, 1), target_tensor.dtype)
    dec_tokens = jnp.concatenate([sos, target_tensor[:, :-1]], axis=1)
    dec_emb = jnp.take(params["dec_embed"], dec_tokens, axis=0)
    dec_emb = jnp.transpose(dec_emb, (1, 0, 2)).astype(jnp.float32)
    dec_hs, _ = gru_ref(dec_emb, params["dec_wih"], params["dec_whh"],
                        params["dec_bih"], params["dec_bhh"], dec_h0)
    logits = jnp.einsum("tbh,hv->tbv", dec_hs, params["dec_wout"]) + params["dec_bout"]
    logp = jax.nn.log_softmax(logits, axis=-1)
    return jnp.transpose(logp, (1, 0, 2))


# ----------------------------------------------------------------------------
if __name__ == "__main__":
    # small config consistent with the module's args
    B, S, T = 2, 8, 8
    E = 32            # emb_size
    H = 32            # hid_size_enc == hid_size_pol == hid_size_dec (depth=1 GRU)
    DB, BS = 8, 8     # db_size, bs_size
    V = 128           # vocab_size

    key = jax.random.PRNGKey(0)
    keys = jax.random.split(key, 16)
    sc = 0.1

    params = {
        "enc_embed": jax.random.normal(keys[0], (V, E), jnp.float32),
        "enc_wih": sc * jax.random.normal(keys[1], (E, 3 * H), jnp.float32),
        "enc_whh": sc * jax.random.normal(keys[2], (H, 3 * H), jnp.float32),
        "enc_bih": sc * jax.random.normal(keys[3], (1, 3 * H), jnp.float32),
        "enc_bhh": sc * jax.random.normal(keys[4], (1, 3 * H), jnp.float32),
        "pol_w": sc * jax.random.normal(keys[5], (H + DB + BS, H), jnp.float32),
        "pol_b": sc * jax.random.normal(keys[6], (1, H), jnp.float32),
        "dec_embed": jax.random.normal(keys[7], (V, E), jnp.float32),
        "dec_wih": sc * jax.random.normal(keys[8], (E, 3 * H), jnp.float32),
        "dec_whh": sc * jax.random.normal(keys[9], (H, 3 * H), jnp.float32),
        "dec_bih": sc * jax.random.normal(keys[10], (1, 3 * H), jnp.float32),
        "dec_bhh": sc * jax.random.normal(keys[11], (1, 3 * H), jnp.float32),
        "dec_wout": sc * jax.random.normal(keys[12], (H, V), jnp.float32),
        "dec_bout": sc * jax.random.normal(keys[13], (1, V), jnp.float32),
    }

    input_tensor = jax.random.randint(keys[14], (B, S), 0, V, jnp.int32)
    target_tensor = jax.random.randint(keys[15], (B, T), 0, V, jnp.int32)
    db_tensor = jax.random.uniform(keys[14], (B, DB), jnp.float32)
    bs_tensor = jax.random.uniform(keys[15], (B, BS), jnp.float32)

    # one-time weight relayout (kept out of the per-call jitted path)
    prep = prepare_params(params, DB, BS)
    prep = jax.tree_util.tree_map(jax.block_until_ready, prep)

    forward = jax.jit(forward_pallas)
    proba = forward(prep, input_tensor, target_tensor, db_tensor, bs_tensor)
    proba = jax.block_until_ready(proba)

    ref = forward_ref(params, input_tensor, target_tensor, db_tensor, bs_tensor)
    np.testing.assert_allclose(np.asarray(proba), np.asarray(ref),
                               rtol=1e-4, atol=1e-4)

    # TODO(synk): beam search / greedy decode paths (data-dependent control flow,
    # priority queues) are host-side logic and are not expressed as a kernel.
    assert proba.shape == (B, T, V)
    print("KERNEL_OK")
</pallas_src>

<mosaic_0001>
module attributes {stable_mosaic.version = 11 : i64} {
  func.func @kernel(%arg0: memref<2x8xi32, #tpu.memory_space<vmem>>, %arg1: memref<2x8xi32, #tpu.memory_space<vmem>>, %arg2: memref<2x8xf32, #tpu.memory_space<vmem>>, %arg3: memref<2x8xf32, #tpu.memory_space<vmem>>, %arg4: memref<128x384xf32, #tpu.memory_space<vmem>>, %arg5: memref<128x384xf32, #tpu.memory_space<vmem>>, %arg6: memref<1x384xf32, #tpu.memory_space<vmem>>, %arg7: memref<1x128xf32, #tpu.memory_space<vmem>>, %arg8: memref<128x384xf32, #tpu.memory_space<vmem>>, %arg9: memref<128x384xf32, #tpu.memory_space<vmem>>, %arg10: memref<1x384xf32, #tpu.memory_space<vmem>>, %arg11: memref<1x128xf32, #tpu.memory_space<vmem>>, %arg12: memref<128x128xf32, #tpu.memory_space<vmem>>, %arg13: memref<8x128xf32, #tpu.memory_space<vmem>>, %arg14: memref<8x128xf32, #tpu.memory_space<vmem>>, %arg15: memref<1x128xf32, #tpu.memory_space<vmem>>, %arg16: memref<128x128xf32, #tpu.memory_space<vmem>>, %arg17: memref<1x128xf32, #tpu.memory_space<vmem>>, %arg18: memref<16x128xf32, #tpu.memory_space<vmem>>, %arg19: memref<64x384xf32, #tpu.memory_space<vmem>>, %arg20: memref<64x384xf32, #tpu.memory_space<vmem>>) attributes {dimension_semantics = [], scalar_prefetch = 0 : i64, scratch_operands = 2 : i64, tpu.core_type = #tpu.core_type<tc>} {
    %0 = tpu.iota {dimensions = array<i32: 1>} : vector<8x128xi32>
    %c0 = arith.constant 0 : index
    %c0_0 = arith.constant 0 : index
    %1 = vector.load %arg0[%c0, %c0_0] : memref<2x8xi32, #tpu.memory_space<vmem>>, vector<2x8xi32>
    %c0_i32 = arith.constant 0 : i32
    %2 = vector.broadcast %c0_i32 : i32 to vector<6x8xi32>
    %3 = tpu.concatenate %1, %2 in 0 : vector<2x8xi32>, vector<6x8xi32> -> vector<8x8xi32>
    %c0_1 = arith.constant 0 : index
    %c0_2 = arith.constant 0 : index
    %4 = vector.load %arg1[%c0_1, %c0_2] : memref<2x8xi32, #tpu.memory_space<vmem>>, vector<2x8xi32>
    %c0_i32_3 = arith.constant 0 : i32
    %5 = vector.broadcast %c0_i32_3 : i32 to vector<6x8xi32>
    %6 = tpu.concatenate %4, %5 in 0 : vector<2x8xi32>, vector<6x8xi32> -> vector<8x8xi32>
    %7 = vector.extract_strided_slice %3 {offsets = [0, 0], sizes = [8, 1], strides = [1, 1]} : vector<8x8xi32> to vector<8x1xi32>
    %8 = vector.broadcast %7 : vector<8x1xi32> to vector<8x128xi32>
    %9 = arith.cmpi eq, %0, %8 : vector<8x128xi32>
    %cst = arith.constant 1.000000e+00 : f32
    %cst_4 = arith.constant 0.000000e+00 : f32
    %10 = vector.broadcast %cst : f32 to vector<8x128xf32>
    %11 = vector.broadcast %cst_4 : f32 to vector<8x128xf32>
    %12 = arith.select %9, %10, %11 : vector<8x128xi1>, vector<8x128xf32>
    %13 = vector.extract_strided_slice %3 {offsets = [0, 1], sizes = [8, 1], strides = [1, 1]} : vector<8x8xi32> to vector<8x1xi32>
    %14 = vector.broadcast %13 : vector<8x1xi32> to vector<8x128xi32>
    %15 = arith.cmpi eq, %0, %14 : vector<8x128xi32>
    %cst_5 = arith.constant 1.000000e+00 : f32
    %cst_6 = arith.constant 0.000000e+00 : f32
    %16 = vector.broadcast %cst_5 : f32 to vector<8x128xf32>
    %17 = vector.broadcast %cst_6 : f32 to vector<8x128xf32>
    %18 = arith.select %15, %16, %17 : vector<8x128xi1>, vector<8x128xf32>
    %19 = vector.extract_strided_slice %3 {offsets = [0, 2], sizes = [8, 1], strides = [1, 1]} : vector<8x8xi32> to vector<8x1xi32>
    %20 = vector.broadcast %19 : vector<8x1xi32> to vector<8x128xi32>
    %21 = arith.cmpi eq, %0, %20 : vector<8x128xi32>
    %cst_7 = arith.constant 1.000000e+00 : f32
    %cst_8 = arith.constant 0.000000e+00 : f32
    %22 = vector.broadcast %cst_7 : f32 to vector<8x128xf32>
    %23 = vector.broadcast %cst_8 : f32 to vector<8x128xf32>
    %24 = arith.select %21, %22, %23 : vector<8x128xi1>, vector<8x128xf32>
    %25 = vector.extract_strided_slice %3 {offsets = [0, 3], sizes = [8, 1], strides = [1, 1]} : vector<8x8xi32> to vector<8x1xi32>
    %26 = vector.broadcast %25 : vector<8x1xi32> to vector<8x128xi32>
    %27 = arith.cmpi eq, %0, %26 : vector<8x128xi32>
    %cst_9 = arith.constant 1.000000e+00 : f32
    %cst_10 = arith.constant 0.000000e+00 : f32
    %28 = vector.broadcast %cst_9 : f32 to vector<8x128xf32>
    %29 = vector.broadcast %cst_10 : f32 to vector<8x128xf32>
    %30 = arith.select %27, %28, %29 : vector<8x128xi1>, vector<8x128xf32>
    %31 = vector.extract_strided_slice %3 {offsets = [0, 4], sizes = [8, 1], strides = [1, 1]} : vector<8x8xi32> to vector<8x1xi32>
    %32 = vector.broadcast %31 : vector<8x1xi32> to vector<8x128xi32>
    %33 = arith.cmpi eq, %0, %32 : vector<8x128xi32>
    %cst_11 = arith.constant 1.000000e+00 : f32
    %cst_12 = arith.constant 0.000000e+00 : f32
    %34 = vector.broadcast %cst_11 : f32 to vector<8x128xf32>
    %35 = vector.broadcast %cst_12 : f32 to vector<8x128xf32>
    %36 = arith.select %33, %34, %35 : vector<8x128xi1>, vector<8x128xf32>
    %37 = vector.extract_strided_slice %3 {offsets = [0, 5], sizes = [8, 1], strides = [1, 1]} : vector<8x8xi32> to vector<8x1xi32>
    %38 = vector.broadcast %37 : vector<8x1xi32> to vector<8x128xi32>
    %39 = arith.cmpi eq, %0, %38 : vector<8x128xi32>
    %cst_13 = arith.constant 1.000000e+00 : f32
    %cst_14 = arith.constant 0.000000e+00 : f32
    %40 = vector.broadcast %cst_13 : f32 to vector<8x128xf32>
    %41 = vector.broadcast %cst_14 : f32 to vector<8x128xf32>
    %42 = arith.select %39, %40, %41 : vector<8x128xi1>, vector<8x128xf32>
    %43 = vector.extract_strided_slice %3 {offsets = [0, 6], sizes = [8, 1], strides = [1, 1]} : vector<8x8xi32> to vector<8x1xi32>
    %44 = vector.broadcast %43 : vector<8x1xi32> to vector<8x128xi32>
    %45 = arith.cmpi eq, %0, %44 : vector<8x128xi32>
    %cst_15 = arith.constant 1.000000e+00 : f32
    %cst_16 = arith.constant 0.000000e+00 : f32
    %46 = vector.broadcast %cst_15 : f32 to vector<8x128xf32>
    %47 = vector.broadcast %cst_16 : f32 to vector<8x128xf32>
    %48 = arith.select %45, %46, %47 : vector<8x128xi1>, vector<8x128xf32>
    %49 = vector.extract_strided_slice %3 {offsets = [0, 7], sizes = [8, 1], strides = [1, 1]} : vector<8x8xi32> to vector<8x1xi32>
    %50 = vector.broadcast %49 : vector<8x1xi32> to vector<8x128xi32>
    %51 = arith.cmpi eq, %0, %50 : vector<8x128xi32>
    %cst_17 = arith.constant 1.000000e+00 : f32
    %cst_18 = arith.constant 0.000000e+00 : f32
    %52 = vector.broadcast %cst_17 : f32 to vector<8x128xf32>
    %53 = vector.broadcast %cst_18 : f32 to vector<8x128xf32>
    %54 = arith.select %51, %52, %53 : vector<8x128xi1>, vector<8x128xf32>
    %55 = tpu.concatenate %12, %18, %24, %30, %36, %42, %48, %54 in 0 : vector<8x128xf32>, vector<8x128xf32>, vector<8x128xf32>, vector<8x128xf32>, vector<8x128xf32>, vector<8x128xf32>, vector<8x128xf32>, vector<8x128xf32> -> vector<64x128xf32>
    %c0_i32_19 = arith.constant 0 : i32
    %56 = vector.broadcast %c0_i32_19 : i32 to vector<8x128xi32>
    %57 = arith.cmpi eq, %0, %56 : vector<8x128xi32>
    %cst_20 = arith.constant 1.000000e+00 : f32
    %cst_21 = arith.constant 0.000000e+00 : f32
    %58 = vector.broadcast %cst_20 : f32 to vector<8x128xf32>
    %59 = vector.broadcast %cst_21 : f32 to vector<8x128xf32>
    %60 = arith.select %57, %58, %59 : vector<8x128xi1>, vector<8x128xf32>
    %61 = vector.extract_strided_slice %6 {offsets = [0, 0], sizes = [8, 1], strides = [1, 1]} : vector<8x8xi32> to vector<8x1xi32>
    %62 = vector.broadcast %61 : vector<8x1xi32> to vector<8x128xi32>
    %63 = arith.cmpi eq, %0, %62 : vector<8x128xi32>
    %cst_22 = arith.constant 1.000000e+00 : f32
    %cst_23 = arith.constant 0.000000e+00 : f32
    %64 = vector.broadcast %cst_22 : f32 to vector<8x128xf32>
    %65 = vector.broadcast %cst_23 : f32 to vector<8x128xf32>
    %66 = arith.select %63, %64, %65 : vector<8x128xi1>, vector<8x128xf32>
    %67 = vector.extract_strided_slice %6 {offsets = [0, 1], sizes = [8, 1], strides = [1, 1]} : vector<8x8xi32> to vector<8x1xi32>
    %68 = vector.broadcast %67 : vector<8x1xi32> to vector<8x128xi32>
    %69 = arith.cmpi eq, %0, %68 : vector<8x128xi32>
    %cst_24 = arith.constant 1.000000e+00 : f32
    %cst_25 = arith.constant 0.000000e+00 : f32
    %70 = vector.broadcast %cst_24 : f32 to vector<8x128xf32>
    %71 = vector.broadcast %cst_25 : f32 to vector<8x128xf32>
    %72 = arith.select %69, %70, %71 : vector<8x128xi1>, vector<8x128xf32>
    %73 = vector.extract_strided_slice %6 {offsets = [0, 2], sizes = [8, 1], strides = [1, 1]} : vector<8x8xi32> to vector<8x1xi32>
    %74 = vector.broadcast %73 : vector<8x1xi32> to vector<8x128xi32>
    %75 = arith.cmpi eq, %0, %74 : vector<8x128xi32>
    %cst_26 = arith.constant 1.000000e+00 : f32
    %cst_27 = arith.constant 0.000000e+00 : f32
    %76 = vector.broadcast %cst_26 : f32 to vector<8x128xf32>
    %77 = vector.broadcast %cst_27 : f32 to vector<8x128xf32>
    %78 = arith.select %75, %76, %77 : vector<8x128xi1>, vector<8x128xf32>
    %79 = vector.extract_strided_slice %6 {offsets = [0, 3], sizes = [8, 1], strides = [1, 1]} : vector<8x8xi32> to vector<8x1xi32>
    %80 = vector.broadcast %79 : vector<8x1xi32> to vector<8x128xi32>
    %81 = arith.cmpi eq, %0, %80 : vector<8x128xi32>
    %cst_28 = arith.constant 1.000000e+00 : f32
    %cst_29 = arith.constant 0.000000e+00 : f32
    %82 = vector.broadcast %cst_28 : f32 to vector<8x128xf32>
    %83 = vector.broadcast %cst_29 : f32 to vector<8x128xf32>
    %84 = arith.select %81, %82, %83 : vector<8x128xi1>, vector<8x128xf32>
    %85 = vector.extract_strided_slice %6 {offsets = [0, 4], sizes = [8, 1], strides = [1, 1]} : vector<8x8xi32> to vector<8x1xi32>
    %86 = vector.broadcast %85 : vector<8x1xi32> to vector<8x128xi32>
    %87 = arith.cmpi eq, %0, %86 : vector<8x128xi32>
    %cst_30 = arith.constant 1.000000e+00 : f32
    %cst_31 = arith.constant 0.000000e+00 : f32
    %88 = vector.broadcast %cst_30 : f32 to vector<8x128xf32>
    %89 = vector.broadcast %cst_31 : f32 to vector<8x128xf32>
    %90 = arith.select %87, %88, %89 : vector<8x128xi1>, vector<8x128xf32>
    %91 = vector.extract_strided_slice %6 {offsets = [0, 5], sizes = [8, 1], strides = [1, 1]} : vector<8x8xi32> to vector<8x1xi32>
    %92 = vector.broadcast %91 : vector<8x1xi32> to vector<8x128xi32>
    %93 = arith.cmpi eq, %0, %92 : vector<8x128xi32>
    %cst_32 = arith.constant 1.000000e+00 : f32
    %cst_33 = arith.constant 0.000000e+00 : f32
    %94 = vector.broadcast %cst_32 : f32 to vector<8x128xf32>
    %95 = vector.broadcast %cst_33 : f32 to vector<8x128xf32>
    %96 = arith.select %93, %94, %95 : vector<8x128xi1>, vector<8x128xf32>
    %97 = vector.extract_strided_slice %6 {offsets = [0, 6], sizes = [8, 1], strides = [1, 1]} : vector<8x8xi32> to vector<8x1xi32>
    %98 = vector.broadcast %97 : vector<8x1xi32> to vector<8x128xi32>
    %99 = arith.cmpi eq, %0, %98 : vector<8x128xi32>
    %cst_34 = arith.constant 1.000000e+00 : f32
    %cst_35 = arith.constant 0.000000e+00 : f32
    %100 = vector.broadcast %cst_34 : f32 to vector<8x128xf32>
    %101 = vector.broadcast %cst_35 : f32 to vector<8x128xf32>
    %102 = arith.select %99, %100, %101 : vector<8x128xi1>, vector<8x128xf32>
    %103 = tpu.concatenate %60, %66, %72, %78, %84, %90, %96, %102 in 0 : vector<8x128xf32>, vector<8x128xf32>, vector<8x128xf32>, vector<8x128xf32>, vector<8x128xf32>, vector<8x128xf32>, vector<8x128xf32>, vector<8x128xf32> -> vector<64x128xf32>
    %c0_36 = arith.constant 0 : index
    %c0_37 = arith.constant 0 : index
    %104 = vector.load %arg4[%c0_36, %c0_37] : memref<128x384xf32, #tpu.memory_space<vmem>>, vector<128x384xf32>
    %cst_38 = arith.constant dense<0.000000e+00> : vector<64x384xf32>
    %105 = tpu.matmul %55, %104, %cst_38 {dimension_numbers = #tpu.dot_dimension_numbers<[1], [0], [0], [1], [0, 0, 1, 1], [], []>} : vector<64x128xf32>, vector<128x384xf32>, vector<64x384xf32> -> vector<64x384xf32>
    %c0_39 = arith.constant 0 : index
    %c0_40 = arith.constant 0 : index
    %106 = vector.load %arg6[%c0_39, %c0_40] : memref<1x384xf32, #tpu.memory_space<vmem>>, vector<1x384xf32>
    %107 = vector.broadcast %106 : vector<1x384xf32> to vector<64x384xf32>
    %108 = arith.addf %105, %107 : vector<64x384xf32>
    %c0_41 = arith.constant 0 : index
    %c0_42 = arith.constant 0 : index
    %109 = vector.load %arg19[%c0_41, %c0_42] : memref<64x384xf32, #tpu.memory_space<vmem>>, vector<64x384xf32>
    tpu.vector_store %arg19[%c0_41, %c0_42], %108 {strides = array<i32>} : memref<64x384xf32, #tpu.memory_space<vmem>>, vector<64x384xf32>,
    %c0_43 = arith.constant 0 : index
    %c0_44 = arith.constant 0 : index
    %110 = vector.load %arg8[%c0_43, %c0_44] : memref<128x384xf32, #tpu.memory_space<vmem>>, vector<128x384xf32>
    %cst_45 = arith.constant dense<0.000000e+00> : vector<64x384xf32>
    %111 = tpu.matmul %103, %110, %cst_45 {dimension_numbers = #tpu.dot_dimension_numbers<[1], [0], [0], [1], [0, 0, 1, 1], [], []>} : vector<64x128xf32>, vector<128x384xf32>, vector<64x384xf32> -> vector<64x384xf32>
    %c0_46 = arith.constant 0 : index
    %c0_47 = arith.constant 0 : index
    %112 = vector.load %arg10[%c0_46, %c0_47] : memref<1x384xf32, #tpu.memory_space<vmem>>, vector<1x384xf32>
    %113 = vector.broadcast %112 : vector<1x384xf32> to vector<64x384xf32>
    %114 = arith.addf %111, %113 : vector<64x384xf32>
    %c0_48 = arith.constant 0 : index
    %c0_49 = arith.constant 0 : index
    %115 = vector.load %arg20[%c0_48, %c0_49] : memref<64x384xf32, #tpu.memory_space<vmem>>, vector<64x384xf32>
    tpu.vector_store %arg20[%c0_48, %c0_49], %114 {strides = array<i32>} : memref<64x384xf32, #tpu.memory_space<vmem>>, vector<64x384xf32>,
    %c0_50 = arith.constant 0 : index
    %c0_51 = arith.constant 0 : index
    %116 = vector.load %arg2[%c0_50, %c0_51] : memref<2x8xf32, #tpu.memory_space<vmem>>, vector<2x8xf32>
    %c0_52 = arith.constant 0 : index
    %c0_53 = arith.constant 0 : index
    %117 = vector.load %arg13[%c0_52, %c0_53] : memref<8x128xf32, #tpu.memory_space<vmem>>, vector<8x128xf32>
    %cst_54 = arith.constant dense<0.000000e+00> : vector<2x128xf32>
    %118 = tpu.matmul %116, %117, %cst_54 {dimension_numbers = #tpu.dot_dimension_numbers<[1], [0], [0], [1], [0, 0, 1, 1], [], []>} : vector<2x8xf32>, vector<8x128xf32>, vector<2x128xf32> -> vector<2x128xf32>
    %c0_55 = arith.constant 0 : index
    %c0_56 = arith.constant 0 : index
    %119 = vector.load %arg3[%c0_55, %c0_56] : memref<2x8xf32, #tpu.memory_space<vmem>>, vector<2x8xf32>
    %c0_57 = arith.constant 0 : index
    %c0_58 = arith.constant 0 : index
    %120 = vector.load %arg14[%c0_57, %c0_58] : memref<8x128xf32, #tpu.memory_space<vmem>>, vector<8x128xf32>
    %cst_59 = arith.constant dense<0.000000e+00> : vector<2x128xf32>
    %121 = tpu.matmul %119, %120, %cst_59 {dimension_numbers = #tpu.dot_dimension_numbers<[1], [0], [0], [1], [0, 0, 1, 1], [], []>} : vector<2x8xf32>, vector<8x128xf32>, vector<2x128xf32> -> vector<2x128xf32>
    %122 = arith.addf %118, %121 : vector<2x128xf32>
    %c0_60 = arith.constant 0 : index
    %c0_61 = arith.constant 0 : index
    %123 = vector.load %arg15[%c0_60, %c0_61] : memref<1x128xf32, #tpu.memory_space<vmem>>, vector<1x128xf32>
    %124 = vector.broadcast %123 : vector<1x128xf32> to vector<2x128xf32>
    %125 = arith.addf %122, %124 : vector<2x128xf32>
    %cst_62 = arith.constant 0.000000e+00 : f32
    %126 = vector.broadcast %cst_62 : f32 to vector<6x128xf32>
    %127 = tpu.concatenate %125, %126 in 0 : vector<2x128xf32>, vector<6x128xf32> -> vector<8x128xf32>
    %c0_63 = arith.constant 0 : index
    %c0_64 = arith.constant 0 : index
    %128 = vector.load %arg7[%c0_63, %c0_64] : memref<1x128xf32, #tpu.memory_space<vmem>>, vector<1x128xf32>
    %c0_65 = arith.constant 0 : index
    %c0_66 = arith.constant 0 : index
    %129 = vector.load %arg11[%c0_65, %c0_66] : memref<1x128xf32, #tpu.memory_space<vmem>>, vector<1x128xf32>
    %cst_67 = arith.constant 0.000000e+00 : f32
    %130 = vector.broadcast %cst_67 : f32 to vector<8x128xf32>
    %c0_68 = arith.constant 0 : index
    %c0_69 = arith.constant 0 : index
    %131 = vector.load %arg19[%c0_68, %c0_69] : memref<64x384xf32, #tpu.memory_space<vmem>>, vector<8x384xf32>
    %c0_70 = arith.constant 0 : index
    %c0_71 = arith.constant 0 : index
    %132 = vector.load %arg5[%c0_70, %c0_71] : memref<128x384xf32, #tpu.memory_space<vmem>>, vector<128x384xf32>
    %cst_72 = arith.constant dense<0.000000e+00> : vector<8x384xf32>
    %133 = tpu.matmul %130, %132, %cst_72 {dimension_numbers = #tpu.dot_dimension_numbers<[1], [0], [0], [1], [0, 0, 1, 1], [], []>} : vector<8x128xf32>, vector<128x384xf32>, vector<8x384xf32> -> vector<8x384xf32>
    %134 = vector.extract_strided_slice %131 {offsets = [0, 0], sizes = [8, 128], strides = [1, 1]} : vector<8x384xf32> to vector<8x128xf32>
    %135 = vector.extract_strided_slice %133 {offsets = [0, 0], sizes = [8, 128], strides = [1, 1]} : vector<8x384xf32> to vector<8x128xf32>
    %136 = arith.addf %134, %135 : vector<8x128xf32>
    %137 = arith.negf %136 : vector<8x128xf32>
    %138 = math.exp %137 : vector<8x128xf32>
    %cst_73 = arith.constant 1.000000e+00 : f32
    %139 = vector.broadcast %cst_73 : f32 to vector<8x128xf32>
    %140 = arith.addf %139, %138 : vector<8x128xf32>
    %141 = arith.divf %139, %140 : vector<8x128xf32>
    %142 = vector.extract_strided_slice %131 {offsets = [0, 128], sizes = [8, 128], strides = [1, 1]} : vector<8x384xf32> to vector<8x128xf32>
    %143 = vector.extract_strided_slice %133 {offsets = [0, 128], sizes = [8, 128], strides = [1, 1]} : vector<8x384xf32> to vector<8x128xf32>
    %144 = arith.addf %142, %143 : vector<8x128xf32>
    %145 = arith.negf %144 : vector<8x128xf32>
    %146 = math.exp %145 : vector<8x128xf32>
    %cst_74 = arith.constant 1.000000e+00 : f32
    %147 = vector.broadcast %cst_74 : f32 to vector<8x128xf32>
    %148 = arith.addf %147, %146 : vector<8x128xf32>
    %149 = arith.divf %147, %148 : vector<8x128xf32>
    %150 = vector.extract_strided_slice %131 {offsets = [0, 256], sizes = [8, 128], strides = [1, 1]} : vector<8x384xf32> to vector<8x128xf32>
    %151 = vector.extract_strided_slice %133 {offsets = [0, 256], sizes = [8, 128], strides = [1, 1]} : vector<8x384xf32> to vector<8x128xf32>
    %152 = vector.broadcast %128 : vector<1x128xf32> to vector<8x128xf32>
    %153 = arith.addf %151, %152 : vector<8x128xf32>
    %154 = arith.mulf %141, %153 : vector<8x128xf32>
    %155 = arith.addf %150, %154 : vector<8x128xf32>
    %156 = math.tanh %155 : vector<8x128xf32>
    %cst_75 = arith.constant 1.000000e+00 : f32
    %157 = vector.broadcast %cst_75 : f32 to vector<8x128xf32>
    %158 = arith.subf %157, %149 : vector<8x128xf32>
    %159 = arith.mulf %158, %156 : vector<8x128xf32>
    %160 = arith.mulf %149, %130 : vector<8x128xf32>
    %161 = arith.addf %159, %160 : vector<8x128xf32>
    %c8 = arith.constant 8 : index
    %c0_76 = arith.constant 0 : index
    %162 = vector.load %arg19[%c8, %c0_76] : memref<64x384xf32, #tpu.memory_space<vmem>>, vector<8x384xf32>
    %c0_77 = arith.constant 0 : index
    %c0_78 = arith.constant 0 : index
    %163 = vector.load %arg5[%c0_77, %c0_78] : memref<128x384xf32, #tpu.memory_space<vmem>>, vector<128x384xf32>
    %cst_79 = arith.constant dense<0.000000e+00> : vector<8x384xf32>
    %164 = tpu.matmul %161, %163, %cst_79 {dimension_numbers = #tpu.dot_dimension_numbers<[1], [0], [0], [1], [0, 0, 1, 1], [], []>} : vector<8x128xf32>, vector<128x384xf32>, vector<8x384xf32> -> vector<8x384xf32>
    %165 = vector.extract_strided_slice %162 {offsets = [0, 0], sizes = [8, 128], strides = [1, 1]} : vector<8x384xf32> to vector<8x128xf32>
    %166 = vector.extract_strided_slice %164 {offsets = [0, 0], sizes = [8, 128], strides = [1, 1]} : vector<8x384xf32> to vector<8x128xf32>
    %167 = arith.addf %165, %166 : vector<8x128xf32>
    %168 = arith.negf %167 : vector<8x128xf32>
    %169 = math.exp %168 : vector<8x128xf32>
    %cst_80 = arith.constant 1.000000e+00 : f32
    %170 = vector.broadcast %cst_80 : f32 to vector<8x128xf32>
    %171 = arith.addf %170, %169 : vector<8x128xf32>
    %172 = arith.divf %170, %171 : vector<8x128xf32>
    %173 = vector.extract_strided_slice %162 {offsets = [0, 128], sizes = [8, 128], strides = [1, 1]} : vector<8x384xf32> to vector<8x128xf32>
    %174 = vector.extract_strided_slice %164 {offsets = [0, 128], sizes = [8, 128], strides = [1, 1]} : vector<8x384xf32> to vector<8x128xf32>
    %175 = arith.addf %173, %174 : vector<8x128xf32>
    %176 = arith.negf %175 : vector<8x128xf32>
    %177 = math.exp %176 : vector<8x128xf32>
    %cst_81 = arith.constant 1.000000e+00 : f32
    %178 = vector.broadcast %cst_81 : f32 to vector<8x128xf32>
    %179 = arith.addf %178, %177 : vector<8x128xf32>
    %180 = arith.divf %178, %179 : vector<8x128xf32>
    %181 = vector.extract_strided_slice %162 {offsets = [0, 256], sizes = [8, 128], strides = [1, 1]} : vector<8x384xf32> to vector<8x128xf32>
    %182 = vector.extract_strided_slice %164 {offsets = [0, 256], sizes = [8, 128], strides = [1, 1]} : vector<8x384xf32> to vector<8x128xf32>
    %183 = vector.broadcast %128 : vector<1x128xf32> to vector<8x128xf32>
    %184 = arith.addf %182, %183 : vector<8x128xf32>
    %185 = arith.mulf %172, %184 : vector<8x128xf32>
    %186 = arith.addf %181, %185 : vector<8x128xf32>
    %187 = math.tanh %186 : vector<8x128xf32>
    %cst_82 = arith.constant 1.000000e+00 : f32
    %188 = vector.broadcast %cst_82 : f32 to vector<8x128xf32>
    %189 = arith.subf %188, %180 : vector<8x128xf32>
    %190 = arith.mulf %189, %187 : vector<8x128xf32>
    %191 = arith.mulf %180, %161 : vector<8x128xf32>
    %192 = arith.addf %190, %191 : vector<8x128xf32>
    %c16 = arith.constant 16 : index
    %c0_83 = arith.constant 0 : index
    %193 = vector.load %arg19[%c16, %c0_83] : memref<64x384xf32, #tpu.memory_space<vmem>>, vector<8x384xf32>
    %c0_84 = arith.constant 0 : index
    %c0_85 = arith.constant 0 : index
    %194 = vector.load %arg5[%c0_84, %c0_85] : memref<128x384xf32, #tpu.memory_space<vmem>>, vector<128x384xf32>
    %cst_86 = arith.constant dense<0.000000e+00> : vector<8x384xf32>
    %195 = tpu.matmul %192, %194, %cst_86 {dimension_numbers = #tpu.dot_dimension_numbers<[1], [0], [0], [1], [0, 0, 1, 1], [], []>} : vector<8x128xf32>, vector<128x384xf32>, vector<8x384xf32> -> vector<8x384xf32>
    %196 = vector.extract_strided_slice %193 {offsets = [0, 0], sizes = [8, 128], strides = [1, 1]} : vector<8x384xf32> to vector<8x128xf32>
    %197 = vector.extract_strided_slice %195 {offsets = [0, 0], sizes = [8, 128], strides = [1, 1]} : vector<8x384xf32> to vector<8x128xf32>
    %198 = arith.addf %196, %197 : vector<8x128xf32>
    %199 = arith.negf %198 : vector<8x128xf32>
    %200 = math.exp %199 : vector<8x128xf32>
    %cst_87 = arith.constant 1.000000e+00 : f32
    %201 = vector.broadcast %cst_87 : f32 to vector<8x128xf32>
    %202 = arith.addf %201, %200 : vector<8x128xf32>
    %203 = arith.divf %201, %202 : vector<8x128xf32>
    %204 = vector.extract_strided_slice %193 {offsets = [0, 128], sizes = [8, 128], strides = [1, 1]} : vector<8x384xf32> to vector<8x128xf32>
    %205 = vector.extract_strided_slice %195 {offsets = [0, 128], sizes = [8, 128], strides = [1, 1]} : vector<8x384xf32> to vector<8x128xf32>
    %206 = arith.addf %204, %205 : vector<8x128xf32>
    %207 = arith.negf %206 : vector<8x128xf32>
    %208 = math.exp %207 : vector<8x128xf32>
    %cst_88 = arith.constant 1.000000e+00 : f32
    %209 = vector.broadcast %cst_88 : f32 to vector<8x128xf32>
    %210 = arith.addf %209, %208 : vector<8x128xf32>
    %211 = arith.divf %209, %210 : vector<8x128xf32>
    %212 = vector.extract_strided_slice %193 {offsets = [0, 256], sizes = [8, 128], strides = [1, 1]} : vector<8x384xf32> to vector<8x128xf32>
    %213 = vector.extract_strided_slice %195 {offsets = [0, 256], sizes = [8, 128], strides = [1, 1]} : vector<8x384xf32> to vector<8x128xf32>
    %214 = vector.broadcast %128 : vector<1x128xf32> to vector<8x128xf32>
    %215 = arith.addf %213, %214 : vector<8x128xf32>
    %216 = arith.mulf %203, %215 : vector<8x128xf32>
    %217 = arith.addf %212, %216 : vector<8x128xf32>
    %218 = math.tanh %217 : vector<8x128xf32>
    %cst_89 = arith.constant 1.000000e+00 : f32
    %219 = vector.broadcast %cst_89 : f32 to vector<8x128xf32>
    %220 = arith.subf %219, %211 : vector<8x128xf32>
    %221 = arith.mulf %220, %218 : vector<8x128xf32>
    %222 = arith.mulf %211, %192 : vector<8x128xf32>
    %223 = arith.addf %221, %222 : vector<8x128xf32>
    %c24 = arith.constant 24 : index
    %c0_90 = arith.constant 0 : index
    %224 = vector.load %arg19[%c24, %c0_90] : memref<64x384xf32, #tpu.memory_space<vmem>>, vector<8x384xf32>
    %c0_91 = arith.constant 0 : index
    %c0_92 = arith.constant 0 : index
    %225 = vector.load %arg5[%c0_91, %c0_92] : memref<128x384xf32, #tpu.memory_space<vmem>>, vector<128x384xf32>
    %cst_93 = arith.constant dense<0.000000e+00> : vector<8x384xf32>
    %226 = tpu.matmul %223, %225, %cst_93 {dimension_numbers = #tpu.dot_dimension_numbers<[1], [0], [0], [1], [0, 0, 1, 1], [], []>} : vector<8x128xf32>, vector<128x384xf32>, vector<8x384xf32> -> vector<8x384xf32>
    %227 = vector.extract_strided_slice %224 {offsets = [0, 0], sizes = [8, 128], strides = [1, 1]} : vector<8x384xf32> to vector<8x128xf32>
    %228 = vector.extract_strided_slice %226 {offsets = [0, 0], sizes = [8, 128], strides = [1, 1]} : vector<8x384xf32> to vector<8x128xf32>
    %229 = arith.addf %227, %228 : vector<8x128xf32>
    %230 = arith.negf %229 : vector<8x128xf32>
    %231 = math.exp %230 : vector<8x128xf32>
    %cst_94 = arith.constant 1.000000e+00 : f32
    %232 = vector.broadcast %cst_94 : f32 to vector<8x128xf32>
    %233 = arith.addf %232, %231 : vector<8x128xf32>
    %234 = arith.divf %232, %233 : vector<8x128xf32>
    %235 = vector.extract_strided_slice %224 {offsets = [0, 128], sizes = [8, 128], strides = [1, 1]} : vector<8x384xf32> to vector<8x128xf32>
    %236 = vector.extract_strided_slice %226 {offsets = [0, 128], sizes = [8, 128], strides = [1, 1]} : vector<8x384xf32> to vector<8x128xf32>
    %237 = arith.addf %235, %236 : vector<8x128xf32>
    %238 = arith.negf %237 : vector<8x128xf32>
    %239 = math.exp %238 : vector<8x128xf32>
    %cst_95 = arith.constant 1.000000e+00 : f32
    %240 = vector.broadcast %cst_95 : f32 to vector<8x128xf32>
    %241 = arith.addf %240, %239 : vector<8x128xf32>
    %242 = arith.divf %240, %241 : vector<8x128xf32>
    %243 = vector.extract_strided_slice %224 {offsets = [0, 256], sizes = [8, 128], strides = [1, 1]} : vector<8x384xf32> to vector<8x128xf32>
    %244 = vector.extract_strided_slice %226 {offsets = [0, 256], sizes = [8, 128], strides = [1, 1]} : vector<8x384xf32> to vector<8x128xf32>
    %245 = vector.broadcast %128 : vector<1x128xf32> to vector<8x128xf32>
    %246 = arith.addf %244, %245 : vector<8x128xf32>
    %247 = arith.mulf %234, %246 : vector<8x128xf32>
    %248 = arith.addf %243, %247 : vector<8x128xf32>
    %249 = math.tanh %248 : vector<8x128xf32>
    %cst_96 = arith.constant 1.000000e+00 : f32
    %250 = vector.broadcast %cst_96 : f32 to vector<8x128xf32>
    %251 = arith.subf %250, %242 : vector<8x128xf32>
    %252 = arith.mulf %251, %249 : vector<8x128xf32>
    %253 = arith.mulf %242, %223 : vector<8x128xf32>
    %254 = arith.addf %252, %253 : vector<8x128xf32>
    %c32 = arith.constant 32 : index
    %c0_97 = arith.constant 0 : index
    %255 = vector.load %arg19[%c32, %c0_97] : memref<64x384xf32, #tpu.memory_space<vmem>>, vector<8x384xf32>
    %c0_98 = arith.constant 0 : index
    %c0_99 = arith.constant 0 : index
    %256 = vector.load %arg5[%c0_98, %c0_99] : memref<128x384xf32, #tpu.memory_space<vmem>>, vector<128x384xf32>
    %cst_100 = arith.constant dense<0.000000e+00> : vector<8x384xf32>
    %257 = tpu.matmul %254, %256, %cst_100 {dimension_numbers = #tpu.dot_dimension_numbers<[1], [0], [0], [1], [0, 0, 1, 1], [], []>} : vector<8x128xf32>, vector<128x384xf32>, vector<8x384xf32> -> vector<8x384xf32>
    %258 = vector.extract_strided_slice %255 {offsets = [0, 0], sizes = [8, 128], strides = [1, 1]} : vector<8x384xf32> to vector<8x128xf32>
    %259 = vector.extract_strided_slice %257 {offsets = [0, 0], sizes = [8, 128], strides = [1, 1]} : vector<8x384xf32> to vector<8x128xf32>
    %260 = arith.addf %258, %259 : vector<8x128xf32>
    %261 = arith.negf %260 : vector<8x128xf32>
    %262 = math.exp %261 : vector<8x128xf32>
    %cst_101 = arith.constant 1.000000e+00 : f32
    %263 = vector.broadcast %cst_101 : f32 to vector<8x128xf32>
    %264 = arith.addf %263, %262 : vector<8x128xf32>
    %265 = arith.divf %263, %264 : vector<8x128xf32>
    %266 = vector.extract_strided_slice %255 {offsets = [0, 128], sizes = [8, 128], strides = [1, 1]} : vector<8x384xf32> to vector<8x128xf32>
    %267 = vector.extract_strided_slice %257 {offsets = [0, 128], sizes = [8, 128], strides = [1, 1]} : vector<8x384xf32> to vector<8x128xf32>
    %268 = arith.addf %266, %267 : vector<8x128xf32>
    %269 = arith.negf %268 : vector<8x128xf32>
    %270 = math.exp %269 : vector<8x128xf32>
    %cst_102 = arith.constant 1.000000e+00 : f32
    %271 = vector.broadcast %cst_102 : f32 to vector<8x128xf32>
    %272 = arith.addf %271, %270 : vector<8x128xf32>
    %273 = arith.divf %271, %272 : vector<8x128xf32>
    %274 = vector.extract_strided_slice %255 {offsets = [0, 256], sizes = [8, 128], strides = [1, 1]} : vector<8x384xf32> to vector<8x128xf32>
    %275 = vector.extract_strided_slice %257 {offsets = [0, 256], sizes = [8, 128], strides = [1, 1]} : vector<8x384xf32> to vector<8x128xf32>
    %276 = vector.broadcast %128 : vector<1x128xf32> to vector<8x128xf32>
    %277 = arith.addf %275, %276 : vector<8x128xf32>
    %278 = arith.mulf %265, %277 : vector<8x128xf32>
    %279 = arith.addf %274, %278 : vector<8x128xf32>
    %280 = math.tanh %279 : vector<8x128xf32>
    %cst_103 = arith.constant 1.000000e+00 : f32
    %281 = vector.broadcast %cst_103 : f32 to vector<8x128xf32>
    %282 = arith.subf %281, %273 : vector<8x128xf32>
    %283 = arith.mulf %282, %280 : vector<8x128xf32>
    %284 = arith.mulf %273, %254 : vector<8x128xf32>
    %285 = arith.addf %283, %284 : vector<8x128xf32>
    %c40 = arith.constant 40 : index
    %c0_104 = arith.constant 0 : index
    %286 = vector.load %arg19[%c40, %c0_104] : memref<64x384xf32, #tpu.memory_space<vmem>>, vector<8x384xf32>
    %c0_105 = arith.constant 0 : index
    %c0_106 = arith.constant 0 : index
    %287 = vector.load %arg5[%c0_105, %c0_106] : memref<128x384xf32, #tpu.memory_space<vmem>>, vector<128x384xf32>
    %cst_107 = arith.constant dense<0.000000e+00> : vector<8x384xf32>
    %288 = tpu.matmul %285, %287, %cst_107 {dimension_numbers = #tpu.dot_dimension_numbers<[1], [0], [0], [1], [0, 0, 1, 1], [], []>} : vector<8x128xf32>, vector<128x384xf32>, vector<8x384xf32> -> vector<8x384xf32>
    %289 = vector.extract_strided_slice %286 {offsets = [0, 0], sizes = [8, 128], strides = [1, 1]} : vector<8x384xf32> to vector<8x128xf32>
    %290 = vector.extract_strided_slice %288 {offsets = [0, 0], sizes = [8, 128], strides = [1, 1]} : vector<8x384xf32> to vector<8x128xf32>
    %291 = arith.addf %289, %290 : vector<8x128xf32>
    %292 = arith.negf %291 : vector<8x128xf32>
    %293 = math.exp %292 : vector<8x128xf32>
    %cst_108 = arith.constant 1.000000e+00 : f32
    %294 = vector.broadcast %cst_108 : f32 to vector<8x128xf32>
    %295 = arith.addf %294, %293 : vector<8x128xf32>
    %296 = arith.divf %294, %295 : vector<8x128xf32>
    %297 = vector.extract_strided_slice %286 {offsets = [0, 128], sizes = [8, 128], strides = [1, 1]} : vector<8x384xf32> to vector<8x128xf32>
    %298 = vector.extract_strided_slice %288 {offsets = [0, 128], sizes = [8, 128], strides = [1, 1]} : vector<8x384xf32> to vector<8x128xf32>
    %299 = arith.addf %297, %298 : vector<8x128xf32>
    %300 = arith.negf %299 : vector<8x128xf32>
    %301 = math.exp %300 : vector<8x128xf32>
    %cst_109 = arith.constant 1.000000e+00 : f32
    %302 = vector.broadcast %cst_109 : f32 to vector<8x128xf32>
    %303 = arith.addf %302, %301 : vector<8x128xf32>
    %304 = arith.divf %302, %303 : vector<8x128xf32>
    %305 = vector.extract_strided_slice %286 {offsets = [0, 256], sizes = [8, 128], strides = [1, 1]} : vector<8x384xf32> to vector<8x128xf32>
    %306 = vector.extract_strided_slice %288 {offsets = [0, 256], sizes = [8, 128], strides = [1, 1]} : vector<8x384xf32> to vector<8x128xf32>
    %307 = vector.broadcast %128 : vector<1x128xf32> to vector<8x128xf32>
    %308 = arith.addf %306, %307 : vector<8x128xf32>
    %309 = arith.mulf %296, %308 : vector<8x128xf32>
    %310 = arith.addf %305, %309 : vector<8x128xf32>
    %311 = math.tanh %310 : vector<8x128xf32>
    %cst_110 = arith.constant 1.000000e+00 : f32
    %312 = vector.broadcast %cst_110 : f32 to vector<8x128xf32>
    %313 = arith.subf %312, %304 : vector<8x128xf32>
    %314 = arith.mulf %313, %311 : vector<8x128xf32>
    %315 = arith.mulf %304, %285 : vector<8x128xf32>
    %316 = arith.addf %314, %315 : vector<8x128xf32>
    %c48 = arith.constant 48 : index
    %c0_111 = arith.constant 0 : index
    %317 = vector.load %arg19[%c48, %c0_111] : memref<64x384xf32, #tpu.memory_space<vmem>>, vector<8x384xf32>
    %c0_112 = arith.constant 0 : index
    %c0_113 = arith.constant 0 : index
    %318 = vector.load %arg5[%c0_112, %c0_113] : memref<128x384xf32, #tpu.memory_space<vmem>>, vector<128x384xf32>
    %cst_114 = arith.constant dense<0.000000e+00> : vector<8x384xf32>
    %319 = tpu.matmul %316, %318, %cst_114 {dimension_numbers = #tpu.dot_dimension_numbers<[1], [0], [0], [1], [0, 0, 1, 1], [], []>} : vector<8x128xf32>, vector<128x384xf32>, vector<8x384xf32> -> vector<8x384xf32>
    %320 = vector.extract_strided_slice %317 {offsets = [0, 0], sizes = [8, 128], strides = [1, 1]} : vector<8x384xf32> to vector<8x128xf32>
    %321 = vector.extract_strided_slice %319 {offsets = [0, 0], sizes = [8, 128], strides = [1, 1]} : vector<8x384xf32> to vector<8x128xf32>
    %322 = arith.addf %320, %321 : vector<8x128xf32>
    %323 = arith.negf %322 : vector<8x128xf32>
    %324 = math.exp %323 : vector<8x128xf32>
    %cst_115 = arith.constant 1.000000e+00 : f32
    %325 = vector.broadcast %cst_115 : f32 to vector<8x128xf32>
    %326 = arith.addf %325, %324 : vector<8x128xf32>
    %327 = arith.divf %325, %326 : vector<8x128xf32>
    %328 = vector.extract_strided_slice %317 {offsets = [0, 128], sizes = [8, 128], strides = [1, 1]} : vector<8x384xf32> to vector<8x128xf32>
    %329 = vector.extract_strided_slice %319 {offsets = [0, 128], sizes = [8, 128], strides = [1, 1]} : vector<8x384xf32> to vector<8x128xf32>
    %330 = arith.addf %328, %329 : vector<8x128xf32>
    %331 = arith.negf %330 : vector<8x128xf32>
    %332 = math.exp %331 : vector<8x128xf32>
    %cst_116 = arith.constant 1.000000e+00 : f32
    %333 = vector.broadcast %cst_116 : f32 to vector<8x128xf32>
    %334 = arith.addf %333, %332 : vector<8x128xf32>
    %335 = arith.divf %333, %334 : vector<8x128xf32>
    %336 = vector.extract_strided_slice %317 {offsets = [0, 256], sizes = [8, 128], strides = [1, 1]} : vector<8x384xf32> to vector<8x128xf32>
    %337 = vector.extract_strided_slice %319 {offsets = [0, 256], sizes = [8, 128], strides = [1, 1]} : vector<8x384xf32> to vector<8x128xf32>
    %338 = vector.broadcast %128 : vector<1x128xf32> to vector<8x128xf32>
    %339 = arith.addf %337, %338 : vector<8x128xf32>
    %340 = arith.mulf %327, %339 : vector<8x128xf32>
    %341 = arith.addf %336, %340 : vector<8x128xf32>
    %342 = math.tanh %341 : vector<8x128xf32>
    %cst_117 = arith.constant 1.000000e+00 : f32
    %343 = vector.broadcast %cst_117 : f32 to vector<8x128xf32>
    %344 = arith.subf %343, %335 : vector<8x128xf32>
    %345 = arith.mulf %344, %342 : vector<8x128xf32>
    %346 = arith.mulf %335, %316 : vector<8x128xf32>
    %347 = arith.addf %345, %346 : vector<8x128xf32>
    %c56 = arith.constant 56 : index
    %c0_118 = arith.constant 0 : index
    %348 = vector.load %arg19[%c56, %c0_118] : memref<64x384xf32, #tpu.memory_space<vmem>>, vector<8x384xf32>
    %c0_119 = arith.constant 0 : index
    %c0_120 = arith.constant 0 : index
    %349 = vector.load %arg5[%c0_119, %c0_120] : memref<128x384xf32, #tpu.memory_space<vmem>>, vector<128x384xf32>
    %cst_121 = arith.constant dense<0.000000e+00> : vector<8x384xf32>
    %350 = tpu.matmul %347, %349, %cst_121 {dimension_numbers = #tpu.dot_dimension_numbers<[1], [0], [0], [1], [0, 0, 1, 1], [], []>} : vector<8x128xf32>, vector<128x384xf32>, vector<8x384xf32> -> vector<8x384xf32>
    %351 = vector.extract_strided_slice %348 {offsets = [0, 0], sizes = [8, 128], strides = [1, 1]} : vector<8x384xf32> to vector<8x128xf32>
    %352 = vector.extract_strided_slice %350 {offsets = [0, 0], sizes = [8, 128], strides = [1, 1]} : vector<8x384xf32> to vector<8x128xf32>
    %353 = arith.addf %351, %352 : vector<8x128xf32>
    %354 = arith.negf %353 : vector<8x128xf32>
    %355 = math.exp %354 : vector<8x128xf32>
    %cst_122 = arith.constant 1.000000e+00 : f32
    %356 = vector.broadcast %cst_122 : f32 to vector<8x128xf32>
    %357 = arith.addf %356, %355 : vector<8x128xf32>
    %358 = arith.divf %356, %357 : vector<8x128xf32>
    %359 = vector.extract_strided_slice %348 {offsets = [0, 128], sizes = [8, 128], strides = [1, 1]} : vector<8x384xf32> to vector<8x128xf32>
    %360 = vector.extract_strided_slice %350 {offsets = [0, 128], sizes = [8, 128], strides = [1, 1]} : vector<8x384xf32> to vector<8x128xf32>
    %361 = arith.addf %359, %360 : vector<8x128xf32>
    %362 = arith.negf %361 : vector<8x128xf32>
    %363 = math.exp %362 : vector<8x128xf32>
    %cst_123 = arith.constant 1.000000e+00 : f32
    %364 = vector.broadcast %cst_123 : f32 to vector<8x128xf32>
    %365 = arith.addf %364, %363 : vector<8x128xf32>
    %366 = arith.divf %364, %365 : vector<8x128xf32>
    %367 = vector.extract_strided_slice %348 {offsets = [0, 256], sizes = [8, 128], strides = [1, 1]} : vector<8x384xf32> to vector<8x128xf32>
    %368 = vector.extract_strided_slice %350 {offsets = [0, 256], sizes = [8, 128], strides = [1, 1]} : vector<8x384xf32> to vector<8x128xf32>
    %369 = vector.broadcast %128 : vector<1x128xf32> to vector<8x128xf32>
    %370 = arith.addf %368, %369 : vector<8x128xf32>
    %371 = arith.mulf %358, %370 : vector<8x128xf32>
    %372 = arith.addf %367, %371 : vector<8x128xf32>
    %373 = math.tanh %372 : vector<8x128xf32>
    %cst_124 = arith.constant 1.000000e+00 : f32
    %374 = vector.broadcast %cst_124 : f32 to vector<8x128xf32>
    %375 = arith.subf %374, %366 : vector<8x128xf32>
    %376 = arith.mulf %375, %373 : vector<8x128xf32>
    %377 = arith.mulf %366, %347 : vector<8x128xf32>
    %378 = arith.addf %376, %377 : vector<8x128xf32>
    %c0_125 = arith.constant 0 : index
    %c0_126 = arith.constant 0 : index
    %379 = vector.load %arg12[%c0_125, %c0_126] : memref<128x128xf32, #tpu.memory_space<vmem>>, vector<128x128xf32>
    %cst_127 = arith.constant dense<0.000000e+00> : vector<8x128xf32>
    %380 = tpu.matmul %378, %379, %cst_127 {dimension_numbers = #tpu.dot_dimension_numbers<[1], [0], [0], [1], [0, 0, 1, 1], [], []>} : vector<8x128xf32>, vector<128x128xf32>, vector<8x128xf32> -> vector<8x128xf32>
    %381 = arith.addf %380, %127 : vector<8x128xf32>
    %382 = math.tanh %381 : vector<8x128xf32>
    %c0_128 = arith.constant 0 : index
    %c0_129 = arith.constant 0 : index
    %383 = vector.load %arg20[%c0_128, %c0_129] : memref<64x384xf32, #tpu.memory_space<vmem>>, vector<8x384xf32>
    %c0_130 = arith.constant 0 : index
    %c0_131 = arith.constant 0 : index
    %384 = vector.load %arg9[%c0_130, %c0_131] : memref<128x384xf32, #tpu.memory_space<vmem>>, vector<128x384xf32>
    %cst_132 = arith.constant dense<0.000000e+00> : vector<8x384xf32>
    %385 = tpu.matmul %382, %384, %cst_132 {dimension_numbers = #tpu.dot_dimension_numbers<[1], [0], [0], [1], [0, 0, 1, 1], [], []>} : vector<8x128xf32>, vector<128x384xf32>, vector<8x384xf32> -> vector<8x384xf32>
    %386 = vector.extract_strided_slice %383 {offsets = [0, 0], sizes = [8, 128], strides = [1, 1]} : vector<8x384xf32> to vector<8x128xf32>
    %387 = vector.extract_strided_slice %385 {offsets = [0, 0], sizes = [8, 128], strides = [1, 1]} : vector<8x384xf32> to vector<8x128xf32>
    %388 = arith.addf %386, %387 : vector<8x128xf32>
    %389 = arith.negf %388 : vector<8x128xf32>
    %390 = math.exp %389 : vector<8x128xf32>
    %cst_133 = arith.constant 1.000000e+00 : f32
    %391 = vector.broadcast %cst_133 : f32 to vector<8x128xf32>
    %392 = arith.addf %391, %390 : vector<8x128xf32>
    %393 = arith.divf %391, %392 : vector<8x128xf32>
    %394 = vector.extract_strided_slice %383 {offsets = [0, 128], sizes = [8, 128], strides = [1, 1]} : vector<8x384xf32> to vector<8x128xf32>
    %395 = vector.extract_strided_slice %385 {offsets = [0, 128], sizes = [8, 128], strides = [1, 1]} : vector<8x384xf32> to vector<8x128xf32>
    %396 = arith.addf %394, %395 : vector<8x128xf32>
    %397 = arith.negf %396 : vector<8x128xf32>
    %398 = math.exp %397 : vector<8x128xf32>
    %cst_134 = arith.constant 1.000000e+00 : f32
    %399 = vector.broadcast %cst_134 : f32 to vector<8x128xf32>
    %400 = arith.addf %399, %398 : vector<8x128xf32>
    %401 = arith.divf %399, %400 : vector<8x128xf32>
    %402 = vector.extract_strided_slice %383 {offsets = [0, 256], sizes = [8, 128], strides = [1, 1]} : vector<8x384xf32> to vector<8x128xf32>
    %403 = vector.extract_strided_slice %385 {offsets = [0, 256], sizes = [8, 128], strides = [1, 1]} : vector<8x384xf32> to vector<8x128xf32>
    %404 = vector.broadcast %129 : vector<1x128xf32> to vector<8x128xf32>
    %405 = arith.addf %403, %404 : vector<8x128xf32>
    %406 = arith.mulf %393, %405 : vector<8x128xf32>
    %407 = arith.addf %402, %406 : vector<8x128xf32>
    %408 = math.tanh %407 : vector<8x128xf32>
    %cst_135 = arith.constant 1.000000e+00 : f32
    %409 = vector.broadcast %cst_135 : f32 to vector<8x128xf32>
    %410 = arith.subf %409, %401 : vector<8x128xf32>
    %411 = arith.mulf %410, %408 : vector<8x128xf32>
    %412 = arith.mulf %401, %382 : vector<8x128xf32>
    %413 = arith.addf %411, %412 : vector<8x128xf32>
    %c8_136 = arith.constant 8 : index
    %c0_137 = arith.constant 0 : index
    %414 = vector.load %arg20[%c8_136, %c0_137] : memref<64x384xf32, #tpu.memory_space<vmem>>, vector<8x384xf32>
    %c0_138 = arith.constant 0 : index
    %c0_139 = arith.constant 0 : index
    %415 = vector.load %arg9[%c0_138, %c0_139] : memref<128x384xf32, #tpu.memory_space<vmem>>, vector<128x384xf32>
    %cst_140 = arith.constant dense<0.000000e+00> : vector<8x384xf32>
    %416 = tpu.matmul %413, %415, %cst_140 {dimension_numbers = #tpu.dot_dimension_numbers<[1], [0], [0], [1], [0, 0, 1, 1], [], []>} : vector<8x128xf32>, vector<128x384xf32>, vector<8x384xf32> -> vector<8x384xf32>
    %417 = vector.extract_strided_slice %414 {offsets = [0, 0], sizes = [8, 128], strides = [1, 1]} : vector<8x384xf32> to vector<8x128xf32>
    %418 = vector.extract_strided_slice %416 {offsets = [0, 0], sizes = [8, 128], strides = [1, 1]} : vector<8x384xf32> to vector<8x128xf32>
    %419 = arith.addf %417, %418 : vector<8x128xf32>
    %420 = arith.negf %419 : vector<8x128xf32>
    %421 = math.exp %420 : vector<8x128xf32>
    %cst_141 = arith.constant 1.000000e+00 : f32
    %422 = vector.broadcast %cst_141 : f32 to vector<8x128xf32>
    %423 = arith.addf %422, %421 : vector<8x128xf32>
    %424 = arith.divf %422, %423 : vector<8x128xf32>
    %425 = vector.extract_strided_slice %414 {offsets = [0, 128], sizes = [8, 128], strides = [1, 1]} : vector<8x384xf32> to vector<8x128xf32>
    %426 = vector.extract_strided_slice %416 {offsets = [0, 128], sizes = [8, 128], strides = [1, 1]} : vector<8x384xf32> to vector<8x128xf32>
    %427 = arith.addf %425, %426 : vector<8x128xf32>
    %428 = arith.negf %427 : vector<8x128xf32>
    %429 = math.exp %428 : vector<8x128xf32>
    %cst_142 = arith.constant 1.000000e+00 : f32
    %430 = vector.broadcast %cst_142 : f32 to vector<8x128xf32>
    %431 = arith.addf %430, %429 : vector<8x128xf32>
    %432 = arith.divf %430, %431 : vector<8x128xf32>
    %433 = vector.extract_strided_slice %414 {offsets = [0, 256], sizes = [8, 128], strides = [1, 1]} : vector<8x384xf32> to vector<8x128xf32>
    %434 = vector.extract_strided_slice %416 {offsets = [0, 256], sizes = [8, 128], strides = [1, 1]} : vector<8x384xf32> to vector<8x128xf32>
    %435 = vector.broadcast %129 : vector<1x128xf32> to vector<8x128xf32>
    %436 = arith.addf %434, %435 : vector<8x128xf32>
    %437 = arith.mulf %424, %436 : vector<8x128xf32>
    %438 = arith.addf %433, %437 : vector<8x128xf32>
    %439 = math.tanh %438 : vector<8x128xf32>
    %cst_143 = arith.constant 1.000000e+00 : f32
    %440 = vector.broadcast %cst_143 : f32 to vector<8x128xf32>
    %441 = arith.subf %440, %432 : vector<8x128xf32>
    %442 = arith.mulf %441, %439 : vector<8x128xf32>
    %443 = arith.mulf %432, %413 : vector<8x128xf32>
    %444 = arith.addf %442, %443 : vector<8x128xf32>
    %c16_144 = arith.constant 16 : index
    %c0_145 = arith.constant 0 : index
    %445 = vector.load %arg20[%c16_144, %c0_145] : memref<64x384xf32, #tpu.memory_space<vmem>>, vector<8x384xf32>
    %c0_146 = arith.constant 0 : index
    %c0_147 = arith.constant 0 : index
    %446 = vector.load %arg9[%c0_146, %c0_147] : memref<128x384xf32, #tpu.memory_space<vmem>>, vector<128x384xf32>
    %cst_148 = arith.constant dense<0.000000e+00> : vector<8x384xf32>
    %447 = tpu.matmul %444, %446, %cst_148 {dimension_numbers = #tpu.dot_dimension_numbers<[1], [0], [0], [1], [0, 0, 1, 1], [], []>} : vector<8x128xf32>, vector<128x384xf32>, vector<8x384xf32> -> vector<8x384xf32>
    %448 = vector.extract_strided_slice %445 {offsets = [0, 0], sizes = [8, 128], strides = [1, 1]} : vector<8x384xf32> to vector<8x128xf32>
    %449 = vector.extract_strided_slice %447 {offsets = [0, 0], sizes = [8, 128], strides = [1, 1]} : vector<8x384xf32> to vector<8x128xf32>
    %450 = arith.addf %448, %449 : vector<8x128xf32>
    %451 = arith.negf %450 : vector<8x128xf32>
    %452 = math.exp %451 : vector<8x128xf32>
    %cst_149 = arith.constant 1.000000e+00 : f32
    %453 = vector.broadcast %cst_149 : f32 to vector<8x128xf32>
    %454 = arith.addf %453, %452 : vector<8x128xf32>
    %455 = arith.divf %453, %454 : vector<8x128xf32>
    %456 = vector.extract_strided_slice %445 {offsets = [0, 128], sizes = [8, 128], strides = [1, 1]} : vector<8x384xf32> to vector<8x128xf32>
    %457 = vector.extract_strided_slice %447 {offsets = [0, 128], sizes = [8, 128], strides = [1, 1]} : vector<8x384xf32> to vector<8x128xf32>
    %458 = arith.addf %456, %457 : vector<8x128xf32>
    %459 = arith.negf %458 : vector<8x128xf32>
    %460 = math.exp %459 : vector<8x128xf32>
    %cst_150 = arith.constant 1.000000e+00 : f32
    %461 = vector.broadcast %cst_150 : f32 to vector<8x128xf32>
    %462 = arith.addf %461, %460 : vector<8x128xf32>
    %463 = arith.divf %461, %462 : vector<8x128xf32>
    %464 = vector.extract_strided_slice %445 {offsets = [0, 256], sizes = [8, 128], strides = [1, 1]} : vector<8x384xf32> to vector<8x128xf32>
    %465 = vector.extract_strided_slice %447 {offsets = [0, 256], sizes = [8, 128], strides = [1, 1]} : vector<8x384xf32> to vector<8x128xf32>
    %466 = vector.broadcast %129 : vector<1x128xf32> to vector<8x128xf32>
    %467 = arith.addf %465, %466 : vector<8x128xf32>
    %468 = arith.mulf %455, %467 : vector<8x128xf32>
    %469 = arith.addf %464, %468 : vector<8x128xf32>
    %470 = math.tanh %469 : vector<8x128xf32>
    %cst_151 = arith.constant 1.000000e+00 : f32
    %471 = vector.broadcast %cst_151 : f32 to vector<8x128xf32>
    %472 = arith.subf %471, %463 : vector<8x128xf32>
    %473 = arith.mulf %472, %470 : vector<8x128xf32>
    %474 = arith.mulf %463, %444 : vector<8x128xf32>
    %475 = arith.addf %473, %474 : vector<8x128xf32>
    %c24_152 = arith.constant 24 : index
    %c0_153 = arith.constant 0 : index
    %476 = vector.load %arg20[%c24_152, %c0_153] : memref<64x384xf32, #tpu.memory_space<vmem>>, vector<8x384xf32>
    %c0_154 = arith.constant 0 : index
    %c0_155 = arith.constant 0 : index
    %477 = vector.load %arg9[%c0_154, %c0_155] : memref<128x384xf32, #tpu.memory_space<vmem>>, vector<128x384xf32>
    %cst_156 = arith.constant dense<0.000000e+00> : vector<8x384xf32>
    %478 = tpu.matmul %475, %477, %cst_156 {dimension_numbers = #tpu.dot_dimension_numbers<[1], [0], [0], [1], [0, 0, 1, 1], [], []>} : vector<8x128xf32>, vector<128x384xf32>, vector<8x384xf32> -> vector<8x384xf32>
    %479 = vector.extract_strided_slice %476 {offsets = [0, 0], sizes = [8, 128], strides = [1, 1]} : vector<8x384xf32> to vector<8x128xf32>
    %480 = vector.extract_strided_slice %478 {offsets = [0, 0], sizes = [8, 128], strides = [1, 1]} : vector<8x384xf32> to vector<8x128xf32>
    %481 = arith.addf %479, %480 : vector<8x128xf32>
    %482 = arith.negf %481 : vector<8x128xf32>
    %483 = math.exp %482 : vector<8x128xf32>
    %cst_157 = arith.constant 1.000000e+00 : f32
    %484 = vector.broadcast %cst_157 : f32 to vector<8x128xf32>
    %485 = arith.addf %484, %483 : vector<8x128xf32>
    %486 = arith.divf %484, %485 : vector<8x128xf32>
    %487 = vector.extract_strided_slice %476 {offsets = [0, 128], sizes = [8, 128], strides = [1, 1]} : vector<8x384xf32> to vector<8x128xf32>
    %488 = vector.extract_strided_slice %478 {offsets = [0, 128], sizes = [8, 128], strides = [1, 1]} : vector<8x384xf32> to vector<8x128xf32>
    %489 = arith.addf %487, %488 : vector<8x128xf32>
    %490 = arith.negf %489 : vector<8x128xf32>
    %491 = math.exp %490 : vector<8x128xf32>
    %cst_158 = arith.constant 1.000000e+00 : f32
    %492 = vector.broadcast %cst_158 : f32 to vector<8x128xf32>
    %493 = arith.addf %492, %491 : vector<8x128xf32>
    %494 = arith.divf %492, %493 : vector<8x128xf32>
    %495 = vector.extract_strided_slice %476 {offsets = [0, 256], sizes = [8, 128], strides = [1, 1]} : vector<8x384xf32> to vector<8x128xf32>
    %496 = vector.extract_strided_slice %478 {offsets = [0, 256], sizes = [8, 128], strides = [1, 1]} : vector<8x384xf32> to vector<8x128xf32>
    %497 = vector.broadcast %129 : vector<1x128xf32> to vector<8x128xf32>
    %498 = arith.addf %496, %497 : vector<8x128xf32>
    %499 = arith.mulf %486, %498 : vector<8x128xf32>
    %500 = arith.addf %495, %499 : vector<8x128xf32>
    %501 = math.tanh %500 : vector<8x128xf32>
    %cst_159 = arith.constant 1.000000e+00 : f32
    %502 = vector.broadcast %cst_159 : f32 to vector<8x128xf32>
    %503 = arith.subf %502, %494 : vector<8x128xf32>
    %504 = arith.mulf %503, %501 : vector<8x128xf32>
    %505 = arith.mulf %494, %475 : vector<8x128xf32>
    %506 = arith.addf %504, %505 : vector<8x128xf32>
    %c32_160 = arith.constant 32 : index
    %c0_161 = arith.constant 0 : index
    %507 = vector.load %arg20[%c32_160, %c0_161] : memref<64x384xf32, #tpu.memory_space<vmem>>, vector<8x384xf32>
    %c0_162 = arith.constant 0 : index
    %c0_163 = arith.constant 0 : index
    %508 = vector.load %arg9[%c0_162, %c0_163] : memref<128x384xf32, #tpu.memory_space<vmem>>, vector<128x384xf32>
    %cst_164 = arith.constant dense<0.000000e+00> : vector<8x384xf32>
    %509 = tpu.matmul %506, %508, %cst_164 {dimension_numbers = #tpu.dot_dimension_numbers<[1], [0], [0], [1], [0, 0, 1, 1], [], []>} : vector<8x128xf32>, vector<128x384xf32>, vector<8x384xf32> -> vector<8x384xf32>
    %510 = vector.extract_strided_slice %507 {offsets = [0, 0], sizes = [8, 128], strides = [1, 1]} : vector<8x384xf32> to vector<8x128xf32>
    %511 = vector.extract_strided_slice %509 {offsets = [0, 0], sizes = [8, 128], strides = [1, 1]} : vector<8x384xf32> to vector<8x128xf32>
    %512 = arith.addf %510, %511 : vector<8x128xf32>
    %513 = arith.negf %512 : vector<8x128xf32>
    %514 = math.exp %513 : vector<8x128xf32>
    %cst_165 = arith.constant 1.000000e+00 : f32
    %515 = vector.broadcast %cst_165 : f32 to vector<8x128xf32>
    %516 = arith.addf %515, %514 : vector<8x128xf32>
    %517 = arith.divf %515, %516 : vector<8x128xf32>
    %518 = vector.extract_strided_slice %507 {offsets = [0, 128], sizes = [8, 128], strides = [1, 1]} : vector<8x384xf32> to vector<8x128xf32>
    %519 = vector.extract_strided_slice %509 {offsets = [0, 128], sizes = [8, 128], strides = [1, 1]} : vector<8x384xf32> to vector<8x128xf32>
    %520 = arith.addf %518, %519 : vector<8x128xf32>
    %521 = arith.negf %520 : vector<8x128xf32>
    %522 = math.exp %521 : vector<8x128xf32>
    %cst_166 = arith.constant 1.000000e+00 : f32
    %523 = vector.broadcast %cst_166 : f32 to vector<8x128xf32>
    %524 = arith.addf %523, %522 : vector<8x128xf32>
    %525 = arith.divf %523, %524 : vector<8x128xf32>
    %526 = vector.extract_strided_slice %507 {offsets = [0, 256], sizes = [8, 128], strides = [1, 1]} : vector<8x384xf32> to vector<8x128xf32>
    %527 = vector.extract_strided_slice %509 {offsets = [0, 256], sizes = [8, 128], strides = [1, 1]} : vector<8x384xf32> to vector<8x128xf32>
    %528 = vector.broadcast %129 : vector<1x128xf32> to vector<8x128xf32>
    %529 = arith.addf %527, %528 : vector<8x128xf32>
    %530 = arith.mulf %517, %529 : vector<8x128xf32>
    %531 = arith.addf %526, %530 : vector<8x128xf32>
    %532 = math.tanh %531 : vector<8x128xf32>
    %cst_167 = arith.constant 1.000000e+00 : f32
    %533 = vector.broadcast %cst_167 : f32 to vector<8x128xf32>
    %534 = arith.subf %533, %525 : vector<8x128xf32>
    %535 = arith.mulf %534, %532 : vector<8x128xf32>
    %536 = arith.mulf %525, %506 : vector<8x128xf32>
    %537 = arith.addf %535, %536 : vector<8x128xf32>
    %c40_168 = arith.constant 40 : index
    %c0_169 = arith.constant 0 : index
    %538 = vector.load %arg20[%c40_168, %c0_169] : memref<64x384xf32, #tpu.memory_space<vmem>>, vector<8x384xf32>
    %c0_170 = arith.constant 0 : index
    %c0_171 = arith.constant 0 : index
    %539 = vector.load %arg9[%c0_170, %c0_171] : memref<128x384xf32, #tpu.memory_space<vmem>>, vector<128x384xf32>
    %cst_172 = arith.constant dense<0.000000e+00> : vector<8x384xf32>
    %540 = tpu.matmul %537, %539, %cst_172 {dimension_numbers = #tpu.dot_dimension_numbers<[1], [0], [0], [1], [0, 0, 1, 1], [], []>} : vector<8x128xf32>, vector<128x384xf32>, vector<8x384xf32> -> vector<8x384xf32>
    %541 = vector.extract_strided_slice %538 {offsets = [0, 0], sizes = [8, 128], strides = [1, 1]} : vector<8x384xf32> to vector<8x128xf32>
    %542 = vector.extract_strided_slice %540 {offsets = [0, 0], sizes = [8, 128], strides = [1, 1]} : vector<8x384xf32> to vector<8x128xf32>
    %543 = arith.addf %541, %542 : vector<8x128xf32>
    %544 = arith.negf %543 : vector<8x128xf32>
    %545 = math.exp %544 : vector<8x128xf32>
    %cst_173 = arith.constant 1.000000e+00 : f32
    %546 = vector.broadcast %cst_173 : f32 to vector<8x128xf32>
    %547 = arith.addf %546, %545 : vector<8x128xf32>
    %548 = arith.divf %546, %547 : vector<8x128xf32>
    %549 = vector.extract_strided_slice %538 {offsets = [0, 128], sizes = [8, 128], strides = [1, 1]} : vector<8x384xf32> to vector<8x128xf32>
    %550 = vector.extract_strided_slice %540 {offsets = [0, 128], sizes = [8, 128], strides = [1, 1]} : vector<8x384xf32> to vector<8x128xf32>
    %551 = arith.addf %549, %550 : vector<8x128xf32>
    %552 = arith.negf %551 : vector<8x128xf32>
    %553 = math.exp %552 : vector<8x128xf32>
    %cst_174 = arith.constant 1.000000e+00 : f32
    %554 = vector.broadcast %cst_174 : f32 to vector<8x128xf32>
    %555 = arith.addf %554, %553 : vector<8x128xf32>
    %556 = arith.divf %554, %555 : vector<8x128xf32>
    %557 = vector.extract_strided_slice %538 {offsets = [0, 256], sizes = [8, 128], strides = [1, 1]} : vector<8x384xf32> to vector<8x128xf32>
    %558 = vector.extract_strided_slice %540 {offsets = [0, 256], sizes = [8, 128], strides = [1, 1]} : vector<8x384xf32> to vector<8x128xf32>
    %559 = vector.broadcast %129 : vector<1x128xf32> to vector<8x128xf32>
    %560 = arith.addf %558, %559 : vector<8x128xf32>
    %561 = arith.mulf %548, %560 : vector<8x128xf32>
    %562 = arith.addf %557, %561 : vector<8x128xf32>
    %563 = math.tanh %562 : vector<8x128xf32>
    %cst_175 = arith.constant 1.000000e+00 : f32
    %564 = vector.broadcast %cst_175 : f32 to vector<8x128xf32>
    %565 = arith.subf %564, %556 : vector<8x128xf32>
    %566 = arith.mulf %565, %563 : vector<8x128xf32>
    %567 = arith.mulf %556, %537 : vector<8x128xf32>
    %568 = arith.addf %566, %567 : vector<8x128xf32>
    %c48_176 = arith.constant 48 : index
    %c0_177 = arith.constant 0 : index
    %569 = vector.load %arg20[%c48_176, %c0_177] : memref<64x384xf32, #tpu.memory_space<vmem>>, vector<8x384xf32>
    %c0_178 = arith.constant 0 : index
    %c0_179 = arith.constant 0 : index
    %570 = vector.load %arg9[%c0_178, %c0_179] : memref<128x384xf32, #tpu.memory_space<vmem>>, vector<128x384xf32>
    %cst_180 = arith.constant dense<0.000000e+00> : vector<8x384xf32>
    %571 = tpu.matmul %568, %570, %cst_180 {dimension_numbers = #tpu.dot_dimension_numbers<[1], [0], [0], [1], [0, 0, 1, 1], [], []>} : vector<8x128xf32>, vector<128x384xf32>, vector<8x384xf32> -> vector<8x384xf32>
    %572 = vector.extract_strided_slice %569 {offsets = [0, 0], sizes = [8, 128], strides = [1, 1]} : vector<8x384xf32> to vector<8x128xf32>
    %573 = vector.extract_strided_slice %571 {offsets = [0, 0], sizes = [8, 128], strides = [1, 1]} : vector<8x384xf32> to vector<8x128xf32>
    %574 = arith.addf %572, %573 : vector<8x128xf32>
    %575 = arith.negf %574 : vector<8x128xf32>
    %576 = math.exp %575 : vector<8x128xf32>
    %cst_181 = arith.constant 1.000000e+00 : f32
    %577 = vector.broadcast %cst_181 : f32 to vector<8x128xf32>
    %578 = arith.addf %577, %576 : vector<8x128xf32>
    %579 = arith.divf %577, %578 : vector<8x128xf32>
    %580 = vector.extract_strided_slice %569 {offsets = [0, 128], sizes = [8, 128], strides = [1, 1]} : vector<8x384xf32> to vector<8x128xf32>
    %581 = vector.extract_strided_slice %571 {offsets = [0, 128], sizes = [8, 128], strides = [1, 1]} : vector<8x384xf32> to vector<8x128xf32>
    %582 = arith.addf %580, %581 : vector<8x128xf32>
    %583 = arith.negf %582 : vector<8x128xf32>
    %584 = math.exp %583 : vector<8x128xf32>
    %cst_182 = arith.constant 1.000000e+00 : f32
    %585 = vector.broadcast %cst_182 : f32 to vector<8x128xf32>
    %586 = arith.addf %585, %584 : vector<8x128xf32>
    %587 = arith.divf %585, %586 : vector<8x128xf32>
    %588 = vector.extract_strided_slice %569 {offsets = [0, 256], sizes = [8, 128], strides = [1, 1]} : vector<8x384xf32> to vector<8x128xf32>
    %589 = vector.extract_strided_slice %571 {offsets = [0, 256], sizes = [8, 128], strides = [1, 1]} : vector<8x384xf32> to vector<8x128xf32>
    %590 = vector.broadcast %129 : vector<1x128xf32> to vector<8x128xf32>
    %591 = arith.addf %589, %590 : vector<8x128xf32>
    %592 = arith.mulf %579, %591 : vector<8x128xf32>
    %593 = arith.addf %588, %592 : vector<8x128xf32>
    %594 = math.tanh %593 : vector<8x128xf32>
    %cst_183 = arith.constant 1.000000e+00 : f32
    %595 = vector.broadcast %cst_183 : f32 to vector<8x128xf32>
    %596 = arith.subf %595, %587 : vector<8x128xf32>
    %597 = arith.mulf %596, %594 : vector<8x128xf32>
    %598 = arith.mulf %587, %568 : vector<8x128xf32>
    %599 = arith.addf %597, %598 : vector<8x128xf32>
    %c56_184 = arith.constant 56 : index
    %c0_185 = arith.constant 0 : index
    %600 = vector.load %arg20[%c56_184, %c0_185] : memref<64x384xf32, #tpu.memory_space<vmem>>, vector<8x384xf32>
    %c0_186 = arith.constant 0 : index
    %c0_187 = arith.constant 0 : index
    %601 = vector.load %arg9[%c0_186, %c0_187] : memref<128x384xf32, #tpu.memory_space<vmem>>, vector<128x384xf32>
    %cst_188 = arith.constant dense<0.000000e+00> : vector<8x384xf32>
    %602 = tpu.matmul %599, %601, %cst_188 {dimension_numbers = #tpu.dot_dimension_numbers<[1], [0], [0], [1], [0, 0, 1, 1], [], []>} : vector<8x128xf32>, vector<128x384xf32>, vector<8x384xf32> -> vector<8x384xf32>
    %603 = vector.extract_strided_slice %600 {offsets = [0, 0], sizes = [8, 128], strides = [1, 1]} : vector<8x384xf32> to vector<8x128xf32>
    %604 = vector.extract_strided_slice %602 {offsets = [0, 0], sizes = [8, 128], strides = [1, 1]} : vector<8x384xf32> to vector<8x128xf32>
    %605 = arith.addf %603, %604 : vector<8x128xf32>
    %606 = arith.negf %605 : vector<8x128xf32>
    %607 = math.exp %606 : vector<8x128xf32>
    %cst_189 = arith.constant 1.000000e+00 : f32
    %608 = vector.broadcast %cst_189 : f32 to vector<8x128xf32>
    %609 = arith.addf %608, %607 : vector<8x128xf32>
    %610 = arith.divf %608, %609 : vector<8x128xf32>
    %611 = vector.extract_strided_slice %600 {offsets = [0, 128], sizes = [8, 128], strides = [1, 1]} : vector<8x384xf32> to vector<8x128xf32>
    %612 = vector.extract_strided_slice %602 {offsets = [0, 128], sizes = [8, 128], strides = [1, 1]} : vector<8x384xf32> to vector<8x128xf32>
    %613 = arith.addf %611, %612 : vector<8x128xf32>
    %614 = arith.negf %613 : vector<8x128xf32>
    %615 = math.exp %614 : vector<8x128xf32>
    %cst_190 = arith.constant 1.000000e+00 : f32
    %616 = vector.broadcast %cst_190 : f32 to vector<8x128xf32>
    %617 = arith.addf %616, %615 : vector<8x128xf32>
    %618 = arith.divf %616, %617 : vector<8x128xf32>
    %619 = vector.extract_strided_slice %600 {offsets = [0, 256], sizes = [8, 128], strides = [1, 1]} : vector<8x384xf32> to vector<8x128xf32>
    %620 = vector.extract_strided_slice %602 {offsets = [0, 256], sizes = [8, 128], strides = [1, 1]} : vector<8x384xf32> to vector<8x128xf32>
    %621 = vector.broadcast %129 : vector<1x128xf32> to vector<8x128xf32>
    %622 = arith.addf %620, %621 : vector<8x128xf32>
    %623 = arith.mulf %610, %622 : vector<8x128xf32>
    %624 = arith.addf %619, %623 : vector<8x128xf32>
    %625 = math.tanh %624 : vector<8x128xf32>
    %cst_191 = arith.constant 1.000000e+00 : f32
    %626 = vector.broadcast %cst_191 : f32 to vector<8x128xf32>
    %627 = arith.subf %626, %618 : vector<8x128xf32>
    %628 = arith.mulf %627, %625 : vector<8x128xf32>
    %629 = arith.mulf %618, %599 : vector<8x128xf32>
    %630 = arith.addf %628, %629 : vector<8x128xf32>
    %631 = tpu.concatenate %413, %444, %475, %506, %537, %568, %599, %630 in 0 : vector<8x128xf32>, vector<8x128xf32>, vector<8x128xf32>, vector<8x128xf32>, vector<8x128xf32>, vector<8x128xf32>, vector<8x128xf32>, vector<8x128xf32> -> vector<64x128xf32>
    %c0_192 = arith.constant 0 : index
    %c0_193 = arith.constant 0 : index
    %632 = vector.load %arg16[%c0_192, %c0_193] : memref<128x128xf32, #tpu.memory_space<vmem>>, vector<128x128xf32>
    %cst_194 = arith.constant dense<0.000000e+00> : vector<64x128xf32>
    %633 = tpu.matmul %631, %632, %cst_194 {dimension_numbers = #tpu.dot_dimension_numbers<[1], [0], [0], [1], [0, 0, 1, 1], [], []>} : vector<64x128xf32>, vector<128x128xf32>, vector<64x128xf32> -> vector<64x128xf32>
    %c0_195 = arith.constant 0 : index
    %c0_196 = arith.constant 0 : index
    %634 = vector.load %arg17[%c0_195, %c0_196] : memref<1x128xf32, #tpu.memory_space<vmem>>, vector<1x128xf32>
    %635 = vector.broadcast %634 : vector<1x128xf32> to vector<64x128xf32>
    %636 = arith.addf %633, %635 : vector<64x128xf32>
    %cst_197 = arith.constant dense<0xFF800000> : vector<64xf32>
    %637 = vector.multi_reduction <maximumf>, %636, %cst_197 [1] : vector<64x128xf32> to vector<64xf32>
    %638 = vector.shape_cast %637 : vector<64xf32> to vector<64x1xf32>
    %639 = vector.broadcast %638 : vector<64x1xf32> to vector<64x128xf32>
    %640 = arith.subf %636, %639 : vector<64x128xf32>
    %641 = math.exp %640 : vector<64x128xf32>
    %cst_198 = arith.constant dense<0.000000e+00> : vector<64xf32>
    %642 = vector.multi_reduction <add>, %641, %cst_198 [1] : vector<64x128xf32> to vector<64xf32>
    %643 = vector.shape_cast %642 : vector<64xf32> to vector<64x1xf32>
    %644 = math.log %643 : vector<64x1xf32>
    %645 = vector.broadcast %644 : vector<64x1xf32> to vector<64x128xf32>
    %646 = arith.subf %640, %645 : vector<64x128xf32>
    %647 = vector.extract_strided_slice %646 {offsets = [0, 0], sizes = [1, 128], strides = [1, 1]} : vector<64x128xf32> to vector<1x128xf32>
    %648 = vector.extract_strided_slice %646 {offsets = [8, 0], sizes = [1, 128], strides = [1, 1]} : vector<64x128xf32> to vector<1x128xf32>
    %649 = vector.extract_strided_slice %646 {offsets = [16, 0], sizes = [1, 128], strides = [1, 1]} : vector<64x128xf32> to vector<1x128xf32>
    %650 = vector.extract_strided_slice %646 {offsets = [24, 0], sizes = [1, 128], strides = [1, 1]} : vector<64x128xf32> to vector<1x128xf32>
    %651 = vector.extract_strided_slice %646 {offsets = [32, 0], sizes = [1, 128], strides = [1, 1]} : vector<64x128xf32> to vector<1x128xf32>
    %652 = vector.extract_strided_slice %646 {offsets = [40, 0], sizes = [1, 128], strides = [1, 1]} : vector<64x128xf32> to vector<1x128xf32>
    %653 = vector.extract_strided_slice %646 {offsets = [48, 0], sizes = [1, 128], strides = [1, 1]} : vector<64x128xf32> to vector<1x128xf32>
    %654 = vector.extract_strided_slice %646 {offsets = [56, 0], sizes = [1, 128], strides = [1, 1]} : vector<64x128xf32> to vector<1x128xf32>
    %655 = tpu.concatenate %647, %648, %649, %650, %651, %652, %653, %654 in 0 : vector<1x128xf32>, vector<1x128xf32>, vector<1x128xf32>, vector<1x128xf32>, vector<1x128xf32>, vector<1x128xf32>, vector<1x128xf32>, vector<1x128xf32> -> vector<8x128xf32>
    %c0_199 = arith.constant 0 : index
    %c0_200 = arith.constant 0 : index
    %656 = vector.load %arg18[%c0_199, %c0_200] : memref<16x128xf32, #tpu.memory_space<vmem>>, vector<8x128xf32>
    tpu.vector_store %arg18[%c0_199, %c0_200], %655 {strides = array<i32>} : memref<16x128xf32, #tpu.memory_space<vmem>>, vector<8x128xf32>,
    %657 = vector.extract_strided_slice %646 {offsets = [1, 0], sizes = [1, 128], strides = [1, 1]} : vector<64x128xf32> to vector<1x128xf32>
    %658 = vector.extract_strided_slice %646 {offsets = [9, 0], sizes = [1, 128], strides = [1, 1]} : vector<64x128xf32> to vector<1x128xf32>
    %659 = vector.extract_strided_slice %646 {offsets = [17, 0], sizes = [1, 128], strides = [1, 1]} : vector<64x128xf32> to vector<1x128xf32>
    %660 = vector.extract_strided_slice %646 {offsets = [25, 0], sizes = [1, 128], strides = [1, 1]} : vector<64x128xf32> to vector<1x128xf32>
    %661 = vector.extract_strided_slice %646 {offsets = [33, 0], sizes = [1, 128], strides = [1, 1]} : vector<64x128xf32> to vector<1x128xf32>
    %662 = vector.extract_strided_slice %646 {offsets = [41, 0], sizes = [1, 128], strides = [1, 1]} : vector<64x128xf32> to vector<1x128xf32>
    %663 = vector.extract_strided_slice %646 {offsets = [49, 0], sizes = [1, 128], strides = [1, 1]} : vector<64x128xf32> to vector<1x128xf32>
    %664 = vector.extract_strided_slice %646 {offsets = [57, 0], sizes = [1, 128], strides = [1, 1]} : vector<64x128xf32> to vector<1x128xf32>
    %665 = tpu.concatenate %657, %658, %659, %660, %661, %662, %663, %664 in 0 : vector<1x128xf32>, vector<1x128xf32>, vector<1x128xf32>, vector<1x128xf32>, vector<1x128xf32>, vector<1x128xf32>, vector<1x128xf32>, vector<1x128xf32> -> vector<8x128xf32>
    %c8_201 = arith.constant 8 : index
    %c0_202 = arith.constant 0 : index
    %666 = vector.load %arg18[%c8_201, %c0_202] : memref<16x128xf32, #tpu.memory_space<vmem>>, vector<8x128xf32>
    tpu.vector_store %arg18[%c8_201, %c0_202], %665 {strides = array<i32>} : memref<16x128xf32, #tpu.memory_space<vmem>>, vector<8x128xf32>,
    return
  }
}

</mosaic_0001>

<bundles_post_ra>
// kernel: forward_pallas.1
= control target key start
LH: loop header
LB: loop body
LE: loop exit
PB: predicated region body
PF: predicated region fallthrough
CT: control target
= control target key end

     0   :  { %s8440_s0 = inlined_call_operand.vmem [shape: s32[2,8], index: 0, kind: input, shape index: {}]   ;;  %s8441_s1 = inlined_call_operand.vmem [shape: s32[2,8], index: 1, kind: input, shape index: {}]   ;;  %s8442_s2 = inlined_call_operand.vmem [shape: f32[2,8], index: 2, kind: input, shape index: {}]   ;;  %s8443_s3 = inlined_call_operand.vmem [shape: f32[2,8], index: 3, kind: input, shape index: {}]   ;;  %s8444_s4 = inlined_call_operand.hbm [shape: f32[128,384], index: 4, kind: input, shape index: {}]   ;;  %s8445_s5 = inlined_call_operand.hbm [shape: f32[128,384], index: 5, kind: input, shape index: {}]   ;;  %s8446_s6 = inlined_call_operand.hbm [shape: f32[1,384], index: 6, kind: input, shape index: {}]   ;;  %s8447_s7 = inlined_call_operand.hbm [shape: f32[1,128], index: 7, kind: input, shape index: {}]   ;;  %s8448_s8 = inlined_call_operand.hbm [shape: f32[128,384], index: 8, kind: input, shape index: {}]   ;;  %s8449_s9 = inlined_call_operand.hbm [shape: f32[128,384], index: 9, kind: input, shape index: {}]   ;;  %s8450_s10 = inlined_call_operand.hbm [shape: f32[1,384], index: 10, kind: input, shape index: {}]   ;;  %s8451_s11 = inlined_call_operand.hbm [shape: f32[1,128], index: 11, kind: input, shape index: {}]   ;;  %s8452_s12 = inlined_call_operand.hbm [shape: f32[128,128], index: 12, kind: input, shape index: {}]   ;;  %s8453_s13 = inlined_call_operand.vmem [shape: f32[8,128], index: 13, kind: input, shape index: {}]   ;;  %s8454_s14 = inlined_call_operand.vmem [shape: f32[8,128], index: 14, kind: input, shape index: {}]   ;;  %s8455_s15 = inlined_call_operand.vmem [shape: f32[1,128], index: 15, kind: input, shape index: {}]   ;;  %s8456_s16 = inlined_call_operand.hbm [shape: f32[128,128], index: 16, kind: input, shape index: {}]   ;;  %s8457_s17 = inlined_call_operand.hbm [shape: f32[1,128], index: 17, kind: input, shape index: {}]   ;;  %s8458_s18 = inlined_call_operand.hbm [shape: f32[16,128], index: 18, kind: output, shape index: {}]  }
   0x1   :  { %8461 = sst [smem:[#allocation30_spill]] %s8440_s0 }
   0x2   :  { %8462 = sst [smem:[#allocation31_spill]] %s8441_s1 }
   0x3   :  { %8463 = sst [smem:[#allocation32_spill]] %s8442_s2 }
   0x4   :  { %23 = vsyncpa [#allocation5], 0 }
   0x5   :  { %24 = vsyncpa [#allocation8], 0 }
   0x6   :  { %25 = vsyncpa [#allocation11], 0 }
   0x7   :  { %26 = vsyncpa [#allocation14], 0 }
   0x8   :  { %27 = vsyncpa [#allocation17], 0 }
   0x9   :  { %28 = vsyncpa [#allocation20], 0 }
   0xa   :  { %29 = vsyncpa [#allocation6], 0  ;;  %s7030_s27 = smov [#allocation7]   ;;  %s7031_s29 = smov [#allocation10]  }
   0xb   :  { %s55_s28 = sshll.u32 %s7030_s27, 4  ;;  %s78_s30 = sshll.u32 %s7031_s29, 4  ;;  %s56_s28 = int_to_ptr.vmem [resolvable:$true] %s55_s28  ;;  %s7153_s30 = int_to_ptr.vmem [resolvable:$true] %s78_s30 }
   0xc   :  { %s6752_s1 = scalar_lea.hbm %s8445_s5, 6144 }
   0xd   :  { %p6753_p0 = scmp.ne.s32.totalorder %s8445_s5, %s6752_s1  ;;  %p6756_p1 = scmp.lt.u32.totalorder %s6752_s1, %s8445_s5 }
   0xf   :  { %p6758_p2 = pnand %p6756_p1, %p6753_p0 }
  0x11   :  { %6761 = shalt.err (!%p6758_p2)
}
  0x12   :  { %s6762_s23 = scalar_lea.vmem %s56_s28, 6144  ;;  %p6767_p4 = scmp.lt.s32.totalorder %s56_s28, %s56_s28 }
  0x13   :  { %p6763_p3 = scmp.ne.s32.totalorder %s56_s28, %s6762_s23  ;;  %p6768_p5 = scmp.lt.s32.totalorder %s6762_s23, %s6762_s23 }
  0x15   :  { %p6769_p6 = por %p6768_p5, %p6767_p4 }
  0x17   :  { %p6770_p7 = pnand %p6769_p6, %p6763_p3 }
  0x19   :  { %6773 = shalt.err (!%p6770_p7)
}
  0x1a   :  { %s7032_s24 = smov 384   ;;  %s7033_s25 = smov 24  }
  0x1b   :  { %61 = dma.hbm_to_vmem [thread:$0]  %s8445_s5, 6144, %s56_s28, [#allocation8], %s7032_s24, %s7032_s24, %s7033_s25  }
  0x1c   :  { %s6774_s19 = scalar_lea.hbm %s8447_s7, 16 }
  0x1d   :  { %p6775_p8 = scmp.ne.s32.totalorder %s8447_s7, %s6774_s19  ;;  %p6778_p9 = scmp.lt.u32.totalorder %s6774_s19, %s8447_s7 }
  0x1f   :  { %p6780_p10 = pnand %p6778_p9, %p6775_p8 }
  0x21   :  { %6783 = shalt.err (!%p6780_p10)
}
  0x22   :  { %s6784_s2 = scalar_lea.vmem %s7153_s30, 16  ;;  %s6788_s5 = scalar_lea.vmem %s7153_s30, 32 }
  0x23   :  { %p6785_p11 = scmp.ne.s32.totalorder %s7153_s30, %s6784_s2  ;;  %p6789_p12 = scmp.lt.s32.totalorder %s7153_s30, %s7153_s30 }
  0x24   :  { %p6790_p13 = scmp.lt.s32.totalorder %s6788_s5, %s6784_s2 }
  0x26   :  { %p6791_p0 = por %p6790_p13, %p6789_p12 }
  0x28   :  { %p6792_p1 = pnand %p6791_p0, %p6785_p11 }
  0x2a   :  { %6795 = shalt.err (!%p6792_p1)
}
  0x2b   :  { %81 = dma.hbm_to_vmem [thread:$0]  %s8447_s7, 16, %s7153_s30, [#allocation11]  }
  0x2c   :  { %s7034_s26 = smov [#allocation13]   ;;  %s7035_s29 = smov [#allocation16]  }
  0x2d   :  { %s99_s27 = sshll.u32 %s7034_s26, 4  ;;  %s122_s0 = sshll.u32 %s7035_s29, 4  ;;  %s100_s27 = int_to_ptr.vmem [resolvable:$true] %s99_s27  ;;  %s123_s0 = int_to_ptr.vmem [resolvable:$true] %s122_s0 }
  0x2e   :  { %s6796_s20 = scalar_lea.hbm %s8449_s9, 6144 }
  0x2f   :  { %p6797_p2 = scmp.ne.s32.totalorder %s8449_s9, %s6796_s20  ;;  %p6800_p3 = scmp.lt.u32.totalorder %s6796_s20, %s8449_s9 }
  0x31   :  { %p6802_p4 = pnand %p6800_p3, %p6797_p2 }
  0x33   :  { %6805 = shalt.err (!%p6802_p4)
}
  0x34   :  { %s6806_s7 = scalar_lea.vmem %s100_s27, 6144  ;;  %p6811_p6 = scmp.lt.s32.totalorder %s100_s27, %s100_s27 }
  0x35   :  { %p6807_p5 = scmp.ne.s32.totalorder %s100_s27, %s6806_s7  ;;  %p6812_p7 = scmp.lt.s32.totalorder %s6806_s7, %s6806_s7 }
  0x37   :  { %p6813_p8 = por %p6812_p7, %p6811_p6 }
  0x39   :  { %p6814_p9 = pnand %p6813_p8, %p6807_p5 }
  0x3b   :  { %6817 = shalt.err (!%p6814_p9)
}
  0x3c   :  { %105 = dma.hbm_to_vmem [thread:$0]  %s8449_s9, 6144, %s100_s27, [#allocation14], %s7032_s24, %s7032_s24, %s7033_s25  }
  0x3d   :  { %s6818_s29 = scalar_lea.hbm %s8451_s11, 16 }
  0x3e   :  { %p6819_p10 = scmp.ne.s32.totalorder %s8451_s11, %s6818_s29  ;;  %p6822_p11 = scmp.lt.u32.totalorder %s6818_s29, %s8451_s11 }
  0x40   :  { %p6824_p12 = pnand %p6822_p11, %p6819_p10 }
  0x42   :  { %6827 = shalt.err (!%p6824_p12)
}
  0x43   :  { %s6828_s22 = scalar_lea.vmem %s123_s0, 16  ;;  %s6832_s2 = scalar_lea.vmem %s123_s0, 32 }
  0x44   :  { %p6829_p13 = scmp.ne.s32.totalorder %s123_s0, %s6828_s22  ;;  %p6833_p0 = scmp.lt.s32.totalorder %s123_s0, %s123_s0 }
  0x45   :  { %p6834_p1 = scmp.lt.s32.totalorder %s6832_s2, %s6828_s22 }
  0x47   :  { %p6835_p2 = por %p6834_p1, %p6833_p0 }
  0x49   :  { %p6836_p3 = pnand %p6835_p2, %p6829_p13 }
  0x4b   :  { %6839 = shalt.err (!%p6836_p3)
}
  0x4c   :  { %125 = dma.hbm_to_vmem [thread:$0]  %s8451_s11, 16, %s123_s0, [#allocation17]  }
  0x4d   :  { %s7036_s5 = smov [#allocation19]   ;;  %s7037_s30 = smov [#allocation4]  }
  0x4e   :  { %s149_s7 = sshll.u32 %s7036_s5, 4  ;;  %s43_s28 = sshll.u32 %s7037_s30, 4  ;;  %s150_s7 = int_to_ptr.vmem [resolvable:$true] %s149_s7  ;;  %s7215_s28 = int_to_ptr.vmem [resolvable:$true] %s43_s28 }
  0x4f   :  { %s6840_s29 = scalar_lea.hbm %s8456_s16, 2048 }
  0x50   :  { %p6841_p4 = scmp.ne.s32.totalorder %s8456_s16, %s6840_s29  ;;  %p6844_p5 = scmp.lt.u32.totalorder %s6840_s29, %s8456_s16 }
  0x52   :  { %p6846_p6 = pnand %p6844_p5, %p6841_p4 }
  0x54   :  { %6849 = shalt.err (!%p6846_p6)
}
  0x55   :  { %s6850_s11 = scalar_lea.vmem %s150_s7, 2048  ;;  %p6855_p8 = scmp.lt.s32.totalorder %s150_s7, %s150_s7 }
  0x56   :  { %p6851_p7 = scmp.ne.s32.totalorder %s150_s7, %s6850_s11  ;;  %p6856_p9 = scmp.lt.s32.totalorder %s6850_s11, %s6850_s11 }
  0x58   :  { %p6857_p10 = por %p6856_p9, %p6855_p8 }
  0x5a   :  { %p6858_p11 = pnand %p6857_p10, %p6851_p7 }
  0x5c   :  { %6861 = shalt.err (!%p6858_p11)
}
  0x5d   :  { %s7038_s0 = smov 128   ;;  %s7039_s22 = smov 8  }
  0x5e   :  { %155 = dma.hbm_to_vmem [thread:$0]  %s8456_s16, 2048, %s150_s7, [#allocation20], %s7038_s0, %s7038_s0, %s7039_s22  }
  0x5f   :  { %s6862_s30 = scalar_lea.hbm %s8444_s4, 6144 }
  0x60   :  { %p6863_p12 = scmp.ne.s32.totalorder %s8444_s4, %s6862_s30  ;;  %p6866_p13 = scmp.lt.u32.totalorder %s6862_s30, %s8444_s4 }
  0x62   :  { %p6868_p0 = pnand %p6866_p13, %p6863_p12 }
  0x64   :  { %6871 = shalt.err (!%p6868_p0)
}
  0x65   :  { %s6872_s1 = scalar_lea.vmem %s7215_s28, 6144  ;;  %p6877_p2 = scmp.lt.s32.totalorder %s7215_s28, %s7215_s28 }
  0x66   :  { %p6873_p1 = scmp.ne.s32.totalorder %s7215_s28, %s6872_s1  ;;  %p6878_p3 = scmp.lt.s32.totalorder %s6872_s1, %s6872_s1 }
  0x68   :  { %p6879_p4 = por %p6878_p3, %p6877_p2 }
  0x6a   :  { %p6880_p5 = pnand %p6879_p4, %p6873_p1 }
  0x6c   :  { %6883 = shalt.err (!%p6880_p5)
}
  0x6d   :  { %49 = dma.hbm_to_vmem [thread:$0]  %s8444_s4, 6144, %s7215_s28, [#allocation5], %s7032_s24, %s7032_s24, %s7033_s25  }
  0x6e   :  { %s7040_s20 = smov [#allocation9]   ;;  %s7041_s11 = smov [#allocation12]  }
  0x6f   :  { %s68_s21 = sshll.u32 %s7040_s20, 4  ;;  %s87_s2 = sshll.u32 %s7041_s11, 4  ;;  %s69_s21 = int_to_ptr.vmem [resolvable:$true] %s68_s21  ;;  %s7252_s2 = int_to_ptr.vmem [resolvable:$true] %s87_s2 }
  0x70   :  { %s6884_s5 = scalar_lea.hbm %s8446_s6, 48 }
  0x71   :  { %p6885_p6 = scmp.ne.s32.totalorder %s8446_s6, %s6884_s5  ;;  %p6888_p7 = scmp.lt.u32.totalorder %s6884_s5, %s8446_s6 }
  0x73   :  { %p6890_p8 = pnand %p6888_p7, %p6885_p6 }
  0x75   :  { %6893 = shalt.err (!%p6890_p8)
}
  0x76   :  { %s6894_s4 = scalar_lea.vmem %s69_s21, 48  ;;  %s6898_s28 = scalar_lea.vmem %s69_s21, 64 }
  0x77   :  { %p6895_p9 = scmp.ne.s32.totalorder %s69_s21, %s6894_s4  ;;  %p6899_p10 = scmp.lt.s32.totalorder %s69_s21, %s69_s21 }
  0x78   :  { %p6900_p11 = scmp.lt.s32.totalorder %s6898_s28, %s6894_s4 }
  0x7a   :  { %p6901_p12 = por %p6900_p11, %p6899_p10 }
  0x7c   :  { %p6902_p13 = pnand %p6901_p12, %p6895_p9 }
  0x7e   :  { %6905 = shalt.err (!%p6902_p13)
}
  0x7f   :  { %71 = dma.hbm_to_vmem [thread:$0]  %s8446_s6, 48, %s69_s21, [#allocation8]  }
  0x80   :  { %s6906_s20 = scalar_lea.hbm %s8448_s8, 6144 }
  0x81   :  { %p6907_p0 = scmp.ne.s32.totalorder %s8448_s8, %s6906_s20  ;;  %p6910_p1 = scmp.lt.u32.totalorder %s6906_s20, %s8448_s8 }
  0x83   :  { %p6912_p2 = pnand %p6910_p1, %p6907_p0 }
  0x85   :  { %6915 = shalt.err (!%p6912_p2)
}
  0x86   :  { %s6916_s30 = scalar_lea.vmem %s7252_s2, 6144  ;;  %p6921_p4 = scmp.lt.s32.totalorder %s7252_s2, %s7252_s2 }
  0x87   :  { %p6917_p3 = scmp.ne.s32.totalorder %s7252_s2, %s6916_s30  ;;  %p6922_p5 = scmp.lt.s32.totalorder %s6916_s30, %s6916_s30 }
  0x89   :  { %p6923_p6 = por %p6922_p5, %p6921_p4 }
  0x8b   :  { %p6924_p7 = pnand %p6923_p6, %p6917_p3 }
  0x8d   :  { %6927 = shalt.err (!%p6924_p7)
}
  0x8e   :  { %93 = dma.hbm_to_vmem [thread:$0]  %s8448_s8, 6144, %s7252_s2, [#allocation11], %s7032_s24, %s7032_s24, %s7033_s25  }
  0x8f   :  { %s7042_s23 = smov [#allocation15]   ;;  %s7043_s29 = smov [#allocation18]  }
  0x90   :  { %s112_s26 = sshll.u32 %s7042_s23, 4  ;;  %s131_s4 = sshll.u32 %s7043_s29, 4  ;;  %s113_s26 = int_to_ptr.vmem [resolvable:$true] %s112_s26  ;;  %s7286_s4 = int_to_ptr.vmem [resolvable:$true] %s131_s4 }
  0x91   :  { %s6928_s1 = scalar_lea.hbm %s8450_s10, 48 }
  0x92   :  { %p6929_p8 = scmp.ne.s32.totalorder %s8450_s10, %s6928_s1  ;;  %p6932_p9 = scmp.lt.u32.totalorder %s6928_s1, %s8450_s10 }
  0x94   :  { %p6934_p10 = pnand %p6932_p9, %p6929_p8 }
  0x96   :  { %6937 = shalt.err (!%p6934_p10)
}
  0x97   :  { %s6938_s8 = scalar_lea.vmem %s113_s26, 48  ;;  %s6942_s24 = scalar_lea.vmem %s113_s26, 64 }
  0x98   :  { %p6939_p11 = scmp.ne.s32.totalorder %s113_s26, %s6938_s8  ;;  %p6943_p12 = scmp.lt.s32.totalorder %s113_s26, %s113_s26 }
  0x99   :  { %p6944_p13 = scmp.lt.s32.totalorder %s6942_s24, %s6938_s8 }
  0x9b   :  { %p6945_p0 = por %p6944_p13, %p6943_p12 }
  0x9d   :  { %p6946_p1 = pnand %p6945_p0, %p6939_p11 }
  0x9f   :  { %6949 = shalt.err (!%p6946_p1)
}
  0xa0   :  { %115 = dma.hbm_to_vmem [thread:$0]  %s8450_s10, 48, %s113_s26, [#allocation14]  }
  0xa1   :  { %s6950_s5 = scalar_lea.hbm %s8452_s12, 2048 }
  0xa2   :  { %p6951_p2 = scmp.ne.s32.totalorder %s8452_s12, %s6950_s5  ;;  %p6954_p3 = scmp.lt.u32.totalorder %s6950_s5, %s8452_s12 }
  0xa4   :  { %p6956_p4 = pnand %p6954_p3, %p6951_p2 }
  0xa6   :  { %6959 = shalt.err (!%p6956_p4)
}
  0xa7   :  { %s6960_s29 = scalar_lea.vmem %s7286_s4, 2048  ;;  %p6965_p6 = scmp.lt.s32.totalorder %s7286_s4, %s7286_s4 }
  0xa8   :  { %p6961_p5 = scmp.ne.s32.totalorder %s7286_s4, %s6960_s29  ;;  %p6966_p7 = scmp.lt.s32.totalorder %s6960_s29, %s6960_s29 }
  0xaa   :  { %p6967_p8 = por %p6966_p7, %p6965_p6 }
  0xac   :  { %p6968_p9 = pnand %p6967_p8, %p6961_p5 }
  0xae   :  { %6971 = shalt.err (!%p6968_p9)
}
  0xaf   :  { %137 = dma.hbm_to_vmem [thread:$0]  %s8452_s12, 2048, %s7286_s4, [#allocation17], %s7038_s0, %s7038_s0, %s7039_s22  }
  0xb0   :  { %s7044_s28 = smov [#allocation21]   ;;  %s6972_s7 = scalar_lea.hbm %s8457_s17, 16 }
  0xb1   :  { %s162_s19 = sshll.u32 %s7044_s28, 4  ;;  %p6973_p10 = scmp.ne.s32.totalorder %s8457_s17, %s6972_s7  ;;  %s163_s19 = int_to_ptr.vmem [resolvable:$true] %s162_s19 }
  0xb2   :  { %p6976_p11 = scmp.lt.u32.totalorder %s6972_s7, %s8457_s17 }
  0xb4   :  { %p6978_p12 = pnand %p6976_p11, %p6973_p10 }
  0xb6   :  { %6981 = shalt.err (!%p6978_p12)
}
  0xb7   :  { %s6982_s25 = scalar_lea.vmem %s163_s19, 16  ;;  %s6986_s12 = scalar_lea.vmem %s163_s19, 32 }
  0xb8   :  { %p6983_p13 = scmp.ne.s32.totalorder %s163_s19, %s6982_s25  ;;  %p6987_p0 = scmp.lt.s32.totalorder %s163_s19, %s163_s19 }
  0xb9   :  { %p6988_p1 = scmp.lt.s32.totalorder %s6986_s12, %s6982_s25 }
  0xbb   :  { %p6989_p2 = por %p6988_p1, %p6987_p0 }
  0xbd   :  { %p6990_p3 = pnand %p6989_p2, %p6983_p13 }
  0xbf   :  { %6993 = shalt.err (!%p6990_p3)
}
  0xc0   :  { %165 = dma.hbm_to_vmem [thread:$0]  %s8457_s17, 16, %s163_s19, [#allocation20]  }
  0xc1   :  { %7016 = dma.done.wait [#allocation5], 6144  }
  0xc2   :  { %7017 = vsyncadd [#allocation5], 4294961152 }
  0xc3   :  { %7018 = dma.done.wait [#allocation8], 6192  }
  0xc4   :  { %7019 = vsyncadd [#allocation8], 4294961104 }
  0xc5   :  { %7020 = dma.done.wait [#allocation11], 6160  }
  0xc6   :  { %7021 = vsyncadd [#allocation11], 4294961136 }
  0xc7   :  { %7022 = dma.done.wait [#allocation14], 6192  }
  0xc8   :  { %7023 = vsyncadd [#allocation14], 4294961104 }
  0xc9   :  { %7024 = dma.done.wait [#allocation17], 2064  }
  0xca   :  { %7025 = vsyncadd [#allocation17], 4294965232 }
  0xcb   :  { %7026 = dma.done.wait [#allocation20], 2064  }
  0xcc   :  { %7027 = vsyncadd [#allocation20], 4294965232  ;;  %v7045_v0 = vmov 0   ;;  %v7046_v1 = vmov 2   ;;  %vm202_vm0 = vcmask 1041408   ;;  %s8464_s27 = sld [smem:[#allocation30_spill]] }
  0xcd   :  { %6542 = vset.pattern.permute.xlu0 %v7045_v0  ;;  %6544 = vset.pattern.permute.xlu1 %v7046_v1  ;;  %v284_v3 = vld [vmem:[#allocation4 + $0x8] sm:$0xff]  ;;  %v287_v5 = vld [vmem:[#allocation4 + $0x20] sm:$0xff]  ;;  %v286_v7 = vld [vmem:[#allocation4 + $0x18] sm:$0xff]  ;;  %v7047_v16 = vmov 0.0   ;;  %v7048_v24 = vmov 1   ;;  %v7049_v25 = vmov 3  }
  0xce   :  { %v283_v6 = vld [vmem:[#allocation4] sm:$0xff]  ;;  %v5370_v8 = vpack.c.bf16 %v287_v5, %v284_v3  ;;  %v290_v10 = vld [vmem:[#allocation4 + $0x38] sm:$0xff]  ;;  %v293_v11 = vld [vmem:[#allocation4 + $0x50] sm:$0xff]  ;;  %412 = vmatprep.mubr.f32.mxu0 %v7047_v16  ;;  %v7050_v37 = vmov 4   ;;  %v7051_v38 = vmov 5   ;;  %s8465_s6 = sld [smem:[#allocation31_spill]] }
  0xcf   :  { %v5372_v9 = vpack.c.bf16 %v286_v7, %v283_v6  ;;  %v285_v12 = vld [vmem:[#allocation4 + $0x10] sm:$0xff]  ;;  %v288_v13 = vld [vmem:[#allocation4 + $0x28] sm:$0xff]  ;;  %v5374_v17 = vpack.c.bf16 %v293_v11, %v290_v10  ;;  %v299_v20 = vld [vmem:[#allocation4 + $0x80] sm:$0xff]  ;;  %v7052_v49 = vmov 6   ;;  %v7053_v60 = vmov 7   ;;  %s8466_s28 = sld [smem:[#allocation32_spill]] }
  0xd0   :  { %v289_v14 = vld [vmem:[#allocation4 + $0x30] sm:$0xff]  ;;  %v292_v15 = vld [vmem:[#allocation4 + $0x48] sm:$0xff]  ;;  %5371 = vmatprep.subr.bf16.mxu0 %v5370_v8  ;;  %v5402_v18 = vpack.c.bf16 %v288_v13, %v285_v12  ;;  %v291_v21 = vld [vmem:[#allocation4 + $0x40] sm:$0xff] }
  0xd1   :  { %v296_v19 = vld [vmem:[#allocation4 + $0x68] sm:$0xff]  ;;  %5373 = vmatpush1.bf16.msra.mxu0 %v5372_v9  ;;  %v5376_v22 = vpack.c.bf16 %v292_v15, %v289_v14  ;;  %v294_v23 = vld [vmem:[#allocation4 + $0x58] sm:$0xff]  ;;  %v295_v28 = vld [vmem:[#allocation4 + $0x60] sm:$0xff] }
  0xd2   :  { %v201_v2 = vld [vmem:[%s8464_s27] sm:$0x3]  ;;  %v5378_v26 = vpack.c.bf16 %v299_v20, %v296_v19  ;;  %v5406_v27 = vpack.c.bf16 %v294_v23, %v291_v21  ;;  %v298_v29 = vld [vmem:[#allocation4 + $0x78] sm:$0xff]  ;;  %v305_v31 = vld [vmem:[#allocation4 + $0xb0] sm:$0xff]  ;;  %5375 = vmatprep.subr.bf16.mxu0 %v5374_v17  ;;  %5403 = vmatprep.subr.bf16.mxu1 %v5402_v18 }
  0xd3   :  { %v7338_v4 = vsel %vm202_vm0, %v201_v2, 0  ;;  %v302_v30 = vld [vmem:[#allocation4 + $0x98] sm:$0xff]  ;;  %v297_v32 = vld [vmem:[#allocation4 + $0x70] sm:$0xff]  ;;  %v300_v33 = vld [vmem:[#allocation4 + $0x88] sm:$0xff]  ;;  %5405 = vmatpush3.bf16.msra.mxu1 %v5402_v18  ;;  %v5380_v34 = vpack.c.bf16 %v298_v29, %v295_v28  ;;  %v199_v28 = vlaneseq }
  0xd4   :  { %207 = vperm.xlu0 %6542, %v7338_v4   ;;  %217 = vperm.xlu1 %6544, %v7338_v4   ;;  %v5382_v35 = vpack.c.bf16 %v305_v31, %v302_v30  ;;  %v5410_v36 = vpack.c.bf16 %v300_v33, %v297_v32  ;;  %v301_v39 = vld [vmem:[#allocation4 + $0x90] sm:$0xff]  ;;  %v304_v40 = vld [vmem:[#allocation4 + $0xa8] sm:$0xff]  ;;  %v311_v42 = vld [vmem:[#allocation4 + $0xe0] sm:$0xff] }
  0xd5   :  { %5377 = vmatpush1.bf16.msra.mxu0 %v5376_v22  ;;  %5407 = vmatprep.subr.bf16.mxu1 %v5406_v27  ;;  %v308_v41 = vld [vmem:[#allocation4 + $0xc8] sm:$0xff]  ;;  %v303_v43 = vld [vmem:[#allocation4 + $0xa0] sm:$0xff]  ;;  %v306_v44 = vld [vmem:[#allocation4 + $0xb8] sm:$0xff]  ;;  %v5384_v46 = vpack.c.bf16 %v304_v40, %v301_v39  ;;  %v7371_v31 = vand.u32 127, %v199_v28  ;;  %v7054_v40 = vmov 1.0  }
  0xd6   :  { %5379 = vmatprep.subr.bf16.mxu0 %v5378_v26  ;;  %v204_v45 = vld [vmem:[%s8465_s6] sm:$0x3]  ;;  %v5386_v47 = vpack.c.bf16 %v311_v42, %v308_v41  ;;  %v5414_v48 = vpack.c.bf16 %v306_v44, %v303_v43  ;;  %v307_v51 = vld [vmem:[#allocation4 + $0xc0] sm:$0xff]  ;;  %v310_v52 = vld [vmem:[#allocation4 + $0xd8] sm:$0xff] }
  0xd7   :  { %5409 = vmatpush3.bf16.msra.mxu1 %v5406_v27  ;;  %v7354_v50 = vsel %vm202_vm0, %v204_v45, 0  ;;  %v314_v53 = vld [vmem:[#allocation4 + $0xf8] sm:$0xff]  ;;  %v317_v54 = vld [vmem:[#allocation4 + $0x110] sm:$0xff]  ;;  %v312_v56 = vld [vmem:[#allocation4 + $0xe8] sm:$0xff]  ;;  %v5388_v57 = vpack.c.bf16 %v310_v52, %v307_v51  ;;  %vm246_vm9 = vcmp.eq.s32.totalorder %v7371_v31, 0 }
  0xd8   :  { %6543 = vset.pattern.permute.xlu0 %v7048_v24  ;;  %6545 = vset.pattern.permute.xlu1 %v7049_v25  ;;  %v309_v55 = vld [vmem:[#allocation4 + $0xd0] sm:$0xff]  ;;  %v5390_v58 = vpack.c.bf16 %v317_v54, %v314_v53  ;;  %v316_v62 = vld [vmem:[#allocation4 + $0x108] sm:$0xff]  ;;  %v315_v2 = vld [vmem:[#allocation4 + $0x100] sm:$0xff] }
  0xd9   :  { %212 = vperm.xlu0 %6543, %v7338_v4   ;;  %222 = vperm.xlu1 %6545, %v7338_v4   ;;  %v5418_v59 = vpack.c.bf16 %v312_v56, %v309_v55  ;;  %v313_v61 = vld [vmem:[#allocation4 + $0xf0] sm:$0xff]  ;;  %v320_v63 = vld [vmem:[#allocation4 + $0x128] sm:$0xff]  ;;  %v318_v3 = vld [vmem:[#allocation4 + $0x118] sm:$0xff] }
  0xda   :  { %5381 = vmatpush1.bf16.msra.mxu0 %v5380_v34  ;;  %5411 = vmatprep.subr.bf16.mxu1 %v5410_v36  ;;  %v5392_v5 = vpack.c.bf16 %v316_v62, %v313_v61  ;;  %v5422_v7 = vpack.c.bf16 %v318_v3, %v315_v2  ;;  %v319_v8 = vld [vmem:[#allocation4 + $0x120] sm:$0xff]  ;;  %v322_v9 = vld [vmem:[#allocation4 + $0x138] sm:$0xff]  ;;  %v329_v11 = vld [vmem:[#allocation4 + $0x170] sm:$0xff] }
  0xdb   :  { %5383 = vmatprep.subr.bf16.mxu0 %v5382_v35  ;;  %5413 = vmatpush3.bf16.msra.mxu1 %v5410_v36  ;;  %v326_v10 = vld [vmem:[#allocation4 + $0x158] sm:$0xff]  ;;  %v324_v12 = vld [vmem:[#allocation4 + $0x148] sm:$0xff]  ;;  %v5396_v13 = vpack.c.bf16 %v322_v9, %v319_v8  ;;  %v325_v15 = vld [vmem:[#allocation4 + $0x150] sm:$0xff] }
  0xdc   :  { %5415 = vmatprep.subr.bf16.mxu1 %v5414_v48  ;;  %v5398_v14 = vpack.c.bf16 %v329_v11, %v326_v10  ;;  %v328_v17 = vld [vmem:[#allocation4 + $0x168] sm:$0xff]  ;;  %v327_v19 = vld [vmem:[#allocation4 + $0x160] sm:$0xff]  ;;  %v330_v20 = vld [vmem:[#allocation4 + $0x178] sm:$0xff] }
  0xdd   :  { %6546 = vset.pattern.permute.xlu1 %v7050_v37  ;;  %6547 = vset.pattern.permute.xlu0 %v7051_v38  ;;  %v591_v21 = vld [vmem:[#allocation12 + $0x8] sm:$0xff]  ;;  %v594_v22 = vld [vmem:[#allocation12 + $0x20] sm:$0xff]  ;;  %v5400_v23 = vpack.c.bf16 %v328_v17, %v325_v15  ;;  %v592_v26 = vld [vmem:[#allocation12 + $0x10] sm:$0xff] }
  0xde   :  { %227 = vperm.xlu1 %6546, %v7338_v4   ;;  %232 = vperm.xlu0 %6547, %v7338_v4   ;;  %v595_v27 = vld [vmem:[#allocation12 + $0x28] sm:$0xff]  ;;  %v590_v29 = vld [vmem:[#allocation12] sm:$0xff]  ;;  %v593_v30 = vld [vmem:[#allocation12 + $0x18] sm:$0xff] }
  0xdf   :  { %5385 = vmatpush1.bf16.msra.mxu0 %v5384_v46  ;;  %5417 = vmatpush3.bf16.msra.mxu1 %v5414_v48  ;;  %v597_v32 = vld [vmem:[#allocation12 + $0x38] sm:$0xff]  ;;  %v600_v33 = vld [vmem:[#allocation12 + $0x50] sm:$0xff]  ;;  %v5436_v34 = vpack.c.bf16 %v593_v30, %v590_v29  ;;  %v603_v41 = vld [vmem:[#allocation12 + $0x68] sm:$0xff] }
  0xe0   :  { %5387 = vmatprep.subr.bf16.mxu0 %v5386_v47  ;;  %5419 = vmatprep.subr.bf16.mxu1 %v5418_v59  ;;  %v5438_v36 = vpack.c.bf16 %v600_v33, %v597_v32  ;;  %v596_v39 = vld [vmem:[#allocation12 + $0x30] sm:$0xff]  ;;  %v606_v42 = vld [vmem:[#allocation12 + $0x80] sm:$0xff]  ;;  %v601_v44 = vld [vmem:[#allocation12 + $0x58] sm:$0xff] }
  0xe1   :  { %v598_v43 = vld [vmem:[#allocation12 + $0x40] sm:$0xff]  ;;  %v609_v52 = vld [vmem:[#allocation12 + $0x98] sm:$0xff]  ;;  %v612_v53 = vld [vmem:[#allocation12 + $0xb0] sm:$0xff] }
  0xe2   :  { %6548 = vset.pattern.permute.xlu1 %v7052_v49  ;;  %6550 = vset.pattern.permute.xlu0 %v7045_v0  ;;  %v323_v0 = vld [vmem:[#allocation4 + $0x140] sm:$0xff]  ;;  %v5470_v51 = vpack.c.bf16 %v601_v44, %v598_v43  ;;  %v604_v54 = vld [vmem:[#allocation12 + $0x70] sm:$0xff]  ;;  %v607_v55 = vld [vmem:[#allocation12 + $0x88] sm:$0xff] }
  0xe3   :  { %237 = vperm.xlu1 %6548, %v7338_v4   ;;  %249 = vperm.xlu0 %6550, %v7354_v50   ;;  %v5394_v6 = vpack.c.bf16 %v323_v0, %v320_v63  ;;  %v602_v48 = vld [vmem:[#allocation12 + $0x60] sm:$0xff]  ;;  %v615_v62 = vld [vmem:[#allocation12 + $0xc8] sm:$0xff]  ;;  %v613_v3 = vld [vmem:[#allocation12 + $0xb8] sm:$0xff] }
  0xe4   :  { %5389 = vmatpush1.bf16.msra.mxu0 %v5388_v57  ;;  %5421 = vmatpush3.bf16.msra.mxu1 %v5418_v59  ;;  %v5446_v57 = vpack.c.bf16 %v612_v53, %v609_v52  ;;  %v611_v59 = vld [vmem:[#allocation12 + $0xa8] sm:$0xff]  ;;  %v618_v63 = vld [vmem:[#allocation12 + $0xe0] sm:$0xff]  ;;  %v617_v8 = vld [vmem:[#allocation12 + $0xd8] sm:$0xff] }
  0xe5   :  { %5391 = vmatprep.subr.bf16.mxu0 %v5390_v58  ;;  %5423 = vmatprep.subr.bf16.mxu1 %v5422_v7  ;;  %v608_v58 = vld [vmem:[#allocation12 + $0x90] sm:$0xff]  ;;  %v610_v2 = vld [vmem:[#allocation12 + $0xa0] sm:$0xff]  ;;  %v621_v10 = vld [vmem:[#allocation12 + $0xf8] sm:$0xff] }
  0xe6   :  { %v5478_v9 = vpack.c.bf16 %v613_v3, %v610_v2  ;;  %v624_v11 = vld [vmem:[#allocation12 + $0x110] sm:$0xff]  ;;  %v633_v30 = vld [vmem:[#allocation12 + $0x158] sm:$0xff]  ;;  %v1063_v44 = vld [vmem:[#allocation7 + $0x8] sm:$0xff] }
  0xe7   :  { %6549 = vset.pattern.permute.xlu1 %v7053_v60  ;;  %6553 = vset.pattern.permute.xlu0 %v7049_v25  ;;  %v5434_v25 = vpack.c.bf16 %v594_v22, %v591_v21  ;;  %v5474_v60 = vpack.c.bf16 %v607_v55, %v604_v54  ;;  %v5454_v15 = vpack.c.bf16 %v624_v11, %v621_v10  ;;  %v620_v17 = vld [vmem:[#allocation12 + $0xf0] sm:$0xff]  ;;  %v630_v21 = vld [vmem:[#allocation12 + $0x140] sm:$0xff]  ;;  %v637_v43 = vld [vmem:[#allocation12 + $0x178] sm:$0xff] }
  0xe8   :  { %242 = vperm.xlu1 %6549, %v7338_v4   ;;  %264 = vperm.xlu0 %6553, %v7354_v50   ;;  %v321_v4 = vld [vmem:[#allocation4 + $0x130] sm:$0xff]  ;;  %v622_v22 = vld [vmem:[#allocation12 + $0x100] sm:$0xff] }
  0xe9   :  { %5393 = vmatpush1.bf16.msra.mxu0 %v5392_v5  ;;  %v5426_v18 = vpack.c.bf16 %v324_v12, %v321_v4  ;;  %5425 = vmatpush3.bf16.msra.mxu1 %v5422_v7  ;;  %v5448_v5 = vpack.c.bf16 %v611_v59, %v608_v58  ;;  %v614_v7 = vld [vmem:[#allocation12 + $0xc0] sm:$0xff]  ;;  %v616_v4 = vld [vmem:[#allocation12 + $0xd0] sm:$0xff]  ;;  %v619_v12 = vld [vmem:[#allocation12 + $0xe8] sm:$0xff] }
  0xea   :  { %5395 = vmatprep.subr.bf16.mxu0 %v5394_v6  ;;  %v5450_v6 = vpack.c.bf16 %v618_v63, %v615_v62  ;;  %v636_v32 = vld [vmem:[#allocation12 + $0x170] sm:$0xff]  ;;  %v1071_v58 = vld [vmem:[#allocation7 + $0x48] sm:$0xff]  ;;  %v1074_v63 = vld [vmem:[#allocation7 + $0x60] sm:$0xff] }
  0xeb   :  { %5427 = vmatprep.subr.bf16.mxu1 %v5426_v18  ;;  %v628_v33 = vld [vmem:[#allocation12 + $0x130] sm:$0xff]  ;;  %v1075_v59 = vld [vmem:[#allocation7 + $0x68] sm:$0xff] }
  0xec   :  { %6551 = vset.pattern.permute.xlu1 %v7048_v24  ;;  %6556 = vset.pattern.permute.xlu0 %v7052_v49  ;;  %v5430_v24 = vpack.c.bf16 %v330_v20, %v327_v19  ;;  %v605_v49 = vld [vmem:[#allocation12 + $0x78] sm:$0xff]  ;;  %v5482_v19 = vpack.c.bf16 %v619_v12, %v616_v4  ;;  %v627_v20 = vld [vmem:[#allocation12 + $0x128] sm:$0xff] }
  0xed   :  { %254 = vperm.xlu1 %6551, %v7354_v50   ;;  %279 = vperm.xlu0 %6556, %v7354_v50   ;;  %v5444_v56 = vpack.c.bf16 %v605_v49, %v602_v48  ;;  %v1062_v48 = vld [vmem:[#allocation7] sm:$0xff]  ;;  %v1065_v49 = vld [vmem:[#allocation7 + $0x18] sm:$0xff]  ;;  %v1072_v52 = vld [vmem:[#allocation7 + $0x50] sm:$0xff] }
  0xee   :  { %5397 = vmatpush1.bf16.msra.mxu0 %v5396_v13  ;;  %5429 = vmatpush3.bf16.msra.mxu1 %v5426_v18  ;;  %v623_v18 = vld [vmem:[#allocation12 + $0x108] sm:$0xff]  ;;  %v7438_v54 = vpack.c.bf16 %v1065_v49, %v1062_v48  ;;  %v7056_v48 = vmov 0.0|0.0  }
  0xef   :  { %5399 = vmatprep.subr.bf16.mxu0 %v5398_v14  ;;  %5431 = vmatprep.subr.bf16.mxu1 %v5430_v24  ;;  %v5452_v14 = vpack.c.bf16 %v617_v8, %v614_v7  ;;  %v900_v2 = vld [vmem:[%s8454_s14] sm:$0xff]  ;;  %v1084_v7 = vld [vmem:[#allocation7 + $0xb0] sm:$0xff] }
  0xf0   :  { %v1080_v10 = vld [vmem:[#allocation7 + $0x90] sm:$0xff]  ;;  %v1083_v11 = vld [vmem:[#allocation7 + $0xa8] sm:$0xff] }
  0xf1   :  { %6552 = vset.pattern.permute.xlu1 %v7046_v1  ;;  %v5466_v1 = vpack.c.bf16 %v595_v27, %v592_v26  ;;  %v5458_v26 = vpack.c.bf16 %v630_v21, %v627_v20  ;;  %v626_v27 = vld [vmem:[#allocation12 + $0x120] sm:$0xff]  ;;  %v1093_v20 = vld [vmem:[#allocation7 + $0xf8] sm:$0xff]  ;;  %v1096_v21 = vld [vmem:[#allocation7 + $0x110] sm:$0xff] }
  0xf2   :  { %259 = vperm.xlu1 %6552, %v7354_v50   ;;  %5401 = vmatpush1.bf16.msra.mxu0 %v5400_v23  ;;  %v625_v23 = vld [vmem:[#allocation12 + $0x118] sm:$0xff]  ;;  %v1087_v12 = vld [vmem:[#allocation7 + $0xc8] sm:$0xff] }
  0xf3   :  { %5435 = vmatprep.subr.bf16.mxu0 %v5434_v25  ;;  %5433 = vmatpush3.bf16.msra.mxu1 %v5430_v24  ;;  %v5456_v24 = vpack.c.bf16 %v623_v18, %v620_v17  ;;  %v5486_v29 = vpack.c.bf16 %v625_v23, %v622_v22  ;;  %v1086_v18 = vld [vmem:[#allocation7 + $0xc0] sm:$0xff]  ;;  %v7525_v23 = vpack.c.bf16 %v1096_v21, %v1093_v20 }
  0xf4   :  { %5467 = vmatprep.subr.bf16.mxu1 %v5466_v1 }
  0xf6   :  { %6554 = vset.pattern.permute.xlu1 %v7050_v37 }
  0xf7   :  { %269 = vperm.xlu1 %6554, %v7354_v50  }
  0xfb   :  { %6555 = vset.pattern.permute.xlu1 %v7051_v38  ;;  %v599_v38 = vld [vmem:[#allocation12 + $0x48] sm:$0xff] }
  0xfc   :  { %274 = vperm.xlu1 %6555, %v7354_v50   ;;  %v5440_v45 = vpack.c.bf16 %v599_v38, %v596_v39  ;;  %v5442_v50 = vpack.c.bf16 %v606_v42, %v603_v41  ;;  %v635_v39 = vld [vmem:[#allocation12 + $0x168] sm:$0xff]  ;;  %v634_v42 = vld [vmem:[#allocation12 + $0x160] sm:$0xff] }
 0x153   :  { %v208_v35 = vpop.permute.xlu0 %207  ;;  %v218_v37 = vpop.permute.xlu1 %217 }
 0x154   :  { %vm209_vm1 = vcmp.eq.s32.totalorder %v7371_v31, %v208_v35  ;;  %vm219_vm3 = vcmp.eq.s32.totalorder %v7371_v31, %v218_v37  ;;  %v632_v37 = vld [vmem:[#allocation12 + $0x150] sm:$0xff] }
 0x155   :  { %4198 = vmatmul.mubr.msk.f32.vlgmr.msra.gmra.mrb[0].mxu0 %vm209_vm1, %v7054_v40  ;;  %4665 = vmatprep.mubr.msk.f32.mxu1 %vm209_vm1, %v7054_v40 }
 0x156   :  { %5437 = vmatpush1.bf16.msra.mxu0 %v5436_v34  ;;  %418 = vmatprep.mubr.f32.mxu0 %v7047_v16  ;;  %v631_v34 = vld [vmem:[#allocation12 + $0x148] sm:$0xff] }
 0x157   :  { %5439 = vmatprep.subr.bf16.mxu0 %v5438_v36  ;;  %v5462_v36 = vpack.c.bf16 %v636_v32, %v633_v30  ;;  %v5490_v41 = vpack.c.bf16 %v631_v34, %v628_v33  ;;  %v898_v30 = vld [vmem:[%s8453_s13] sm:$0xff]  ;;  %v1098_v32 = vld [vmem:[#allocation7 + $0x120] sm:$0xff]  ;;  %v1101_v33 = vld [vmem:[#allocation7 + $0x138] sm:$0xff] }
 0x158   :  { %v213_v46 = vpop.permute.xlu0 %212  ;;  %v223_v47 = vpop.permute.xlu1 %222  ;;  %v1064_v34 = vld [vmem:[#allocation7 + $0x10] sm:$0xff] }
 0x159   :  { %vm214_vm2 = vcmp.eq.s32.totalorder %v7371_v31, %v213_v46  ;;  %vm224_vm4 = vcmp.eq.s32.totalorder %v7371_v31, %v223_v47  ;;  %v5464_v46 = vpack.c.bf16 %v635_v39, %v632_v37  ;;  %v5494_v47 = vpack.c.bf16 %v637_v43, %v634_v42  ;;  %v1105_v37 = vld [vmem:[#allocation7 + $0x158] sm:$0xff]  ;;  %v1108_v39 = vld [vmem:[#allocation7 + $0x170] sm:$0xff] }
 0x15a   :  { %4199 = vmatmul.mubr.msk.f32.gmra.mrb[2].mxu0 %vm214_vm2, %v7054_v40  ;;  %4666 = vmatmul.mubr.msk.f32.vlgmr.msra.gmra.mrb[0].mxu1 %vm214_vm2, %v7054_v40  ;;  %vm7055_vm2 = vmmov 0   ;;  %v1104_v43 = vld [vmem:[#allocation7 + $0x150] sm:$0xff] }
 0x15b   :  { %5441 = vmatpush1.bf16.msra.mxu0 %v5440_v45  ;;  %5469 = vmatpush3.bf16.msra.mxu1 %v5466_v1  ;;  %v629_v1 = vld [vmem:[#allocation12 + $0x138] sm:$0xff] }
 0x15c   :  { %4668 = vmatprep.mubr.msk.f32.mxu1 %vm219_vm3, %v7054_v40  ;;  %424 = vmatprep.mubr.f32.mxu0 %v7047_v16  ;;  %v5460_v35 = vpack.c.bf16 %v629_v1, %v626_v27  ;;  %v1066_v45 = vld [vmem:[#allocation7 + $0x20] sm:$0xff]  ;;  %v899_v1 = vld [vmem:[%s8443_s3] sm:$0x3] }
 0x15d   :  { %5443 = vmatprep.subr.bf16.mxu0 %v5442_v50  ;;  %5471 = vmatprep.subr.bf16.mxu1 %v5470_v51  ;;  %v228_v61 = vpop.permute.xlu1 %227  ;;  %v233_v0 = vpop.permute.xlu0 %232  ;;  %v7431_v50 = vpack.c.bf16 %v1066_v45, %v1063_v44  ;;  %v1102_v27 = vld [vmem:[#allocation7 + $0x140] sm:$0xff]  ;;  %v7565_v44 = vpack.c.bf16 %v1108_v39, %v1105_v37  ;;  %v1107_v45 = vld [vmem:[#allocation7 + $0x168] sm:$0xff] }
 0x15e   :  { %4200 = vmatmul.mubr.msk.f32.gmra.mrb[4].mxu0 %vm219_vm3, %v7054_v40  ;;  %4669 = vmatmul.mubr.msk.f32.gmra.mrb[2].mxu1 %vm224_vm4, %v7054_v40  ;;  %vm229_vm5 = vcmp.eq.s32.totalorder %v7371_v31, %v228_v61  ;;  %vm234_vm6 = vcmp.eq.s32.totalorder %v7371_v31, %v233_v0  ;;  %v1077_v0 = vld [vmem:[#allocation7 + $0x78] sm:$0xff]  ;;  %vm901_vm3 = vcmask 64512   ;;  %v7576_v49 = vpack.c.bf16 %v1107_v45, %v1104_v43  ;;  %v638_v37 = vld [vmem:[#allocation15] sm:$0x7] }
 0x15f   :  { %5445 = vmatpush1.bf16.msra.mxu0 %v5444_v56  ;;  %5473 = vmatpush3.bf16.msra.mxu1 %v5470_v51  ;;  %v1069_v51 = vld [vmem:[#allocation7 + $0x38] sm:$0xff]  ;;  %v7472_v8 = vpack.c.bf16 %v1077_v0, %v1074_v63 }
 0x160   :  { %430 = vmatprep.mubr.f32.mxu0 %v7047_v16  ;;  %5447 = vmatprep.subr.bf16.mxu0 %v5446_v57  ;;  %v7441_v56 = vpack.c.bf16 %v1072_v52, %v1069_v51  ;;  %v1068_v57 = vld [vmem:[#allocation7 + $0x30] sm:$0xff]  ;;  %v1097_v63 = vld [vmem:[#allocation7 + $0x118] sm:$0xff] }
 0x161   :  { %5475 = vmatprep.subr.bf16.mxu1 %v5474_v60  ;;  %4671 = vmatprep.mubr.msk.f32.mxu1 %vm229_vm5, %v7054_v40  ;;  %v7449_v61 = vpack.c.bf16 %v1071_v58, %v1068_v57  ;;  %v1076_v52 = vld [vmem:[#allocation7 + $0x70] sm:$0xff]  ;;  %v1082_v57 = vld [vmem:[#allocation7 + $0xa0] sm:$0xff]  ;;  %v1085_v58 = vld [vmem:[#allocation7 + $0xb8] sm:$0xff] }
 0x162   :  { %4201 = vmatmul.mubr.msk.f32.gmra.mrb[6].mxu0 %vm224_vm4, %v7054_v40  ;;  %4672 = vmatmul.mubr.msk.f32.gmra.mrb[4].mxu1 %vm234_vm6, %v7054_v40  ;;  %v238_v13 = vpop.permute.xlu1 %237  ;;  %v250_v55 = vpop.permute.xlu0 %249  ;;  %vm4139_vm4 = vcmask 1040384  }
 0x163   :  { %5449 = vmatpush1.bf16.msra.mxu0 %v5448_v5  ;;  %5477 = vmatpush3.bf16.msra.mxu1 %v5474_v60  ;;  %vm239_vm7 = vcmp.eq.s32.totalorder %v7371_v31, %v238_v13  ;;  %v1078_v60 = vld [vmem:[#allocation7 + $0x80] sm:$0xff]  ;;  %vm251_vm10 = vcmp.eq.s32.totalorder %v7371_v31, %v250_v55 }
 0x164   :  { %436 = vmatprep.mubr.f32.mxu0 %v7047_v16  ;;  %5451 = vmatprep.subr.bf16.mxu0 %v5450_v6  ;;  %v7461_v3 = vpack.c.bf16 %v1078_v60, %v1075_v59  ;;  %v1081_v6 = vld [vmem:[#allocation7 + $0x98] sm:$0xff]  ;;  %v1090_v13 = vld [vmem:[#allocation7 + $0xe0] sm:$0xff]  ;;  %v1091_v59 = vld [vmem:[#allocation7 + $0xe8] sm:$0xff] }
 0x165   :  { %5479 = vmatprep.subr.bf16.mxu1 %v5478_v9  ;;  %4674 = vmatprep.mubr.msk.f32.mxu1 %vm239_vm7, %v7054_v40  ;;  %v7504_v17 = vpack.c.bf16 %v1090_v13, %v1087_v12  ;;  %v331_v13 = vld [vmem:[#allocation9] sm:$0x7] }
 0x166   :  { %4202 = vmatmul.mubr.msk.f32.gmra.mrb[8].mxu0 %vm229_vm5, %v7054_v40  ;;  %vm4142_vm5 = vcmask 1042432  }
 0x167   :  { %5453 = vmatpush1.bf16.msra.mxu0 %v5452_v14  ;;  %5481 = vmatpush3.bf16.msra.mxu1 %v5478_v9  ;;  %v243_v25 = vpop.permute.xlu1 %242  ;;  %v265_v5 = vpop.permute.xlu0 %264  ;;  %v7476_v9 = vpack.c.bf16 %v1084_v7, %v1081_v6  ;;  %v7496_v14 = vpack.c.bf16 %v1083_v11, %v1080_v10  ;;  %v1106_v7 = vld [vmem:[#allocation7 + $0x160] sm:$0xff]  ;;  %v1109_v10 = vld [vmem:[#allocation7 + $0x178] sm:$0xff] }
 0x168   :  { %442 = vmatprep.mubr.f32.mxu0 %v7047_v16  ;;  %5455 = vmatprep.subr.bf16.mxu0 %v5454_v15  ;;  %vm244_vm8 = vcmp.eq.s32.totalorder %v7371_v31, %v243_v25  ;;  %vm266_vm13 = vcmp.eq.s32.totalorder %v7371_v31, %v265_v5  ;;  %v1095_v25 = vld [vmem:[#allocation7 + $0x108] sm:$0xff]  ;;  %v7623_v11 = vpack.c.bf16 %v1109_v10, %v1106_v7 }
 0x169   :  { %5483 = vmatprep.subr.bf16.mxu1 %v5482_v19  ;;  %4675 = vmatmul.mubr.msk.f32.gmra.mrb[6].mxu1 %vm244_vm8, %v7054_v40  ;;  %v1103_v5 = vld [vmem:[#allocation7 + $0x148] sm:$0xff] }
 0x16a   :  { %4203 = vmatmul.mubr.msk.f32.gmra.mrb[10].mxu0 %vm234_vm6, %v7054_v40  ;;  %4709 = vmatprep.mubr.msk.f32.mxu1 %vm246_vm9, %v7054_v40  ;;  %vm4144_vm6 = vcmask 1043456  }
 0x16b   :  { %5457 = vmatpush1.bf16.msra.mxu0 %v5456_v24  ;;  %5485 = vmatpush3.bf16.msra.mxu1 %v5482_v19  ;;  %v1089_v19 = vld [vmem:[#allocation7 + $0xd8] sm:$0xff]  ;;  %v1092_v24 = vld [vmem:[#allocation7 + $0xf0] sm:$0xff] }
 0x16c   :  { %448 = vmatprep.mubr.f32.mxu0 %v7047_v16  ;;  %5459 = vmatprep.subr.bf16.mxu0 %v5458_v26  ;;  %v7425_v38 = vpop.permute.xlu1 %254  ;;  %v7502_v15 = vpop.permute.xlu0 %279  ;;  %v7521_v22 = vpack.c.bf16 %v1089_v19, %v1086_v18  ;;  %v1099_v26 = vld [vmem:[#allocation7 + $0x128] sm:$0xff] }
 0x16d   :  { %5487 = vmatprep.subr.bf16.mxu1 %v5486_v29  ;;  %vm256_vm11 = vcmp.eq.s32.totalorder %v7371_v31, %v7425_v38  ;;  %vm281_vm1 = vcmp.eq.s32.totalorder %v7371_v31, %v7502_v15  ;;  %v897_v38 = vld [vmem:[%s8466_s28] sm:$0x3] }
 0x16e   :  { %4204 = vmatmul.mubr.msk.f32.gmra.mrb[12].mxu0 %vm239_vm7, %v7054_v40  ;;  %vm4146_vm7 = vcmask 1044480  }
 0x16f   :  { %5461 = vmatpush1.bf16.msra.mxu0 %v5460_v35  ;;  %5489 = vmatpush3.bf16.msra.mxu1 %v5486_v29  ;;  %v7540_v29 = vpack.c.bf16 %v1095_v25, %v1092_v24  ;;  %v1067_v35 = vld [vmem:[#allocation7 + $0x28] sm:$0xff] }
 0x170   :  { %454 = vmatprep.mubr.f32.mxu0 %v7047_v16  ;;  %5463 = vmatprep.subr.bf16.mxu0 %v5462_v36  ;;  %v7547_v36 = vpack.c.bf16 %v1102_v27, %v1099_v26  ;;  %v7560_v42 = vpack.c.bf16 %v1067_v35, %v1064_v34 }
 0x171   :  { %5491 = vmatprep.subr.bf16.mxu1 %v5490_v41  ;;  %v7433_v53 = vpop.permute.xlu1 %259 }
 0x172   :  { %4205 = vmatmul.mubr.msk.f32.gmra.mrb[14].mxu0 %vm244_vm8, %v7054_v40  ;;  %vm261_vm12 = vcmp.eq.s32.totalorder %v7371_v31, %v7433_v53  ;;  %v1079_v53 = vld [vmem:[#allocation7 + $0x88] sm:$0xff]  ;;  %vm4150_vm8 = vcmask 1046528  }
 0x173   :  { %5465 = vmatpush1.bf16.msra.mxu0 %v5464_v46  ;;  %5493 = vmatpush3.bf16.msra.mxu1 %v5490_v41  ;;  %v7558_v41 = vpack.c.bf16 %v1101_v33, %v1098_v32  ;;  %v1070_v46 = vld [vmem:[#allocation7 + $0x40] sm:$0xff]  ;;  %v7591_v55 = vpack.c.bf16 %v1079_v53, %v1076_v52 }
 0x174   :  { %719 = vmatprep.mubr.f32.mxu0 %v7047_v16  ;;  %5495 = vmatprep.subr.bf16.mxu1 %v5494_v47 }
 0x175   :  { %5499 = vmatprep.subr.bf16.mxu0 %v7431_v50 }
 0x176   :  { %4214 = vmatmul.mubr.msk.f32.vlgmr.msra.gmra.mrb[16].mxu0 %vm246_vm9, %v7054_v40  ;;  %v7451_v62 = vpop.permute.xlu1 %269 }
 0x177   :  { %5497 = vmatpush3.bf16.msra.mxu1 %v5494_v47  ;;  %5501 = vmatpush1.bf16.msra.mxu0 %v7438_v54  ;;  %vm271_vm14 = vcmp.eq.s32.totalorder %v7371_v31, %v7451_v62  ;;  %v1073_v47 = vld [vmem:[#allocation7 + $0x58] sm:$0xff]  ;;  %v1094_v62 = vld [vmem:[#allocation7 + $0x100] sm:$0xff] }
 0x178   :  { %725 = vmatprep.mubr.f32.mxu0 %v7047_v16  ;;  %5503 = vmatprep.subr.bf16.mxu0 %v7441_v56  ;;  %v7578_v51 = vpack.c.bf16 %v1073_v47, %v1070_v46  ;;  %v7611_v0 = vpack.c.bf16 %v1097_v63, %v1094_v62 }
 0x179   :  { %4721 = vmatprep.subr.mxu1 %v7047_v16 }
 0x17a   :  { %4710 = vmatmul.mubr.msk.f32.vlgmr.msra.gmra.mrb[8].mxu1 %vm251_vm10, %v7054_v40  ;;  %4215 = vmatmul.mubr.msk.f32.gmra.mrb[18].mxu0 %vm251_vm10, %v7054_v40 }
 0x17b   :  { %4712 = vmatprep.mubr.msk.f32.mxu1 %vm256_vm11, %v7054_v40  ;;  %5505 = vmatpush1.bf16.msra.mxu0 %v7449_v61  ;;  %v7479_v4 = vpop.permute.xlu1 %274 }
 0x17c   :  { %731 = vmatprep.mubr.f32.mxu0 %v7047_v16  ;;  %4722 = vmatpush3.msra.mxu1 %v900_v2  ;;  %vm276_vm15 = vcmp.eq.s32.totalorder %v7371_v31, %v7479_v4  ;;  %v7598_v31 = vpack.c.bf16 %v1085_v58, %v1082_v57  ;;  %v1100_v2 = vld [vmem:[#allocation7 + $0x130] sm:$0xff]  ;;  %v7656_v4 = vshrl.u32 %v199_v28, 7 }
 0x17d   :  { %5507 = vmatprep.subr.bf16.mxu0 %v7461_v3  ;;  %4726 = vmatprep.subr.mxu1 %v7047_v16  ;;  %v7617_v6 = vpack.c.bf16 %v1103_v5, %v1100_v2 }
 0x17e   :  { %4713 = vmatmul.mubr.msk.f32.gmra.mrb[10].mxu1 %vm261_vm12, %v7054_v40  ;;  %4216 = vmatmul.mubr.msk.f32.gmra.mrb[20].mxu0 %vm256_vm11, %v7054_v40  ;;  %v343_v12 = vsub.s32 2, %v7656_v4 }
 0x17f   :  { %5509 = vmatpush1.bf16.msra.mxu0 %v7472_v8  ;;  %4715 = vmatprep.mubr.msk.f32.mxu1 %vm266_vm13, %v7054_v40 }
 0x180   :  { %737 = vmatprep.mubr.f32.mxu0 %v7047_v16  ;;  %5511 = vmatprep.subr.bf16.mxu0 %v7476_v9  ;;  %v344_v15 = vrot.slane %v331_v13, %v343_v12  ;;  %v7673_v39 = vrot.slane %v638_v37, %v343_v12 }
 0x182   :  { %4716 = vmatmul.mubr.msk.f32.gmra.mrb[12].mxu1 %vm271_vm14, %v7054_v40  ;;  %4217 = vmatmul.mubr.msk.f32.gmra.mrb[22].mxu0 %vm261_vm12, %v7054_v40 }
 0x183   :  { %5513 = vmatpush1.bf16.msra.mxu0 %v7496_v14  ;;  %4718 = vmatprep.mubr.msk.f32.mxu1 %vm276_vm15, %v7054_v40 }
 0x184   :  { %743 = vmatprep.mubr.f32.mxu0 %v7047_v16  ;;  %5515 = vmatprep.subr.bf16.mxu0 %v7504_v17 }
 0x186   :  { %4719 = vmatmul.mubr.msk.f32.gmra.mrb[14].mxu1 %vm281_vm1, %v7054_v40  ;;  %4218 = vmatmul.mubr.msk.f32.gmra.mrb[24].mxu0 %vm266_vm13, %v7054_v40 }
 0x187   :  { %5517 = vmatpush1.bf16.msra.mxu0 %v7521_v22  ;;  %4723 = vmatprep.mubr.msk.f32.mxu1 %vm7055_vm2, %v7047_v16 }
 0x188   :  { %749 = vmatprep.mubr.f32.mxu0 %v7047_v16  ;;  %5519 = vmatprep.subr.bf16.mxu0 %v7525_v23 }
 0x18a   :  { %4724 = vmatmul.mubr.msk.f32.vlgmr.msra.gmra.mrb[16].mxu1 %vm901_vm3, %v899_v1  ;;  %4219 = vmatmul.mubr.msk.f32.gmra.mrb[26].mxu0 %vm271_vm14, %v7054_v40 }
 0x18b   :  { %5521 = vmatpush1.bf16.msra.mxu0 %v7540_v29  ;;  %4727 = vmatpush3.msra.mxu1 %v898_v30 }
 0x18c   :  { %4728 = vmatprep.mubr.msk.f32.mxu1 %vm7055_vm2, %v7047_v16  ;;  %755 = vmatprep.mubr.f32.mxu0 %v7047_v16 }
 0x18d   :  { %5523 = vmatprep.subr.bf16.mxu0 %v7547_v36  ;;  %5530 = vmatprep.subr.bf16.mxu1 %v7056_v48 }
 0x18e   :  { %4729 = vmatmul.mubr.msk.f32.vlgmr.msra.gmra.mrb[18].mxu1 %vm901_vm3, %v897_v38  ;;  %4220 = vmatmul.mubr.msk.f32.gmra.mrb[28].mxu0 %vm276_vm15, %v7054_v40 }
 0x18f   :  { %5525 = vmatpush1.bf16.msra.mxu0 %v7558_v41  ;;  %5532 = vmatpush3.bf16.msra.mxu1 %v7560_v42 }
 0x190   :  { %761 = vmatprep.mubr.f32.mxu0 %v7047_v16  ;;  %5527 = vmatprep.subr.bf16.mxu0 %v7565_v44 }
 0x191   :  { %5533 = vmatprep.subr.bf16.mxu1 %v7056_v48  ;;  %4763 = vmatprep.mubr.msk.f32.mxu1 %vm7055_vm2, %v7047_v16 }
 0x192   :  { %4221 = vmatmul.mubr.msk.f32.gmra.mrb[30].mxu0 %vm281_vm1, %v7054_v40  ;;  %v1088_v40 = vld [vmem:[#allocation7 + $0xd0] sm:$0xff] }
 0x193   :  { %5529 = vmatpush1.bf16.msra.mxu0 %v7576_v49  ;;  %5535 = vmatpush3.bf16.msra.mxu1 %v7578_v51  ;;  %v7605_v60 = vpack.c.bf16 %v1091_v59, %v1088_v40 }
 0x194   :  { %1174 = vmatprep.mubr.f32.mxu0 %v7047_v16  ;;  %5536 = vmatprep.subr.bf16.mxu1 %v7056_v48 }
 0x195   :  { %5555 = vmatprep.subr.bf16.mxu0 %v7431_v50 }
 0x196   :  { %1175 = vmatmul.mubr.f32.vlgmr.msra.gmra.mrb[0].mxu0 %v7047_v16 }
 0x197   :  { %5538 = vmatpush3.bf16.msra.mxu1 %v7591_v55  ;;  %5557 = vmatpush1.bf16.msra.mxu0 %v7438_v54 }
 0x198   :  { %5539 = vmatprep.subr.bf16.mxu1 %v7056_v48  ;;  %5559 = vmatprep.subr.bf16.mxu0 %v7441_v56 }
 0x199   :  { %1346 = vmatprep.mubr.f32.mxu0 %v7047_v16 }
 0x19b   :  { %5541 = vmatpush3.bf16.msra.mxu1 %v7598_v31  ;;  %5561 = vmatpush1.bf16.msra.mxu0 %v7449_v61 }
 0x19c   :  { %5542 = vmatprep.subr.bf16.mxu1 %v7056_v48  ;;  %5563 = vmatprep.subr.bf16.mxu0 %v7461_v3 }
 0x19f   :  { %5544 = vmatpush3.bf16.msra.mxu1 %v7605_v60  ;;  %5565 = vmatpush1.bf16.msra.mxu0 %v7472_v8 }
 0x1a0   :  { %5545 = vmatprep.subr.bf16.mxu1 %v7056_v48  ;;  %5567 = vmatprep.subr.bf16.mxu0 %v7476_v9 }
 0x1a3   :  { %5547 = vmatpush3.bf16.msra.mxu1 %v7611_v0  ;;  %5569 = vmatpush1.bf16.msra.mxu0 %v7496_v14 }
 0x1a4   :  { %5548 = vmatprep.subr.bf16.mxu1 %v7056_v48  ;;  %5571 = vmatprep.subr.bf16.mxu0 %v7504_v17 }
 0x1a7   :  { %5550 = vmatpush3.bf16.msra.mxu1 %v7617_v6  ;;  %5573 = vmatpush1.bf16.msra.mxu0 %v7521_v22 }
 0x1a8   :  { %5551 = vmatprep.subr.bf16.mxu1 %v7056_v48  ;;  %5575 = vmatprep.subr.bf16.mxu0 %v7525_v23 }
 0x1ab   :  { %5553 = vmatpush3.bf16.msra.mxu1 %v7623_v11  ;;  %5577 = vmatpush1.bf16.msra.mxu0 %v7540_v29 }
 0x1ac   :  { %5586 = vmatprep.subr.bf16.mxu1 %v7056_v48  ;;  %5579 = vmatprep.subr.bf16.mxu0 %v7547_v36 }
 0x1ae   :  { %4764 = vmatmul.mubr.f32.vlgmr.msra.gmra.mrb[20].mxu1 %v7047_v16 }
 0x1af   :  { %5588 = vmatpush3.bf16.msra.mxu1 %v7560_v42  ;;  %5581 = vmatpush1.bf16.msra.mxu0 %v7558_v41 }
 0x1b0   :  { %5589 = vmatprep.subr.bf16.mxu1 %v7056_v48  ;;  %5583 = vmatprep.subr.bf16.mxu0 %v7565_v44 }
 0x1b1   :  { %4798 = vmatprep.mubr.msk.f32.mxu1 %vm7055_vm2, %v7047_v16 }
 0x1b3   :  { %5591 = vmatpush3.bf16.msra.mxu1 %v7578_v51  ;;  %5585 = vmatpush1.bf16.msra.mxu0 %v7576_v49 }
 0x1b4   :  { %5592 = vmatprep.subr.bf16.mxu1 %v7056_v48  ;;  %5611 = vmatprep.subr.bf16.mxu0 %v7431_v50 }
 0x1b7   :  { %5594 = vmatpush3.bf16.msra.mxu1 %v7591_v55 }
 0x1b8   :  { %5595 = vmatprep.subr.bf16.mxu1 %v7056_v48 }
 0x1bb   :  { %5597 = vmatpush3.bf16.msra.mxu1 %v7598_v31 }
 0x1bc   :  { %5598 = vmatprep.subr.bf16.mxu1 %v7056_v48 }
 0x1bf   :  { %5600 = vmatpush3.bf16.msra.mxu1 %v7605_v60 }
 0x1c0   :  { %5601 = vmatprep.subr.bf16.mxu1 %v7056_v48 }
 0x1c3   :  { %5603 = vmatpush3.bf16.msra.mxu1 %v7611_v0 }
 0x1c4   :  { %5604 = vmatprep.subr.bf16.mxu1 %v7056_v48 }
 0x1c7   :  { %5606 = vmatpush3.bf16.msra.mxu1 %v7617_v6 }
 0x1c8   :  { %5607 = vmatprep.subr.bf16.mxu1 %v7056_v48 }
 0x1cb   :  { %5609 = vmatpush3.bf16.msra.mxu1 %v7623_v11 }
 0x1cc   :  { %5642 = vmatprep.subr.bf16.mxu1 %v7056_v48 }
 0x22d   :  { %v4667_v18 = vpop.f32.mrb[0].mxu1 }
 0x22e   :  { %v7659_v19 = vadd.f32 %v4667_v18, %v344_v15  ;;  %v527_v20 = vpop.f32.mrb[1].mxu1 }
 0x231   :  { %v4670_v21 = vpop.f32.mrb[2].mxu1 }
 0x232   :  { %v7661_v24 = vadd.f32 %v4670_v21, %v344_v15  ;;  %v537_v25 = vpop.f32.mrb[3].mxu1 }
 0x233   :  { %v7663_v26 = vadd.f32 %v537_v25, %v344_v15  ;;  %v8460_v25 = vsub.s32 0, %v7656_v4 }
 0x235   :  { %v4673_v27 = vpop.f32.mrb[4].mxu1 }
 0x236   :  { %v7665_v1 = vadd.f32 %v4673_v27, %v344_v15  ;;  %v547_v30 = vpop.f32.mrb[5].mxu1  ;;  %v8459_v27 = vsub.s32 1, %v7656_v4 }
 0x237   :  { %v7667_v28 = vadd.f32 %v547_v30, %v344_v15  ;;  %v7704_v30 = vrot.slane %v331_v13, %v8460_v25 }
 0x23c   :  { %v4676_v32 = vpop.f32.mrb[6].mxu1 }
 0x23d   :  { %v7669_v33 = vadd.f32 %v4676_v32, %v344_v15  ;;  %v557_v34 = vpop.f32.mrb[7].mxu1 }
 0x23e   :  { %v7671_v35 = vadd.f32 %v557_v34, %v344_v15  ;;  %v7708_v34 = vrot.slane %v331_v13, %v8459_v27 }
 0x24d   :  { %v4711_v38 = vpop.f32.mrb[8].mxu1 }
 0x24e   :  { %v7676_v43 = vadd.f32 %v4711_v38, %v7673_v39  ;;  %v7678_v45 = vpop.f32.mrb[9].mxu1 }
 0x251   :  { %v4714_v46 = vpop.f32.mrb[10].mxu1 }
 0x252   :  { %v7681_v47 = vadd.f32 %v4714_v46, %v7673_v39  ;;  %v844_v52 = vpop.f32.mrb[11].mxu1 }
 0x253   :  { %v7684_v53 = vadd.f32 %v844_v52, %v7673_v39 }
 0x255   :  { %v4717_v57 = vpop.f32.mrb[12].mxu1 }
 0x256   :  { %v7687_v58 = vadd.f32 %v4717_v57, %v7673_v39  ;;  %v854_v40 = vpop.f32.mrb[13].mxu1 }
 0x257   :  { %v7690_v59 = vadd.f32 %v854_v40, %v7673_v39 }
 0x259   :  { %v4720_v62 = vpop.f32.mrb[14].mxu1 }
 0x25a   :  { %v7693_v63 = vadd.f32 %v4720_v62, %v7673_v39  ;;  %v864_v2 = vpop.f32.mrb[15].mxu1 }
 0x25b   :  { %v7696_v5 = vadd.f32 %v864_v2, %v7673_v39 }
 0x25d   :  { %v971_v7 = vpop.f32.mrb[16].mxu1 }
 0x25e   :  { %v4725_v10 = vpop.f32.mrb[17].mxu1 }
 0x261   :  { %v1044_v12 = vpop.f32.mrb[18].mxu1 }
 0x262   :  { %v7698_v18 = vadd.f32 %v1044_v12, %v971_v7  ;;  %v4730_v21 = vpop.f32.mrb[19].mxu1  ;;  %v7712_v7 = vld [vmem:[#allocation10] ss:$0 sm:$0xff] }
 0x269   :  { %v1176_v32 = vpop.f32.mrb[0].mxu0 }
 0x26a   :  { %v6450_v37 = vadd.f32 %v1176_v32, %v7704_v30  ;;  %v1178_v38 = vpop.f32.mrb[1].mxu0  ;;  %v528_v32 = vadd.f32 %v527_v20, %v344_v15 }
 0x26b   :  { %v6451_v52 = vadd.f32 %v1178_v38, %v7708_v34 }
 0x26c   :  { %v4233_v46 = vmul.f32 -1.442695, %v6450_v37 }
 0x26d   :  { %v4234_v57 = vmul.f32 -1.442695, %v6451_v52 }
 0x26e   :  { %6557 = vpow2.f32 %v4233_v46 }
 0x26f   :  { %6559 = vpow2.f32 %v4234_v57 }
 0x278   :  { %v6558_v40 = vpop.eup %6557 }
 0x279   :  { %v1255_v62 = vadd.f32 1.0, %v6558_v40  ;;  %v6560_v2 = vpop.eup %6559 }
 0x27a   :  { %v1262_v12 = vadd.f32 1.0, %v6560_v2 }
 0x27b   :  { %6561 = vrcp.f32 %v1255_v62 }
 0x27c   :  { %6563 = vrcp.f32 %v1262_v12 }
 0x281   :  { %v1247_v10 = vpop.f32.mrb[20].mxu1 }
 0x282   :  { %v1271_v13 = vadd.f32 %v7712_v7, %v1247_v10  ;;  %v4765_v21 = vpop.f32.mrb[21].mxu1 }
 0x285   :  { %v6562_v27 = vpop.eup %6561 }
 0x286   :  { %v1272_v37 = vmul.f32 %v6562_v27, %v1271_v13  ;;  %v6564_v38 = vpop.eup %6563 }
 0x287   :  { %v1275_v46 = vsub.f32 1.0, %v6564_v38  ;;  %v1277_v40 = vmul.f32 0.0, %v6564_v38 }
 0x288   :  { %v1273_v25 = vadd.f32 %v1272_v37, %v528_v32 }
 0x28a   :  { %6565 = vtanh.f32 %v1273_v25 }
 0x294   :  { %v6566_v52 = vpop.eup %6565 }
 0x295   :  { %v1276_v57 = vmul.f32 %v6566_v52, %v1275_v46 }
 0x297   :  { %v1278_v62 = vadd.f32 %v1277_v40, %v1276_v57 }
 0x299   :  { %1347 = vmatmul.mubr.f32.vlgmr.msra.gmra.mrb[2].mxu0 %v1278_v62  ;;  %4799 = vmatmul.mubr.f32.vlgmr.msra.gmra.mrb[22].mxu1 %v1278_v62 }
 0x29a   :  { %5613 = vmatpush1.bf16.msra.mxu0 %v7438_v54  ;;  %5644 = vmatpush3.bf16.msra.mxu1 %v7560_v42 }
 0x29b   :  { %5615 = vmatprep.subr.bf16.mxu0 %v7441_v56  ;;  %5645 = vmatprep.subr.bf16.mxu1 %v7056_v48 }
 0x29c   :  { %1512 = vmatprep.mubr.f32.mxu0 %v7047_v16  ;;  %4833 = vmatprep.mubr.msk.f32.mxu1 %vm7055_vm2, %v7047_v16 }
 0x29e   :  { %5617 = vmatpush1.bf16.msra.mxu0 %v7449_v61  ;;  %5647 = vmatpush3.bf16.msra.mxu1 %v7578_v51 }
 0x29f   :  { %5619 = vmatprep.subr.bf16.mxu0 %v7461_v3  ;;  %5648 = vmatprep.subr.bf16.mxu1 %v7056_v48 }
 0x2a2   :  { %5621 = vmatpush1.bf16.msra.mxu0 %v7472_v8  ;;  %5650 = vmatpush3.bf16.msra.mxu1 %v7591_v55 }
 0x2a3   :  { %5623 = vmatprep.subr.bf16.mxu0 %v7476_v9  ;;  %5651 = vmatprep.subr.bf16.mxu1 %v7056_v48 }
 0x2a6   :  { %5625 = vmatpush1.bf16.msra.mxu0 %v7496_v14  ;;  %5653 = vmatpush3.bf16.msra.mxu1 %v7598_v31 }
 0x2a7   :  { %5627 = vmatprep.subr.bf16.mxu0 %v7504_v17  ;;  %5654 = vmatprep.subr.bf16.mxu1 %v7056_v48 }
 0x2aa   :  { %5629 = vmatpush1.bf16.msra.mxu0 %v7521_v22  ;;  %5656 = vmatpush3.bf16.msra.mxu1 %v7605_v60 }
 0x2ab   :  { %5631 = vmatprep.subr.bf16.mxu0 %v7525_v23  ;;  %5657 = vmatprep.subr.bf16.mxu1 %v7056_v48 }
 0x2ae   :  { %5633 = vmatpush1.bf16.msra.mxu0 %v7540_v29  ;;  %5659 = vmatpush3.bf16.msra.mxu1 %v7611_v0 }
 0x2af   :  { %5635 = vmatprep.subr.bf16.mxu0 %v7547_v36  ;;  %5660 = vmatprep.subr.bf16.mxu1 %v7056_v48 }
 0x2b2   :  { %5637 = vmatpush1.bf16.msra.mxu0 %v7558_v41  ;;  %5662 = vmatpush3.bf16.msra.mxu1 %v7617_v6 }
 0x2b3   :  { %5639 = vmatprep.subr.bf16.mxu0 %v7565_v44  ;;  %5663 = vmatprep.subr.bf16.mxu1 %v7056_v48 }
 0x2b6   :  { %5641 = vmatpush1.bf16.msra.mxu0 %v7576_v49  ;;  %5665 = vmatpush3.bf16.msra.mxu1 %v7623_v11 }
 0x2b7   :  { %5667 = vmatprep.subr.bf16.mxu0 %v7431_v50  ;;  %5698 = vmatprep.subr.bf16.mxu1 %v7056_v48 }
 0x36c   :  { %v1348_v15 = vpop.f32.mrb[2].mxu0  ;;  %v1419_v20 = vpop.f32.mrb[22].mxu1 }
 0x36d   :  { %v6452_v25 = vadd.f32 %v1348_v15, %v7704_v30  ;;  %v1350_v27 = vpop.f32.mrb[3].mxu0  ;;  %v4800_v2 = vpop.f32.mrb[23].mxu1  ;;  %v1437_v46 = vadd.f32 %v7712_v7, %v1419_v20 }
 0x36e   :  { %v6453_v12 = vadd.f32 %v1350_v27, %v7708_v34 }
 0x36f   :  { %v4236_v10 = vmul.f32 -1.442695, %v6452_v25 }
 0x370   :  { %v4237_v13 = vmul.f32 -1.442695, %v6453_v12 }
 0x371   :  { %6567 = vpow2.f32 %v4236_v10 }
 0x372   :  { %6569 = vpow2.f32 %v4237_v13 }
 0x37b   :  { %v6568_v21 = vpop.eup %6567 }
 0x37c   :  { %v1427_v32 = vadd.f32 1.0, %v6568_v21  ;;  %v6570_v37 = vpop.eup %6569 }
 0x37d   :  { %v1434_v38 = vadd.f32 1.0, %v6570_v37 }
 0x37e   :  { %6571 = vrcp.f32 %v1427_v32 }
 0x37f   :  { %6573 = vrcp.f32 %v1434_v38 }
 0x388   :  { %v6572_v52 = vpop.eup %6571 }
 0x389   :  { %v1438_v57 = vmul.f32 %v6572_v52, %v1437_v46  ;;  %v6574_v15 = vpop.eup %6573 }
 0x38a   :  { %v1441_v25 = vsub.f32 1.0, %v6574_v15  ;;  %v1443_v10 = vmul.f32 %v6574_v15, %v1278_v62 }
 0x38b   :  { %v1439_v40 = vadd.f32 %v1438_v57, %v7659_v19 }
 0x38d   :  { %6575 = vtanh.f32 %v1439_v40 }
 0x397   :  { %v6576_v2 = vpop.eup %6575 }
 0x398   :  { %v1442_v27 = vmul.f32 %v6576_v2, %v1441_v25 }
 0x39a   :  { %v1444_v12 = vadd.f32 %v1443_v10, %v1442_v27 }
 0x39c   :  { %1513 = vmatmul.mubr.f32.vlgmr.msra.gmra.mrb[4].mxu0 %v1444_v12  ;;  %4834 = vmatmul.mubr.f32.vlgmr.msra.gmra.mrb[24].mxu1 %v1444_v12 }
 0x39d   :  { %5669 = vmatpush1.bf16.msra.mxu0 %v7438_v54  ;;  %5700 = vmatpush3.bf16.msra.mxu1 %v7560_v42 }
 0x39e   :  { %5671 = vmatprep.subr.bf16.mxu0 %v7441_v56  ;;  %5701 = vmatprep.subr.bf16.mxu1 %v7056_v48 }
 0x39f   :  { %1678 = vmatprep.mubr.f32.mxu0 %v7047_v16  ;;  %4868 = vmatprep.mubr.msk.f32.mxu1 %vm7055_vm2, %v7047_v16 }
 0x3a1   :  { %5673 = vmatpush1.bf16.msra.mxu0 %v7449_v61  ;;  %5703 = vmatpush3.bf16.msra.mxu1 %v7578_v51 }
 0x3a2   :  { %5675 = vmatprep.subr.bf16.mxu0 %v7461_v3  ;;  %5704 = vmatprep.subr.bf16.mxu1 %v7056_v48 }
 0x3a5   :  { %5677 = vmatpush1.bf16.msra.mxu0 %v7472_v8  ;;  %5706 = vmatpush3.bf16.msra.mxu1 %v7591_v55 }
 0x3a6   :  { %5679 = vmatprep.subr.bf16.mxu0 %v7476_v9  ;;  %5707 = vmatprep.subr.bf16.mxu1 %v7056_v48 }
 0x3a9   :  { %5681 = vmatpush1.bf16.msra.mxu0 %v7496_v14  ;;  %5709 = vmatpush3.bf16.msra.mxu1 %v7598_v31 }
 0x3aa   :  { %5683 = vmatprep.subr.bf16.mxu0 %v7504_v17  ;;  %5710 = vmatprep.subr.bf16.mxu1 %v7056_v48 }
 0x3ad   :  { %5685 = vmatpush1.bf16.msra.mxu0 %v7521_v22  ;;  %5712 = vmatpush3.bf16.msra.mxu1 %v7605_v60 }
 0x3ae   :  { %5687 = vmatprep.subr.bf16.mxu0 %v7525_v23  ;;  %5713 = vmatprep.subr.bf16.mxu1 %v7056_v48 }
 0x3b1   :  { %5689 = vmatpush1.bf16.msra.mxu0 %v7540_v29  ;;  %5715 = vmatpush3.bf16.msra.mxu1 %v7611_v0 }
 0x3b2   :  { %5691 = vmatprep.subr.bf16.mxu0 %v7547_v36  ;;  %5716 = vmatprep.subr.bf16.mxu1 %v7056_v48 }
 0x3b5   :  { %5693 = vmatpush1.bf16.msra.mxu0 %v7558_v41  ;;  %5718 = vmatpush3.bf16.msra.mxu1 %v7617_v6 }
 0x3b6   :  { %5695 = vmatprep.subr.bf16.mxu0 %v7565_v44  ;;  %5719 = vmatprep.subr.bf16.mxu1 %v7056_v48 }
 0x3b9   :  { %5697 = vmatpush1.bf16.msra.mxu0 %v7576_v49  ;;  %5721 = vmatpush3.bf16.msra.mxu1 %v7623_v11 }
 0x3ba   :  { %5723 = vmatprep.subr.bf16.mxu0 %v7431_v50  ;;  %5754 = vmatprep.subr.bf16.mxu1 %v7056_v48 }
 0x46f   :  { %v1514_v19 = vpop.f32.mrb[4].mxu0  ;;  %v1585_v62 = vpop.f32.mrb[24].mxu1 }
 0x470   :  { %v6454_v20 = vadd.f32 %v1514_v19, %v7704_v30  ;;  %v1516_v13 = vpop.f32.mrb[5].mxu0  ;;  %v4835_v21 = vpop.f32.mrb[25].mxu1  ;;  %v1603_v15 = vadd.f32 %v7712_v7, %v1585_v62 }
 0x471   :  { %v6455_v37 = vadd.f32 %v1516_v13, %v7708_v34 }
 0x472   :  { %v4238_v32 = vmul.f32 -1.442695, %v6454_v20 }
 0x473   :  { %v4239_v38 = vmul.f32 -1.442695, %v6455_v37 }
 0x474   :  { %6577 = vpow2.f32 %v4238_v32 }
 0x475   :  { %6579 = vpow2.f32 %v4239_v38 }
 0x47e   :  { %v6578_v46 = vpop.eup %6577 }
 0x47f   :  { %v1593_v52 = vadd.f32 1.0, %v6578_v46  ;;  %v6580_v57 = vpop.eup %6579 }
 0x480   :  { %v1600_v40 = vadd.f32 1.0, %v6580_v57 }
 0x481   :  { %6581 = vrcp.f32 %v1593_v52 }
 0x482   :  { %6583 = vrcp.f32 %v1600_v40 }
 0x48b   :  { %v6582_v25 = vpop.eup %6581 }
 0x48c   :  { %v1604_v2 = vmul.f32 %v6582_v25, %v1603_v15  ;;  %v6584_v10 = vpop.eup %6583 }
 0x48d   :  { %v1607_v19 = vsub.f32 1.0, %v6584_v10  ;;  %v1609_v21 = vmul.f32 %v6584_v10, %v1444_v12 }
 0x48e   :  { %v1605_v27 = vadd.f32 %v1604_v2, %v7663_v26 }
 0x490   :  { %6585 = vtanh.f32 %v1605_v27 }
 0x49a   :  { %v6586_v20 = vpop.eup %6585 }
 0x49b   :  { %v1608_v13 = vmul.f32 %v6586_v20, %v1607_v19 }
 0x49d   :  { %v1610_v32 = vadd.f32 %v1609_v21, %v1608_v13 }
 0x49f   :  { %1679 = vmatmul.mubr.f32.vlgmr.msra.gmra.mrb[6].mxu0 %v1610_v32  ;;  %4869 = vmatmul.mubr.f32.vlgmr.msra.gmra.mrb[26].mxu1 %v1610_v32 }
 0x4a0   :  { %5725 = vmatpush1.bf16.msra.mxu0 %v7438_v54  ;;  %5756 = vmatpush3.bf16.msra.mxu1 %v7560_v42 }
 0x4a1   :  { %5727 = vmatprep.subr.bf16.mxu0 %v7441_v56  ;;  %5757 = vmatprep.subr.bf16.mxu1 %v7056_v48 }
 0x4a2   :  { %1844 = vmatprep.mubr.f32.mxu0 %v7047_v16  ;;  %4903 = vmatprep.mubr.msk.f32.mxu1 %vm7055_vm2, %v7047_v16 }
 0x4a4   :  { %5729 = vmatpush1.bf16.msra.mxu0 %v7449_v61  ;;  %5759 = vmatpush3.bf16.msra.mxu1 %v7578_v51 }
 0x4a5   :  { %5731 = vmatprep.subr.bf16.mxu0 %v7461_v3  ;;  %5760 = vmatprep.subr.bf16.mxu1 %v7056_v48 }
 0x4a8   :  { %5733 = vmatpush1.bf16.msra.mxu0 %v7472_v8  ;;  %5762 = vmatpush3.bf16.msra.mxu1 %v7591_v55 }
 0x4a9   :  { %5735 = vmatprep.subr.bf16.mxu0 %v7476_v9  ;;  %5763 = vmatprep.subr.bf16.mxu1 %v7056_v48 }
 0x4ac   :  { %5737 = vmatpush1.bf16.msra.mxu0 %v7496_v14  ;;  %5765 = vmatpush3.bf16.msra.mxu1 %v7598_v31 }
 0x4ad   :  { %5739 = vmatprep.subr.bf16.mxu0 %v7504_v17  ;;  %5766 = vmatprep.subr.bf16.mxu1 %v7056_v48 }
 0x4b0   :  { %5741 = vmatpush1.bf16.msra.mxu0 %v7521_v22  ;;  %5768 = vmatpush3.bf16.msra.mxu1 %v7605_v60 }
 0x4b1   :  { %5743 = vmatprep.subr.bf16.mxu0 %v7525_v23  ;;  %5769 = vmatprep.subr.bf16.mxu1 %v7056_v48 }
 0x4b4   :  { %5745 = vmatpush1.bf16.msra.mxu0 %v7540_v29  ;;  %5771 = vmatpush3.bf16.msra.mxu1 %v7611_v0 }
 0x4b5   :  { %5747 = vmatprep.subr.bf16.mxu0 %v7547_v36  ;;  %5772 = vmatprep.subr.bf16.mxu1 %v7056_v48 }
 0x4b8   :  { %5749 = vmatpush1.bf16.msra.mxu0 %v7558_v41  ;;  %5774 = vmatpush3.bf16.msra.mxu1 %v7617_v6 }
 0x4b9   :  { %5751 = vmatprep.subr.bf16.mxu0 %v7565_v44  ;;  %5775 = vmatprep.subr.bf16.mxu1 %v7056_v48 }
 0x4bc   :  { %5753 = vmatpush1.bf16.msra.mxu0 %v7576_v49  ;;  %5777 = vmatpush3.bf16.msra.mxu1 %v7623_v11 }
 0x4bd   :  { %5779 = vmatprep.subr.bf16.mxu0 %v7431_v50  ;;  %5810 = vmatprep.subr.bf16.mxu1 %v7056_v48 }
 0x572   :  { %v1680_v26 = vpop.f32.mrb[6].mxu0  ;;  %v1751_v12 = vpop.f32.mrb[26].mxu1 }
 0x573   :  { %v6456_v62 = vadd.f32 %v1680_v26, %v7704_v30  ;;  %v1682_v37 = vpop.f32.mrb[7].mxu0  ;;  %v4870_v38 = vpop.f32.mrb[27].mxu1  ;;  %v1769_v27 = vadd.f32 %v7712_v7, %v1751_v12 }
 0x574   :  { %v6457_v52 = vadd.f32 %v1682_v37, %v7708_v34 }
 0x575   :  { %v4240_v46 = vmul.f32 -1.442695, %v6456_v62 }
 0x576   :  { %v4241_v57 = vmul.f32 -1.442695, %v6457_v52 }
 0x577   :  { %6587 = vpow2.f32 %v4240_v46 }
 0x578   :  { %6589 = vpow2.f32 %v4241_v57 }
 0x581   :  { %v6588_v40 = vpop.eup %6587 }
 0x582   :  { %v1759_v15 = vadd.f32 1.0, %v6588_v40  ;;  %v6590_v25 = vpop.eup %6589 }
 0x583   :  { %v1766_v2 = vadd.f32 1.0, %v6590_v25 }
 0x584   :  { %6591 = vrcp.f32 %v1759_v15 }
 0x585   :  { %6593 = vrcp.f32 %v1766_v2 }
 0x58e   :  { %v6592_v10 = vpop.eup %6591 }
 0x58f   :  { %v1770_v19 = vmul.f32 %v6592_v10, %v1769_v27  ;;  %v6594_v13 = vpop.eup %6593 }
 0x590   :  { %v1773_v21 = vsub.f32 1.0, %v6594_v13  ;;  %v1775_v37 = vmul.f32 %v6594_v13, %v1610_v32 }
 0x591   :  { %v1771_v20 = vadd.f32 %v1770_v19, %v7661_v24 }
 0x593   :  { %6595 = vtanh.f32 %v1771_v20 }
 0x59d   :  { %v6596_v26 = vpop.eup %6595 }
 0x59e   :  { %v1774_v62 = vmul.f32 %v6596_v26, %v1773_v21 }
 0x5a0   :  { %v1776_v38 = vadd.f32 %v1775_v37, %v1774_v62 }
 0x5a2   :  { %1845 = vmatmul.mubr.f32.vlgmr.msra.gmra.mrb[8].mxu0 %v1776_v38  ;;  %4904 = vmatmul.mubr.f32.vlgmr.msra.gmra.mrb[28].mxu1 %v1776_v38 }
 0x5a3   :  { %5781 = vmatpush1.bf16.msra.mxu0 %v7438_v54  ;;  %5812 = vmatpush3.bf16.msra.mxu1 %v7560_v42 }
 0x5a4   :  { %5783 = vmatprep.subr.bf16.mxu0 %v7441_v56  ;;  %5813 = vmatprep.subr.bf16.mxu1 %v7056_v48 }
 0x5a5   :  { %2010 = vmatprep.mubr.f32.mxu0 %v7047_v16  ;;  %4938 = vmatprep.mubr.msk.f32.mxu1 %vm7055_vm2, %v7047_v16 }
 0x5a7   :  { %5785 = vmatpush1.bf16.msra.mxu0 %v7449_v61  ;;  %5815 = vmatpush3.bf16.msra.mxu1 %v7578_v51 }
 0x5a8   :  { %5787 = vmatprep.subr.bf16.mxu0 %v7461_v3  ;;  %5816 = vmatprep.subr.bf16.mxu1 %v7056_v48 }
 0x5ab   :  { %5789 = vmatpush1.bf16.msra.mxu0 %v7472_v8  ;;  %5818 = vmatpush3.bf16.msra.mxu1 %v7591_v55 }
 0x5ac   :  { %5791 = vmatprep.subr.bf16.mxu0 %v7476_v9  ;;  %5819 = vmatprep.subr.bf16.mxu1 %v7056_v48 }
 0x5af   :  { %5793 = vmatpush1.bf16.msra.mxu0 %v7496_v14  ;;  %5821 = vmatpush3.bf16.msra.mxu1 %v7598_v31 }
 0x5b0   :  { %5795 = vmatprep.subr.bf16.mxu0 %v7504_v17  ;;  %5822 = vmatprep.subr.bf16.mxu1 %v7056_v48 }
 0x5b3   :  { %5797 = vmatpush1.bf16.msra.mxu0 %v7521_v22  ;;  %5824 = vmatpush3.bf16.msra.mxu1 %v7605_v60 }
 0x5b4   :  { %5799 = vmatprep.subr.bf16.mxu0 %v7525_v23  ;;  %5825 = vmatprep.subr.bf16.mxu1 %v7056_v48 }
 0x5b7   :  { %5801 = vmatpush1.bf16.msra.mxu0 %v7540_v29  ;;  %5827 = vmatpush3.bf16.msra.mxu1 %v7611_v0 }
 0x5b8   :  { %5803 = vmatprep.subr.bf16.mxu0 %v7547_v36  ;;  %5828 = vmatprep.subr.bf16.mxu1 %v7056_v48 }
 0x5bb   :  { %5805 = vmatpush1.bf16.msra.mxu0 %v7558_v41  ;;  %5830 = vmatpush3.bf16.msra.mxu1 %v7617_v6 }
 0x5bc   :  { %5807 = vmatprep.subr.bf16.mxu0 %v7565_v44  ;;  %5831 = vmatprep.subr.bf16.mxu1 %v7056_v48 }
 0x5bf   :  { %5809 = vmatpush1.bf16.msra.mxu0 %v7576_v49  ;;  %5833 = vmatpush3.bf16.msra.mxu1 %v7623_v11 }
 0x5c0   :  { %5835 = vmatprep.subr.bf16.mxu0 %v7431_v50  ;;  %5866 = vmatprep.subr.bf16.mxu1 %v7056_v48 }
 0x675   :  { %v1846_v24 = vpop.f32.mrb[8].mxu0  ;;  %v1917_v32 = vpop.f32.mrb[28].mxu1 }
 0x676   :  { %v6458_v12 = vadd.f32 %v1846_v24, %v7704_v30  ;;  %v1848_v46 = vpop.f32.mrb[9].mxu0  ;;  %v4905_v52 = vpop.f32.mrb[29].mxu1  ;;  %v1935_v19 = vadd.f32 %v7712_v7, %v1917_v32 }
 0x677   :  { %v6459_v40 = vadd.f32 %v1848_v46, %v7708_v34 }
 0x678   :  { %v4242_v57 = vmul.f32 -1.442695, %v6458_v12 }
 0x679   :  { %v4243_v15 = vmul.f32 -1.442695, %v6459_v40 }
 0x67a   :  { %6597 = vpow2.f32 %v4242_v57 }
 0x67b   :  { %6599 = vpow2.f32 %v4243_v15 }
 0x684   :  { %v6598_v25 = vpop.eup %6597 }
 0x685   :  { %v1925_v2 = vadd.f32 1.0, %v6598_v25  ;;  %v6600_v27 = vpop.eup %6599 }
 0x686   :  { %v1932_v10 = vadd.f32 1.0, %v6600_v27 }
 0x687   :  { %6601 = vrcp.f32 %v1925_v2 }
 0x688   :  { %6603 = vrcp.f32 %v1932_v10 }
 0x691   :  { %v6602_v20 = vpop.eup %6601 }
 0x692   :  { %v1936_v13 = vmul.f32 %v6602_v20, %v1935_v19  ;;  %v6604_v26 = vpop.eup %6603 }
 0x693   :  { %v1939_v62 = vsub.f32 1.0, %v6604_v26  ;;  %v1941_v12 = vmul.f32 %v6604_v26, %v1776_v38 }
 0x694   :  { %v1937_v21 = vadd.f32 %v1936_v13, %v7667_v28 }
 0x696   :  { %6605 = vtanh.f32 %v1937_v21 }
 0x6a0   :  { %v6606_v37 = vpop.eup %6605 }
 0x6a1   :  { %v1940_v24 = vmul.f32 %v6606_v37, %v1939_v62 }
 0x6a3   :  { %v1942_v46 = vadd.f32 %v1941_v12, %v1940_v24 }
 0x6a5   :  { %2011 = vmatmul.mubr.f32.vlgmr.msra.gmra.mrb[10].mxu0 %v1942_v46  ;;  %4939 = vmatmul.mubr.f32.vlgmr.msra.gmra.mrb[30].mxu1 %v1942_v46 }
 0x6a6   :  { %5837 = vmatpush1.bf16.msra.mxu0 %v7438_v54  ;;  %5868 = vmatpush3.bf16.msra.mxu1 %v7560_v42 }
 0x6a7   :  { %5839 = vmatprep.subr.bf16.mxu0 %v7441_v56  ;;  %5869 = vmatprep.subr.bf16.mxu1 %v7056_v48 }
 0x6a8   :  { %2176 = vmatprep.mubr.f32.mxu0 %v7047_v16  ;;  %4973 = vmatprep.mubr.msk.f32.mxu1 %vm7055_vm2, %v7047_v16 }
 0x6aa   :  { %5841 = vmatpush1.bf16.msra.mxu0 %v7449_v61  ;;  %5871 = vmatpush3.bf16.msra.mxu1 %v7578_v51 }
 0x6ab   :  { %5843 = vmatprep.subr.bf16.mxu0 %v7461_v3  ;;  %5872 = vmatprep.subr.bf16.mxu1 %v7056_v48 }
 0x6ae   :  { %5845 = vmatpush1.bf16.msra.mxu0 %v7472_v8  ;;  %5874 = vmatpush3.bf16.msra.mxu1 %v7591_v55 }
 0x6af   :  { %5847 = vmatprep.subr.bf16.mxu0 %v7476_v9  ;;  %5875 = vmatprep.subr.bf16.mxu1 %v7056_v48 }
 0x6b2   :  { %5849 = vmatpush1.bf16.msra.mxu0 %v7496_v14  ;;  %5877 = vmatpush3.bf16.msra.mxu1 %v7598_v31 }
 0x6b3   :  { %5851 = vmatprep.subr.bf16.mxu0 %v7504_v17  ;;  %5878 = vmatprep.subr.bf16.mxu1 %v7056_v48 }
 0x6b6   :  { %5853 = vmatpush1.bf16.msra.mxu0 %v7521_v22  ;;  %5880 = vmatpush3.bf16.msra.mxu1 %v7605_v60 }
 0x6b7   :  { %5855 = vmatprep.subr.bf16.mxu0 %v7525_v23  ;;  %5881 = vmatprep.subr.bf16.mxu1 %v7056_v48 }
 0x6ba   :  { %5857 = vmatpush1.bf16.msra.mxu0 %v7540_v29  ;;  %5883 = vmatpush3.bf16.msra.mxu1 %v7611_v0 }
 0x6bb   :  { %5859 = vmatprep.subr.bf16.mxu0 %v7547_v36  ;;  %5884 = vmatprep.subr.bf16.mxu1 %v7056_v48 }
 0x6be   :  { %5861 = vmatpush1.bf16.msra.mxu0 %v7558_v41  ;;  %5886 = vmatpush3.bf16.msra.mxu1 %v7617_v6 }
 0x6bf   :  { %5863 = vmatprep.subr.bf16.mxu0 %v7565_v44  ;;  %5887 = vmatprep.subr.bf16.mxu1 %v7056_v48 }
 0x6c2   :  { %5865 = vmatpush1.bf16.msra.mxu0 %v7576_v49  ;;  %5889 = vmatpush3.bf16.msra.mxu1 %v7623_v11 }
 0x6c3   :  { %5891 = vmatprep.subr.bf16.mxu0 %v7431_v50  ;;  %5922 = vmatprep.subr.bf16.mxu1 %v7056_v48 }
 0x778   :  { %v2012_v28 = vpop.f32.mrb[10].mxu0  ;;  %v2083_v38 = vpop.f32.mrb[30].mxu1 }
 0x779   :  { %v6460_v32 = vadd.f32 %v2012_v28, %v7704_v30  ;;  %v2014_v52 = vpop.f32.mrb[11].mxu0  ;;  %v4940_v57 = vpop.f32.mrb[31].mxu1  ;;  %v2101_v50 = vadd.f32 %v7712_v7, %v2083_v38  ;;  %v2444_v38 = vld [vmem:[#allocation18 + $0x18] sm:$0xff] }
 0x77a   :  { %v6461_v15 = vadd.f32 %v2014_v52, %v7708_v34  ;;  %v2445_v52 = vld [vmem:[#allocation18 + $0x20] sm:$0xff]  ;;  %v2446_v57 = vld [vmem:[#allocation18 + $0x28] sm:$0xff] }
 0x77b   :  { %v4244_v40 = vmul.f32 -1.442695, %v6460_v32 }
 0x77c   :  { %v4245_v25 = vmul.f32 -1.442695, %v6461_v15  ;;  %v2447_v15 = vld [vmem:[#allocation18 + $0x30] sm:$0xff] }
 0x77d   :  { %6607 = vpow2.f32 %v4244_v40  ;;  %v5953_v40 = vpack.c.bf16 %v2446_v57, %v2445_v52 }
 0x77e   :  { %6609 = vpow2.f32 %v4245_v25  ;;  %v2448_v25 = vld [vmem:[#allocation18 + $0x38] sm:$0xff] }
 0x787   :  { %v6608_v2 = vpop.eup %6607 }
 0x788   :  { %v2091_v27 = vadd.f32 1.0, %v6608_v2  ;;  %v6610_v10 = vpop.eup %6609  ;;  %v5956_v2 = vpack.c.bf16 %v2448_v25, %v2447_v15 }
 0x789   :  { %v2098_v19 = vadd.f32 1.0, %v6610_v10  ;;  %v2450_v10 = vld [vmem:[#allocation18 + $0x48] sm:$0xff] }
 0x78a   :  { %6611 = vrcp.f32 %v2091_v27  ;;  %v2449_v27 = vld [vmem:[#allocation18 + $0x40] sm:$0xff] }
 0x78b   :  { %6613 = vrcp.f32 %v2098_v19  ;;  %v5959_v19 = vpack.c.bf16 %v2450_v10, %v2449_v27  ;;  %v2531_v10 = vld [vmem:[#allocation13] sm:$0xff] }
 0x794   :  { %v6612_v20 = vpop.eup %6611 }
 0x795   :  { %v2102_v13 = vmul.f32 %v6612_v20, %v2101_v50  ;;  %v6614_v26 = vpop.eup %6613  ;;  %v2451_v50 = vld [vmem:[#allocation18 + $0x50] sm:$0xff]  ;;  %v2452_v20 = vld [vmem:[#allocation18 + $0x58] sm:$0xff] }
 0x796   :  { %v2105_v62 = vsub.f32 1.0, %v6614_v26  ;;  %v2107_v12 = vmul.f32 %v6614_v26, %v1942_v46  ;;  %v2443_v46 = vld [vmem:[#allocation18 + $0x10] sm:$0xff]  ;;  %v2454_v26 = vld [vmem:[#allocation18 + $0x68] sm:$0xff] }
 0x797   :  { %v2103_v21 = vadd.f32 %v2102_v13, %v7665_v1  ;;  %v2442_v1 = vld [vmem:[#allocation18 + $0x8] sm:$0xff]  ;;  %v5950_v32 = vpack.c.bf16 %v2444_v38, %v2443_v46  ;;  %v5962_v13 = vpack.c.bf16 %v2452_v20, %v2451_v50  ;;  %v2538_v50 = vld [vmem:[#allocation13 + $0x38] sm:$0xff] }
 0x798   :  { %v2541_v20 = vld [vmem:[#allocation13 + $0x50] sm:$0xff] }
 0x799   :  { %6615 = vtanh.f32 %v2103_v21  ;;  %v2453_v21 = vld [vmem:[#allocation18 + $0x60] sm:$0xff] }
 0x7a3   :  { %v6616_v37 = vpop.eup %6615 }
 0x7a4   :  { %v2106_v24 = vmul.f32 %v6616_v37, %v2105_v62  ;;  %v5965_v62 = vpack.c.bf16 %v2454_v26, %v2453_v21  ;;  %v2455_v37 = vld [vmem:[#allocation18 + $0x70] sm:$0xff] }
 0x7a6   :  { %v2108_v28 = vadd.f32 %v2107_v12, %v2106_v24  ;;  %v2456_v24 = vld [vmem:[#allocation18 + $0x78] sm:$0xff] }
 0x7a7   :  { %v5968_v12 = vpack.c.bf16 %v2456_v24, %v2455_v37  ;;  %v2537_v37 = vld [vmem:[#allocation13 + $0x30] sm:$0xff]  ;;  %v2540_v24 = vld [vmem:[#allocation13 + $0x48] sm:$0xff] }
 0x7a8   :  { %2177 = vmatmul.mubr.f32.vlgmr.msra.gmra.mrb[12].mxu0 %v2108_v28  ;;  %4974 = vmatmul.mubr.f32.vlgmr.msra.gmra.mrb[32].mxu1 %v2108_v28 }
 0x7a9   :  { %5893 = vmatpush1.bf16.msra.mxu0 %v7438_v54  ;;  %5924 = vmatpush3.bf16.msra.mxu1 %v7560_v42 }
 0x7aa   :  { %5895 = vmatprep.subr.bf16.mxu0 %v7441_v56  ;;  %5925 = vmatprep.subr.bf16.mxu1 %v7056_v48 }
 0x7ab   :  { %2342 = vmatprep.mubr.f32.mxu0 %v7047_v16  ;;  %5008 = vmatprep.mubr.msk.f32.mxu1 %vm7055_vm2, %v7047_v16 }
 0x7ad   :  { %5897 = vmatpush1.bf16.msra.mxu0 %v7449_v61  ;;  %5927 = vmatpush3.bf16.msra.mxu1 %v7578_v51 }
 0x7ae   :  { %5899 = vmatprep.subr.bf16.mxu0 %v7461_v3  ;;  %5928 = vmatprep.subr.bf16.mxu1 %v7056_v48 }
 0x7b1   :  { %5901 = vmatpush1.bf16.msra.mxu0 %v7472_v8  ;;  %5930 = vmatpush3.bf16.msra.mxu1 %v7591_v55 }
 0x7b2   :  { %5903 = vmatprep.subr.bf16.mxu0 %v7476_v9  ;;  %5931 = vmatprep.subr.bf16.mxu1 %v7056_v48 }
 0x7b5   :  { %5905 = vmatpush1.bf16.msra.mxu0 %v7496_v14  ;;  %5933 = vmatpush3.bf16.msra.mxu1 %v7598_v31 }
 0x7b6   :  { %5907 = vmatprep.subr.bf16.mxu0 %v7504_v17  ;;  %5934 = vmatprep.subr.bf16.mxu1 %v7056_v48 }
 0x7b9   :  { %5909 = vmatpush1.bf16.msra.mxu0 %v7521_v22  ;;  %5936 = vmatpush3.bf16.msra.mxu1 %v7605_v60 }
 0x7ba   :  { %5911 = vmatprep.subr.bf16.mxu0 %v7525_v23  ;;  %5937 = vmatprep.subr.bf16.mxu1 %v7056_v48 }
 0x7bd   :  { %5913 = vmatpush1.bf16.msra.mxu0 %v7540_v29  ;;  %5939 = vmatpush3.bf16.msra.mxu1 %v7611_v0 }
 0x7be   :  { %5915 = vmatprep.subr.bf16.mxu0 %v7547_v36  ;;  %5940 = vmatprep.subr.bf16.mxu1 %v7056_v48 }
 0x7c1   :  { %5917 = vmatpush1.bf16.msra.mxu0 %v7558_v41  ;;  %5942 = vmatpush3.bf16.msra.mxu1 %v7617_v6 }
 0x7c2   :  { %5919 = vmatprep.subr.bf16.mxu0 %v7565_v44  ;;  %5943 = vmatprep.subr.bf16.mxu1 %v7056_v48 }
 0x7c5   :  { %5921 = vmatpush1.bf16.msra.mxu0 %v7576_v49  ;;  %5945 = vmatpush3.bf16.msra.mxu1 %v7623_v11  ;;  %v2441_v11 = vld [vmem:[#allocation18] sm:$0xff] }
 0x7c6   :  { %5946 = vmatprep.subr.bf16.mxu0 %v7056_v48  ;;  %6002 = vmatprep.subr.bf16.mxu1 %v7056_v48 }
 0x87b   :  { %v2178_v54 = vpop.f32.mrb[12].mxu0  ;;  %v2249_v56 = vpop.f32.mrb[32].mxu1 }
 0x87c   :  { %v6462_v61 = vadd.f32 %v2178_v54, %v7704_v30  ;;  %v2180_v3 = vpop.f32.mrb[13].mxu0  ;;  %v4975_v8 = vpop.f32.mrb[33].mxu1  ;;  %v2267_v41 = vadd.f32 %v7712_v7, %v2249_v56  ;;  %v2535_v54 = vld [vmem:[#allocation13 + $0x20] sm:$0xff] }
 0x87d   :  { %v6463_v14 = vadd.f32 %v2180_v3, %v7708_v34  ;;  %v2536_v3 = vld [vmem:[#allocation13 + $0x28] sm:$0xff] }
 0x87e   :  { %v4246_v9 = vmul.f32 -1.442695, %v6462_v61  ;;  %v2533_v61 = vld [vmem:[#allocation13 + $0x10] sm:$0xff] }
 0x87f   :  { %v4247_v17 = vmul.f32 -1.442695, %v6463_v14  ;;  %v7966_v8 = vpack.c.bf16 %v2536_v3, %v2533_v61  ;;  %v2542_v14 = vld [vmem:[#allocation13 + $0x58] sm:$0xff] }
 0x880   :  { %6617 = vpow2.f32 %v4246_v9  ;;  %v2539_v9 = vld [vmem:[#allocation13 + $0x40] sm:$0xff]  ;;  %v2546_v61 = vld [vmem:[#allocation13 + $0x78] sm:$0xff] }
 0x881   :  { %6619 = vpow2.f32 %v4247_v17  ;;  %v7971_v17 = vpack.c.bf16 %v2542_v14, %v2539_v9  ;;  %v2550_v3 = vld [vmem:[#allocation13 + $0x98] sm:$0xff]  ;;  %v2553_v9 = vld [vmem:[#allocation13 + $0xb0] sm:$0xff] }
 0x88a   :  { %v6618_v22 = vpop.eup %6617 }
 0x88b   :  { %v2257_v23 = vadd.f32 1.0, %v6618_v22  ;;  %v6620_v29 = vpop.eup %6619  ;;  %v2545_v22 = vld [vmem:[#allocation13 + $0x70] sm:$0xff] }
 0x88c   :  { %v2264_v36 = vadd.f32 1.0, %v6620_v29 }
 0x88d   :  { %6621 = vrcp.f32 %v2257_v23  ;;  %v2548_v23 = vld [vmem:[#allocation13 + $0x88] sm:$0xff] }
 0x88e   :  { %6623 = vrcp.f32 %v2264_v36  ;;  %v7975_v29 = vpack.c.bf16 %v2548_v23, %v2545_v22  ;;  %v2551_v36 = vld [vmem:[#allocation13 + $0xa0] sm:$0xff]  ;;  %v8007_v22 = vpack.c.bf16 %v2553_v9, %v2550_v3  ;;  %v2549_v23 = vld [vmem:[#allocation13 + $0x90] sm:$0xff] }
 0x897   :  { %v6622_v42 = vpop.eup %6621 }
 0x898   :  { %v2268_v44 = vmul.f32 %v6622_v42, %v2267_v41  ;;  %v6624_v51 = vpop.eup %6623  ;;  %v2554_v41 = vld [vmem:[#allocation13 + $0xb8] sm:$0xff] }
 0x899   :  { %v2271_v55 = vsub.f32 1.0, %v6624_v51  ;;  %v2273_v0 = vmul.f32 %v6624_v51, %v2108_v28  ;;  %v2532_v28 = vld [vmem:[#allocation13 + $0x8] sm:$0xff]  ;;  %v7979_v42 = vpack.c.bf16 %v2554_v41, %v2551_v36 }
 0x89a   :  { %v2269_v49 = vadd.f32 %v2268_v44, %v7671_v35  ;;  %v5947_v35 = vpack.c.bf16 %v2442_v1, %v2441_v11  ;;  %v7964_v56 = vpack.c.bf16 %v2535_v54, %v2532_v28  ;;  %v2557_v44 = vld [vmem:[#allocation13 + $0xd0] sm:$0xff]  ;;  %v7997_v28 = vpack.c.bf16 %v2540_v24, %v2537_v37  ;;  %v2552_v36 = vld [vmem:[#allocation13 + $0xa8] sm:$0xff]  ;;  %v2575_v24 = vld [vmem:[#allocation13 + $0x160] sm:$0xff] }
 0x89b   :  { %v2556_v41 = vld [vmem:[#allocation13 + $0xc8] sm:$0xff] }
 0x89c   :  { %6625 = vtanh.f32 %v2269_v49  ;;  %v2560_v49 = vld [vmem:[#allocation13 + $0xe8] sm:$0xff] }
 0x89d   :  { %v7983_v51 = vpack.c.bf16 %v2560_v49, %v2557_v44  ;;  %v2559_v44 = vld [vmem:[#allocation13 + $0xe0] sm:$0xff]  ;;  %v8010_v49 = vpack.c.bf16 %v2552_v36, %v2549_v23  ;;  %v2576_v37 = vld [vmem:[#allocation13 + $0x168] sm:$0xff] }
 0x8a6   :  { %v6626_v31 = vpop.eup %6625 }
 0x8a7   :  { %v2272_v60 = vmul.f32 %v6626_v31, %v2271_v55 }
 0x8a9   :  { %v7949_v6 = vadd.f32 %v2273_v0, %v2272_v60 }
 0x8ab   :  { %2343 = vmatmul.mubr.f32.vlgmr.msra.gmra.mrb[14].mxu0 %v7949_v6  ;;  %5009 = vmatmul.mubr.f32.vlgmr.msra.gmra.mrb[34].mxu1 %v7949_v6 }
 0x8ac   :  { %5043 = vmatprep.mubr.msk.f32.mxu0 %vm7055_vm2, %v7047_v16  ;;  %5078 = vmatprep.mubr.msk.f32.mxu1 %vm7055_vm2, %v7047_v16 }
 0x8ad   :  { %5948 = vmatpush3.bf16.msra.mxu0 %v5947_v35  ;;  %6004 = vmatpush3.bf16.msra.mxu1 %v7966_v8 }
 0x8ae   :  { %5949 = vmatprep.subr.bf16.mxu0 %v7056_v48  ;;  %6005 = vmatprep.subr.bf16.mxu1 %v7056_v48 }
 0x8b1   :  { %5951 = vmatpush3.bf16.msra.mxu0 %v5950_v32  ;;  %6007 = vmatpush3.bf16.msra.mxu1 %v7971_v17 }
 0x8b2   :  { %5952 = vmatprep.subr.bf16.mxu0 %v7056_v48  ;;  %6008 = vmatprep.subr.bf16.mxu1 %v7056_v48 }
 0x8b5   :  { %5954 = vmatpush3.bf16.msra.mxu0 %v5953_v40  ;;  %6010 = vmatpush3.bf16.msra.mxu1 %v7975_v29 }
 0x8b6   :  { %5955 = vmatprep.subr.bf16.mxu0 %v7056_v48  ;;  %6011 = vmatprep.subr.bf16.mxu1 %v7056_v48 }
 0x8b9   :  { %5957 = vmatpush3.bf16.msra.mxu0 %v5956_v2  ;;  %6013 = vmatpush3.bf16.msra.mxu1 %v7979_v42 }
 0x8ba   :  { %5958 = vmatprep.subr.bf16.mxu0 %v7056_v48  ;;  %6014 = vmatprep.subr.bf16.mxu1 %v7056_v48 }
 0x8bd   :  { %5960 = vmatpush3.bf16.msra.mxu0 %v5959_v19  ;;  %6016 = vmatpush3.bf16.msra.mxu1 %v7983_v51 }
 0x8be   :  { %5961 = vmatprep.subr.bf16.mxu0 %v7056_v48  ;;  %6017 = vmatprep.subr.bf16.mxu1 %v7056_v48 }
 0x8c1   :  { %5963 = vmatpush3.bf16.msra.mxu0 %v5962_v13 }
 0x8c2   :  { %5964 = vmatprep.subr.bf16.mxu0 %v7056_v48 }
 0x8c5   :  { %5966 = vmatpush3.bf16.msra.mxu0 %v5965_v62 }
 0x8c6   :  { %5967 = vmatprep.subr.bf16.mxu0 %v7056_v48 }
 0x8c9   :  { %5969 = vmatpush3.bf16.msra.mxu0 %v5968_v12  ;;  %v2544_v12 = vld [vmem:[#allocation13 + $0x68] sm:$0xff] }
 0x8ca   :  { %5971 = vmatprep.subr.bf16.mxu0 %v7964_v56 }
 0x97e   :  { %v2344_v55 = vpop.f32.mrb[14].mxu0  ;;  %v2415_v31 = vpop.f32.mrb[34].mxu1 }
 0x97f   :  { %v6464_v60 = vadd.f32 %v2344_v55, %v7704_v30  ;;  %v2346_v0 = vpop.f32.mrb[15].mxu0  ;;  %v5010_v11 = vpop.f32.mrb[35].mxu1  ;;  %v2433_v40 = vadd.f32 %v7712_v7, %v2415_v31  ;;  %v7994_v7 = vpack.c.bf16 %v2541_v20, %v2538_v50  ;;  %v8013_v55 = vpack.c.bf16 %v2559_v44, %v2556_v41  ;;  %v2555_v31 = vld [vmem:[#allocation13 + $0xc0] sm:$0xff]  ;;  %v2574_v20 = vld [vmem:[#allocation13 + $0x158] sm:$0xff] }
 0x980   :  { %v6465_v35 = vadd.f32 %v2346_v0, %v7708_v34  ;;  %v2534_v34 = vld [vmem:[#allocation13 + $0x18] sm:$0xff] }
 0x981   :  { %v4248_v1 = vmul.f32 -1.442695, %v6464_v60  ;;  %v7992_v26 = vpack.c.bf16 %v2534_v34, %v2531_v10  ;;  %v2558_v60 = vld [vmem:[#allocation13 + $0xd8] sm:$0xff]  ;;  %v2569_v10 = vld [vmem:[#allocation13 + $0x130] sm:$0xff]  ;;  %v2572_v34 = vld [vmem:[#allocation13 + $0x148] sm:$0xff] }
 0x982   :  { %v4249_v46 = vmul.f32 -1.442695, %v6465_v35  ;;  %v8016_v0 = vpack.c.bf16 %v2558_v60, %v2555_v31  ;;  %v2562_v11 = vld [vmem:[#allocation13 + $0xf8] sm:$0xff]  ;;  %v8033_v50 = vpack.c.bf16 %v2572_v34, %v2569_v10  ;;  %v8467_v31 = vsub.s32 0, %v7656_v4 }
 0x983   :  { %6627 = vpow2.f32 %v4248_v1  ;;  %v2565_v1 = vld [vmem:[#allocation13 + $0x110] sm:$0xff] }
 0x984   :  { %6629 = vpow2.f32 %v4249_v46  ;;  %v8020_v35 = vpack.c.bf16 %v2565_v1, %v2562_v11  ;;  %v2561_v46 = vld [vmem:[#allocation13 + $0xf0] sm:$0xff] }
 0x98d   :  { %v6628_v38 = vpop.eup %6627 }
 0x98e   :  { %v2423_v32 = vadd.f32 1.0, %v6628_v38  ;;  %v6630_v52 = vpop.eup %6629  ;;  %v2564_v38 = vld [vmem:[#allocation13 + $0x108] sm:$0xff] }
 0x98f   :  { %v2430_v57 = vadd.f32 1.0, %v6630_v52  ;;  %v8022_v52 = vpack.c.bf16 %v2564_v38, %v2561_v46  ;;  %v8468_v46 = vsub.s32 1, %v7656_v4 }
 0x990   :  { %6631 = vrcp.f32 %v2423_v32  ;;  %v2563_v32 = vld [vmem:[#allocation13 + $0x100] sm:$0xff] }
 0x991   :  { %6633 = vrcp.f32 %v2430_v57  ;;  %v2566_v57 = vld [vmem:[#allocation13 + $0x118] sm:$0xff] }
 0x99a   :  { %v6632_v15 = vpop.eup %6631 }
 0x99b   :  { %v2434_v25 = vmul.f32 %v6632_v15, %v2433_v40  ;;  %v6634_v2 = vpop.eup %6633  ;;  %v8025_v40 = vpack.c.bf16 %v2566_v57, %v2563_v32  ;;  %v2568_v15 = vld [vmem:[#allocation13 + $0x128] sm:$0xff] }
 0x99c   :  { %v2437_v27 = vsub.f32 1.0, %v6634_v2  ;;  %v2439_v21 = vmul.f32 %v6634_v2, %v7949_v6  ;;  %v2543_v6 = vld [vmem:[#allocation13 + $0x60] sm:$0xff] }
 0x99d   :  { %v2435_v30 = vadd.f32 %v2434_v25, %v7669_v33  ;;  %v2547_v33 = vld [vmem:[#allocation13 + $0x80] sm:$0xff]  ;;  %v8004_v14 = vpack.c.bf16 %v2546_v61, %v2543_v6  ;;  %6019 = vmatpush3.bf16.msra.mxu1 %v8025_v40 }
 0x99e   :  { %v8001_v54 = vpack.c.bf16 %v2547_v33, %v2544_v12  ;;  %v2571_v25 = vld [vmem:[#allocation13 + $0x140] sm:$0xff]  ;;  %6020 = vmatprep.subr.bf16.mxu1 %v7056_v48  ;;  %v2578_v12 = vld [vmem:[#allocation13 + $0x178] sm:$0xff] }
 0x99f   :  { %6635 = vtanh.f32 %v2435_v30  ;;  %v2567_v30 = vld [vmem:[#allocation13 + $0x120] sm:$0xff]  ;;  %v8028_v2 = vpack.c.bf16 %v2571_v25, %v2568_v15  ;;  %v8044_v6 = vpack.c.bf16 %v2578_v12, %v2575_v24  ;;  %v835_v24 = vadd.f32 %v7678_v45, %v7673_v39 }
 0x9a0   :  { %v4232_v61 = vld [vmem:[%s8455_s15] ss:$0 sm:$0xff]  ;;  %s7057_s15 = smov [#allocation22]  }
 0x9a1   :  { %6022 = vmatpush3.bf16.msra.mxu1 %v8033_v50  ;;  %v1055_v3 = vadd.f32 %v4232_v61, %v7698_v18  ;;  %v6751_v18 = vld [vmem:[#allocation15] sm:$0x7]  ;;  %s4181_s16 = sshll.u32 %s7057_s15, 4  ;;  %s4182_s16 = int_to_ptr.vmem [resolvable:$true] %s4181_s16 }
 0x9a2   :  { %6023 = vmatprep.subr.bf16.mxu1 %v7056_v48  ;;  %v8097_v60 = vrot.slane %v6751_v18, %v8467_v31  ;;  %v8101_v38 = vrot.slane %v6751_v18, %v8468_v46  ;;  %s6994_s7 = scalar_lea.vmem %s4182_s16, 256  ;;  %p6999_p5 = scmp.lt.s32.totalorder %s4182_s16, %s4182_s16 }
 0x9a3   :  { %v1056_v9 = vsel %vm202_vm0, %v1055_v3, 0.0  ;;  %p6995_p4 = scmp.ne.s32.totalorder %s4182_s16, %s6994_s7  ;;  %p7000_p6 = scmp.lt.s32.totalorder %s6994_s7, %s6994_s7 }
 0x9a5   :  { %6025 = vmatpush3.bf16.msra.mxu1 %v8044_v6  ;;  %p7001_p7 = por %p7000_p6, %p6999_p5 }
 0x9a6   :  { %6058 = vmatprep.subr.bf16.mxu1 %v7056_v48 }
 0x9a7   :  { %p7002_p8 = pnand %p7001_p7, %p6995_p4 }
 0x9a9   :  { %v6636_v19 = vpop.eup %6635 }
 0x9aa   :  { %v2438_v13 = vmul.f32 %v6636_v19, %v2437_v27  ;;  %v2570_v27 = vld [vmem:[#allocation13 + $0x138] sm:$0xff] }
 0x9ab   :  { %v8031_v19 = vpack.c.bf16 %v2570_v27, %v2567_v30 }
 0x9ac   :  { %v2440_v62 = vadd.f32 %v2439_v21, %v2438_v13  ;;  %v2577_v13 = vld [vmem:[#allocation13 + $0x170] sm:$0xff] }
 0x9ad   :  { %v2573_v21 = vld [vmem:[#allocation13 + $0x150] sm:$0xff] }
 0x9ae   :  { %5044 = vmatmul.mubr.f32.vlgmr.msra.gmra.mrb[32].mxu0 %v2440_v62  ;;  %v8037_v62 = vpack.c.bf16 %v2577_v13, %v2574_v20  ;;  %v8040_v33 = vpack.c.bf16 %v2576_v37, %v2573_v21  ;;  %v8105_v13 = vld [vmem:[#allocation16] ss:$0 sm:$0xff] }
 0x9af   :  { %5973 = vmatpush1.bf16.msra.mxu0 %v7992_v26  ;;  %2643 = vmatprep.mubr.f32.mxu0 %v7047_v16 }
 0x9b0   :  { %5975 = vmatprep.subr.bf16.mxu0 %v7994_v7 }
 0x9b3   :  { %5977 = vmatpush1.bf16.msra.mxu0 %v7997_v28 }
 0x9b4   :  { %5979 = vmatprep.subr.bf16.mxu0 %v8001_v54 }
 0x9b7   :  { %5981 = vmatpush1.bf16.msra.mxu0 %v8004_v14 }
 0x9b8   :  { %5983 = vmatprep.subr.bf16.mxu0 %v8007_v22 }
 0x9bb   :  { %5985 = vmatpush1.bf16.msra.mxu0 %v8010_v49 }
 0x9bc   :  { %5987 = vmatprep.subr.bf16.mxu0 %v8013_v55 }
 0x9bf   :  { %5989 = vmatpush1.bf16.msra.mxu0 %v8016_v0 }
 0x9c0   :  { %5991 = vmatprep.subr.bf16.mxu0 %v8020_v35 }
 0x9c3   :  { %5993 = vmatpush1.bf16.msra.mxu0 %v8022_v52 }
 0x9c4   :  { %5995 = vmatprep.subr.bf16.mxu0 %v8028_v2 }
 0x9c7   :  { %5997 = vmatpush1.bf16.msra.mxu0 %v8031_v19 }
 0x9c8   :  { %5999 = vmatprep.subr.bf16.mxu0 %v8037_v62 }
 0x9cb   :  { %6001 = vmatpush1.bf16.msra.mxu0 %v8040_v33 }
 0x9cc   :  { %6027 = vmatprep.subr.bf16.mxu0 %v7964_v56 }
 0xa81   :  { %v2523_v23 = vpop.f32.mrb[32].mxu0 }
 0xa82   :  { %v2524_v36 = vadd.f32 %v2523_v23, %v1056_v9  ;;  %v5045_v41 = vpop.f32.mrb[33].mxu0 }
 0xa84   :  { %6637 = vtanh.f32 %v2524_v36 }
 0xa8e   :  { %v8056_v44 = vpop.eup %6637 }
 0xa8f   :  { %2644 = vmatmul.mubr.f32.vlgmr.msra.gmra.mrb[16].mxu0 %v8056_v44  ;;  %5079 = vmatmul.mubr.f32.vlgmr.msra.gmra.mrb[36].mxu1 %v8056_v44 }
 0xa90   :  { %6029 = vmatpush1.bf16.msra.mxu0 %v7992_v26  ;;  %6060 = vmatpush3.bf16.msra.mxu1 %v7966_v8 }
 0xa91   :  { %6031 = vmatprep.subr.bf16.mxu0 %v7994_v7  ;;  %6061 = vmatprep.subr.bf16.mxu1 %v7056_v48 }
 0xa92   :  { %2815 = vmatprep.mubr.f32.mxu0 %v7047_v16  ;;  %5113 = vmatprep.mubr.msk.f32.mxu1 %vm7055_vm2, %v7047_v16 }
 0xa94   :  { %6033 = vmatpush1.bf16.msra.mxu0 %v7997_v28  ;;  %6063 = vmatpush3.bf16.msra.mxu1 %v7971_v17 }
 0xa95   :  { %6035 = vmatprep.subr.bf16.mxu0 %v8001_v54  ;;  %6064 = vmatprep.subr.bf16.mxu1 %v7056_v48 }
 0xa98   :  { %6037 = vmatpush1.bf16.msra.mxu0 %v8004_v14  ;;  %6066 = vmatpush3.bf16.msra.mxu1 %v7975_v29 }
 0xa99   :  { %6039 = vmatprep.subr.bf16.mxu0 %v8007_v22  ;;  %6067 = vmatprep.subr.bf16.mxu1 %v7056_v48 }
 0xa9c   :  { %6041 = vmatpush1.bf16.msra.mxu0 %v8010_v49  ;;  %6069 = vmatpush3.bf16.msra.mxu1 %v7979_v42 }
 0xa9d   :  { %6043 = vmatprep.subr.bf16.mxu0 %v8013_v55  ;;  %6070 = vmatprep.subr.bf16.mxu1 %v7056_v48 }
 0xaa0   :  { %6045 = vmatpush1.bf16.msra.mxu0 %v8016_v0  ;;  %6072 = vmatpush3.bf16.msra.mxu1 %v7983_v51 }
 0xaa1   :  { %6047 = vmatprep.subr.bf16.mxu0 %v8020_v35  ;;  %6073 = vmatprep.subr.bf16.mxu1 %v7056_v48 }
 0xaa4   :  { %6049 = vmatpush1.bf16.msra.mxu0 %v8022_v52  ;;  %6075 = vmatpush3.bf16.msra.mxu1 %v8025_v40 }
 0xaa5   :  { %6051 = vmatprep.subr.bf16.mxu0 %v8028_v2  ;;  %6076 = vmatprep.subr.bf16.mxu1 %v7056_v48 }
 0xaa8   :  { %6053 = vmatpush1.bf16.msra.mxu0 %v8031_v19  ;;  %6078 = vmatpush3.bf16.msra.mxu1 %v8033_v50 }
 0xaa9   :  { %6055 = vmatprep.subr.bf16.mxu0 %v8037_v62  ;;  %6079 = vmatprep.subr.bf16.mxu1 %v7056_v48 }
 0xaac   :  { %6057 = vmatpush1.bf16.msra.mxu0 %v8040_v33  ;;  %6081 = vmatpush3.bf16.msra.mxu1 %v8044_v6 }
 0xaad   :  { %6083 = vmatprep.subr.bf16.mxu0 %v7964_v56  ;;  %6114 = vmatprep.subr.bf16.mxu1 %v7056_v48 }
 0xb62   :  { %v2645_v11 = vpop.f32.mrb[16].mxu0  ;;  %v2716_v1 = vpop.f32.mrb[36].mxu1 }
 0xb63   :  { %v6466_v32 = vadd.f32 %v2645_v11, %v8097_v60  ;;  %v2647_v57 = vpop.f32.mrb[17].mxu0  ;;  %v5080_v15 = vpop.f32.mrb[37].mxu1  ;;  %v2740_v4 = vadd.f32 %v8105_v13, %v2716_v1 }
 0xb64   :  { %v6467_v30 = vadd.f32 %v2647_v57, %v8101_v38 }
 0xb65   :  { %v4250_v25 = vmul.f32 -1.442695, %v6466_v32 }
 0xb66   :  { %v4251_v27 = vmul.f32 -1.442695, %v6467_v30 }
 0xb67   :  { %6639 = vpow2.f32 %v4250_v25 }
 0xb68   :  { %6641 = vpow2.f32 %v4251_v27 }
 0xb71   :  { %v6640_v10 = vpop.eup %6639 }
 0xb72   :  { %v2724_v34 = vadd.f32 1.0, %v6640_v10  ;;  %v6642_v20 = vpop.eup %6641 }
 0xb73   :  { %v2731_v21 = vadd.f32 1.0, %v6642_v20 }
 0xb74   :  { %6643 = vrcp.f32 %v2724_v34 }
 0xb75   :  { %6645 = vrcp.f32 %v2731_v21 }
 0xb7e   :  { %v6644_v37 = vpop.eup %6643 }
 0xb7f   :  { %v2741_v12 = vmul.f32 %v6644_v37, %v2740_v4  ;;  %v6646_v3 = vpop.eup %6645 }
 0xb80   :  { %v2744_v9 = vsub.f32 1.0, %v6646_v3  ;;  %v2746_v41 = vmul.f32 %v6646_v3, %v8056_v44 }
 0xb81   :  { %v2742_v61 = vadd.f32 %v2741_v12, %v835_v24 }
 0xb83   :  { %6647 = vtanh.f32 %v2742_v61 }
 0xb8d   :  { %v6648_v23 = vpop.eup %6647 }
 0xb8e   :  { %v2745_v36 = vmul.f32 %v6648_v23, %v2744_v9 }
 0xb90   :  { %v8111_v18 = vadd.f32 %v2746_v41, %v2745_v36 }
 0xb92   :  { %2816 = vmatmul.mubr.f32.vlgmr.msra.gmra.mrb[18].mxu0 %v8111_v18  ;;  %5114 = vmatmul.mubr.f32.vlgmr.msra.gmra.mrb[38].mxu1 %v8111_v18 }
 0xb93   :  { %6085 = vmatpush1.bf16.msra.mxu0 %v7992_v26  ;;  %6116 = vmatpush3.bf16.msra.mxu1 %v7966_v8 }
 0xb94   :  { %6087 = vmatprep.subr.bf16.mxu0 %v7994_v7  ;;  %6117 = vmatprep.subr.bf16.mxu1 %v7056_v48 }
 0xb95   :  { %2981 = vmatprep.mubr.f32.mxu0 %v7047_v16  ;;  %5148 = vmatprep.mubr.msk.f32.mxu1 %vm7055_vm2, %v7047_v16 }
 0xb97   :  { %6089 = vmatpush1.bf16.msra.mxu0 %v7997_v28  ;;  %6119 = vmatpush3.bf16.msra.mxu1 %v7971_v17 }
 0xb98   :  { %6091 = vmatprep.subr.bf16.mxu0 %v8001_v54  ;;  %6120 = vmatprep.subr.bf16.mxu1 %v7056_v48 }
 0xb9b   :  { %6093 = vmatpush1.bf16.msra.mxu0 %v8004_v14  ;;  %6122 = vmatpush3.bf16.msra.mxu1 %v7975_v29 }
 0xb9c   :  { %6095 = vmatprep.subr.bf16.mxu0 %v8007_v22  ;;  %6123 = vmatprep.subr.bf16.mxu1 %v7056_v48 }
 0xb9f   :  { %6097 = vmatpush1.bf16.msra.mxu0 %v8010_v49  ;;  %6125 = vmatpush3.bf16.msra.mxu1 %v7979_v42 }
 0xba0   :  { %6099 = vmatprep.subr.bf16.mxu0 %v8013_v55  ;;  %6126 = vmatprep.subr.bf16.mxu1 %v7056_v48 }
 0xba3   :  { %6101 = vmatpush1.bf16.msra.mxu0 %v8016_v0  ;;  %6128 = vmatpush3.bf16.msra.mxu1 %v7983_v51 }
 0xba4   :  { %6103 = vmatprep.subr.bf16.mxu0 %v8020_v35  ;;  %6129 = vmatprep.subr.bf16.mxu1 %v7056_v48 }
 0xba7   :  { %6105 = vmatpush1.bf16.msra.mxu0 %v8022_v52  ;;  %6131 = vmatpush3.bf16.msra.mxu1 %v8025_v40 }
 0xba8   :  { %6107 = vmatprep.subr.bf16.mxu0 %v8028_v2  ;;  %6132 = vmatprep.subr.bf16.mxu1 %v7056_v48 }
 0xbab   :  { %6109 = vmatpush1.bf16.msra.mxu0 %v8031_v19  ;;  %6134 = vmatpush3.bf16.msra.mxu1 %v8033_v50 }
 0xbac   :  { %6111 = vmatprep.subr.bf16.mxu0 %v8037_v62  ;;  %6135 = vmatprep.subr.bf16.mxu1 %v7056_v48 }
 0xbaf   :  { %6113 = vmatpush1.bf16.msra.mxu0 %v8040_v33  ;;  %6137 = vmatpush3.bf16.msra.mxu1 %v8044_v6 }
 0xbb0   :  { %6139 = vmatprep.subr.bf16.mxu0 %v7964_v56  ;;  %6170 = vmatprep.subr.bf16.mxu1 %v7056_v48 }
 0xc65   :  { %v2817_v39 = vpop.f32.mrb[18].mxu0  ;;  %v2888_v45 = vpop.f32.mrb[38].mxu1 }
 0xc66   :  { %v6468_v44 = vadd.f32 %v2817_v39, %v8097_v60  ;;  %v2819_v31 = vpop.f32.mrb[19].mxu0  ;;  %v5115_v11 = vpop.f32.mrb[39].mxu1  ;;  %v2906_v27 = vadd.f32 %v8105_v13, %v2888_v45 }
 0xc67   :  { %v6469_v46 = vadd.f32 %v2819_v31, %v8101_v38 }
 0xc68   :  { %v4253_v1 = vmul.f32 -1.442695, %v6468_v44 }
 0xc69   :  { %v4254_v32 = vmul.f32 -1.442695, %v6469_v46 }
 0xc6a   :  { %6649 = vpow2.f32 %v4253_v1 }
 0xc6b   :  { %6651 = vpow2.f32 %v4254_v32 }
 0xc74   :  { %v6650_v57 = vpop.eup %6649 }
 0xc75   :  { %v2896_v15 = vadd.f32 1.0, %v6650_v57  ;;  %v6652_v25 = vpop.eup %6651 }
 0xc76   :  { %v2903_v30 = vadd.f32 1.0, %v6652_v25 }
 0xc77   :  { %6653 = vrcp.f32 %v2896_v15 }
 0xc78   :  { %6655 = vrcp.f32 %v2903_v30 }
 0xc81   :  { %v6654_v10 = vpop.eup %6653 }
 0xc82   :  { %v2907_v34 = vmul.f32 %v6654_v10, %v2906_v27  ;;  %v6656_v21 = vpop.eup %6655 }
 0xc83   :  { %v2910_v4 = vsub.f32 1.0, %v6656_v21  ;;  %v2912_v12 = vmul.f32 %v6656_v21, %v8111_v18 }
 0xc84   :  { %v2908_v20 = vadd.f32 %v2907_v34, %v7676_v43 }
 0xc86   :  { %6657 = vtanh.f32 %v2908_v20 }
 0xc90   :  { %v6658_v37 = vpop.eup %6657 }
 0xc91   :  { %v2911_v24 = vmul.f32 %v6658_v37, %v2910_v4 }
 0xc93   :  { %v8155_v61 = vadd.f32 %v2912_v12, %v2911_v24 }
 0xc95   :  { %2982 = vmatmul.mubr.f32.vlgmr.msra.gmra.mrb[20].mxu0 %v8155_v61  ;;  %5149 = vmatmul.mubr.f32.vlgmr.msra.gmra.mrb[40].mxu1 %v8155_v61 }
 0xc96   :  { %6141 = vmatpush1.bf16.msra.mxu0 %v7992_v26  ;;  %6172 = vmatpush3.bf16.msra.mxu1 %v7966_v8 }
 0xc97   :  { %6143 = vmatprep.subr.bf16.mxu0 %v7994_v7  ;;  %6173 = vmatprep.subr.bf16.mxu1 %v7056_v48 }
 0xc98   :  { %3147 = vmatprep.mubr.f32.mxu0 %v7047_v16  ;;  %5183 = vmatprep.mubr.msk.f32.mxu1 %vm7055_vm2, %v7047_v16 }
 0xc9a   :  { %6145 = vmatpush1.bf16.msra.mxu0 %v7997_v28  ;;  %6175 = vmatpush3.bf16.msra.mxu1 %v7971_v17 }
 0xc9b   :  { %6147 = vmatprep.subr.bf16.mxu0 %v8001_v54  ;;  %6176 = vmatprep.subr.bf16.mxu1 %v7056_v48 }
 0xc9e   :  { %6149 = vmatpush1.bf16.msra.mxu0 %v8004_v14  ;;  %6178 = vmatpush3.bf16.msra.mxu1 %v7975_v29 }
 0xc9f   :  { %6151 = vmatprep.subr.bf16.mxu0 %v8007_v22  ;;  %6179 = vmatprep.subr.bf16.mxu1 %v7056_v48 }
 0xca2   :  { %6153 = vmatpush1.bf16.msra.mxu0 %v8010_v49  ;;  %6181 = vmatpush3.bf16.msra.mxu1 %v7979_v42 }
 0xca3   :  { %6155 = vmatprep.subr.bf16.mxu0 %v8013_v55  ;;  %6182 = vmatprep.subr.bf16.mxu1 %v7056_v48 }
 0xca6   :  { %6157 = vmatpush1.bf16.msra.mxu0 %v8016_v0  ;;  %6184 = vmatpush3.bf16.msra.mxu1 %v7983_v51 }
 0xca7   :  { %6159 = vmatprep.subr.bf16.mxu0 %v8020_v35  ;;  %6185 = vmatprep.subr.bf16.mxu1 %v7056_v48 }
 0xcaa   :  { %6161 = vmatpush1.bf16.msra.mxu0 %v8022_v52  ;;  %6187 = vmatpush3.bf16.msra.mxu1 %v8025_v40 }
 0xcab   :  { %6163 = vmatprep.subr.bf16.mxu0 %v8028_v2  ;;  %6188 = vmatprep.subr.bf16.mxu1 %v7056_v48 }
 0xcae   :  { %6165 = vmatpush1.bf16.msra.mxu0 %v8031_v19  ;;  %6190 = vmatpush3.bf16.msra.mxu1 %v8033_v50 }
 0xcaf   :  { %6167 = vmatprep.subr.bf16.mxu0 %v8037_v62  ;;  %6191 = vmatprep.subr.bf16.mxu1 %v7056_v48 }
 0xcb2   :  { %6169 = vmatpush1.bf16.msra.mxu0 %v8040_v33  ;;  %6193 = vmatpush3.bf16.msra.mxu1 %v8044_v6 }
 0xcb3   :  { %6195 = vmatprep.subr.bf16.mxu0 %v7964_v56  ;;  %6226 = vmatprep.subr.bf16.mxu1 %v7056_v48 }
 0xd68   :  { %v2983_v43 = vpop.f32.mrb[20].mxu0  ;;  %v3054_v3 = vpop.f32.mrb[40].mxu1 }
 0xd69   :  { %v6470_v9 = vadd.f32 %v2983_v43, %v8097_v60  ;;  %v2985_v23 = vpop.f32.mrb[21].mxu0  ;;  %v5150_v36 = vpop.f32.mrb[41].mxu1  ;;  %v3072_v46 = vadd.f32 %v8105_v13, %v3054_v3 }
 0xd6a   :  { %v6471_v39 = vadd.f32 %v2985_v23, %v8101_v38 }
 0xd6b   :  { %v4255_v41 = vmul.f32 -1.442695, %v6470_v9 }
 0xd6c   :  { %v4256_v45 = vmul.f32 -1.442695, %v6471_v39 }
 0xd6d   :  { %6659 = vpow2.f32 %v4255_v41 }
 0xd6e   :  { %6661 = vpow2.f32 %v4256_v45 }
 0xd77   :  { %v6660_v44 = vpop.eup %6659 }
 0xd78   :  { %v3062_v31 = vadd.f32 1.0, %v6660_v44  ;;  %v6662_v11 = vpop.eup %6661 }
 0xd79   :  { %v3069_v1 = vadd.f32 1.0, %v6662_v11 }
 0xd7a   :  { %6663 = vrcp.f32 %v3062_v31 }
 0xd7b   :  { %6665 = vrcp.f32 %v3069_v1 }
 0xd84   :  { %v6664_v32 = vpop.eup %6663 }
 0xd85   :  { %v3073_v57 = vmul.f32 %v6664_v32, %v3072_v46  ;;  %v6666_v25 = vpop.eup %6665 }
 0xd86   :  { %v3076_v30 = vsub.f32 1.0, %v6666_v25  ;;  %v3078_v34 = vmul.f32 %v6666_v25, %v8155_v61 }
 0xd87   :  { %v3074_v15 = vadd.f32 %v3073_v57, %v7684_v53 }
 0xd89   :  { %6667 = vtanh.f32 %v3074_v15 }
 0xd93   :  { %v6668_v27 = vpop.eup %6667 }
 0xd94   :  { %v3077_v10 = vmul.f32 %v6668_v27, %v3076_v30 }
 0xd96   :  { %v8199_v20 = vadd.f32 %v3078_v34, %v3077_v10 }
 0xd98   :  { %3148 = vmatmul.mubr.f32.vlgmr.msra.gmra.mrb[22].mxu0 %v8199_v20  ;;  %5184 = vmatmul.mubr.f32.vlgmr.msra.gmra.mrb[42].mxu1 %v8199_v20 }
 0xd99   :  { %6197 = vmatpush1.bf16.msra.mxu0 %v7992_v26  ;;  %6228 = vmatpush3.bf16.msra.mxu1 %v7966_v8 }
 0xd9a   :  { %6199 = vmatprep.subr.bf16.mxu0 %v7994_v7  ;;  %6229 = vmatprep.subr.bf16.mxu1 %v7056_v48 }
 0xd9b   :  { %3313 = vmatprep.mubr.f32.mxu0 %v7047_v16  ;;  %5218 = vmatprep.mubr.msk.f32.mxu1 %vm7055_vm2, %v7047_v16 }
 0xd9d   :  { %6201 = vmatpush1.bf16.msra.mxu0 %v7997_v28  ;;  %6231 = vmatpush3.bf16.msra.mxu1 %v7971_v17 }
 0xd9e   :  { %6203 = vmatprep.subr.bf16.mxu0 %v8001_v54  ;;  %6232 = vmatprep.subr.bf16.mxu1 %v7056_v48 }
 0xda1   :  { %6205 = vmatpush1.bf16.msra.mxu0 %v8004_v14  ;;  %6234 = vmatpush3.bf16.msra.mxu1 %v7975_v29 }
 0xda2   :  { %6207 = vmatprep.subr.bf16.mxu0 %v8007_v22  ;;  %6235 = vmatprep.subr.bf16.mxu1 %v7056_v48 }
 0xda5   :  { %6209 = vmatpush1.bf16.msra.mxu0 %v8010_v49  ;;  %6237 = vmatpush3.bf16.msra.mxu1 %v7979_v42 }
 0xda6   :  { %6211 = vmatprep.subr.bf16.mxu0 %v8013_v55  ;;  %6238 = vmatprep.subr.bf16.mxu1 %v7056_v48 }
 0xda9   :  { %6213 = vmatpush1.bf16.msra.mxu0 %v8016_v0  ;;  %6240 = vmatpush3.bf16.msra.mxu1 %v7983_v51 }
 0xdaa   :  { %6215 = vmatprep.subr.bf16.mxu0 %v8020_v35  ;;  %6241 = vmatprep.subr.bf16.mxu1 %v7056_v48 }
 0xdad   :  { %6217 = vmatpush1.bf16.msra.mxu0 %v8022_v52  ;;  %6243 = vmatpush3.bf16.msra.mxu1 %v8025_v40 }
 0xdae   :  { %6219 = vmatprep.subr.bf16.mxu0 %v8028_v2  ;;  %6244 = vmatprep.subr.bf16.mxu1 %v7056_v48 }
 0xdb1   :  { %6221 = vmatpush1.bf16.msra.mxu0 %v8031_v19  ;;  %6246 = vmatpush3.bf16.msra.mxu1 %v8033_v50 }
 0xdb2   :  { %6223 = vmatprep.subr.bf16.mxu0 %v8037_v62  ;;  %6247 = vmatprep.subr.bf16.mxu1 %v7056_v48 }
 0xdb5   :  { %6225 = vmatpush1.bf16.msra.mxu0 %v8040_v33  ;;  %6249 = vmatpush3.bf16.msra.mxu1 %v8044_v6 }
 0xdb6   :  { %6251 = vmatprep.subr.bf16.mxu0 %v7964_v56  ;;  %6282 = vmatprep.subr.bf16.mxu1 %v7056_v48 }
 0xe6b   :  { %v3149_v53 = vpop.f32.mrb[22].mxu0  ;;  %v3220_v21 = vpop.f32.mrb[42].mxu1 }
 0xe6c   :  { %v6472_v4 = vadd.f32 %v3149_v53, %v8097_v60  ;;  %v3151_v37 = vpop.f32.mrb[23].mxu0  ;;  %v5185_v24 = vpop.f32.mrb[43].mxu1  ;;  %v3238_v39 = vadd.f32 %v8105_v13, %v3220_v21 }
 0xe6d   :  { %v6473_v43 = vadd.f32 %v3151_v37, %v8101_v38 }
 0xe6e   :  { %v4257_v12 = vmul.f32 -1.442695, %v6472_v4 }
 0xe6f   :  { %v4258_v3 = vmul.f32 -1.442695, %v6473_v43 }
 0xe70   :  { %6669 = vpow2.f32 %v4257_v12 }
 0xe71   :  { %6671 = vpow2.f32 %v4258_v3 }
 0xe7a   :  { %v6670_v9 = vpop.eup %6669 }
 0xe7b   :  { %v3228_v23 = vadd.f32 1.0, %v6670_v9  ;;  %v6672_v36 = vpop.eup %6671 }
 0xe7c   :  { %v3235_v41 = vadd.f32 1.0, %v6672_v36 }
 0xe7d   :  { %6673 = vrcp.f32 %v3228_v23 }
 0xe7e   :  { %6675 = vrcp.f32 %v3235_v41 }
 0xe87   :  { %v6674_v45 = vpop.eup %6673 }
 0xe88   :  { %v3239_v44 = vmul.f32 %v6674_v45, %v3238_v39  ;;  %v6676_v11 = vpop.eup %6675 }
 0xe89   :  { %v3242_v1 = vsub.f32 1.0, %v6676_v11  ;;  %v3244_v57 = vmul.f32 %v6676_v11, %v8199_v20 }
 0xe8a   :  { %v3240_v31 = vadd.f32 %v3239_v44, %v7681_v47 }
 0xe8c   :  { %6677 = vtanh.f32 %v3240_v31 }
 0xe96   :  { %v6678_v46 = vpop.eup %6677 }
 0xe97   :  { %v3243_v32 = vmul.f32 %v6678_v46, %v3242_v1 }
 0xe99   :  { %v8243_v15 = vadd.f32 %v3244_v57, %v3243_v32 }
 0xe9b   :  { %3314 = vmatmul.mubr.f32.vlgmr.msra.gmra.mrb[24].mxu0 %v8243_v15  ;;  %5219 = vmatmul.mubr.f32.vlgmr.msra.gmra.mrb[44].mxu1 %v8243_v15 }
 0xe9c   :  { %6253 = vmatpush1.bf16.msra.mxu0 %v7992_v26  ;;  %6284 = vmatpush3.bf16.msra.mxu1 %v7966_v8 }
 0xe9d   :  { %6255 = vmatprep.subr.bf16.mxu0 %v7994_v7  ;;  %6285 = vmatprep.subr.bf16.mxu1 %v7056_v48 }
 0xe9e   :  { %3479 = vmatprep.mubr.f32.mxu0 %v7047_v16  ;;  %5253 = vmatprep.mubr.msk.f32.mxu1 %vm7055_vm2, %v7047_v16 }
 0xea0   :  { %6257 = vmatpush1.bf16.msra.mxu0 %v7997_v28  ;;  %6287 = vmatpush3.bf16.msra.mxu1 %v7971_v17 }
 0xea1   :  { %6259 = vmatprep.subr.bf16.mxu0 %v8001_v54  ;;  %6288 = vmatprep.subr.bf16.mxu1 %v7056_v48 }
 0xea4   :  { %6261 = vmatpush1.bf16.msra.mxu0 %v8004_v14  ;;  %6290 = vmatpush3.bf16.msra.mxu1 %v7975_v29 }
 0xea5   :  { %6263 = vmatprep.subr.bf16.mxu0 %v8007_v22  ;;  %6291 = vmatprep.subr.bf16.mxu1 %v7056_v48 }
 0xea8   :  { %6265 = vmatpush1.bf16.msra.mxu0 %v8010_v49  ;;  %6293 = vmatpush3.bf16.msra.mxu1 %v7979_v42 }
 0xea9   :  { %6267 = vmatprep.subr.bf16.mxu0 %v8013_v55  ;;  %6294 = vmatprep.subr.bf16.mxu1 %v7056_v48 }
 0xeac   :  { %6269 = vmatpush1.bf16.msra.mxu0 %v8016_v0  ;;  %6296 = vmatpush3.bf16.msra.mxu1 %v7983_v51 }
 0xead   :  { %6271 = vmatprep.subr.bf16.mxu0 %v8020_v35  ;;  %6297 = vmatprep.subr.bf16.mxu1 %v7056_v48 }
 0xeb0   :  { %6273 = vmatpush1.bf16.msra.mxu0 %v8022_v52  ;;  %6299 = vmatpush3.bf16.msra.mxu1 %v8025_v40 }
 0xeb1   :  { %6275 = vmatprep.subr.bf16.mxu0 %v8028_v2  ;;  %6300 = vmatprep.subr.bf16.mxu1 %v7056_v48 }
 0xeb4   :  { %6277 = vmatpush1.bf16.msra.mxu0 %v8031_v19  ;;  %6302 = vmatpush3.bf16.msra.mxu1 %v8033_v50 }
 0xeb5   :  { %6279 = vmatprep.subr.bf16.mxu0 %v8037_v62  ;;  %6303 = vmatprep.subr.bf16.mxu1 %v7056_v48 }
 0xeb8   :  { %6281 = vmatpush1.bf16.msra.mxu0 %v8040_v33  ;;  %6305 = vmatpush3.bf16.msra.mxu1 %v8044_v6 }
 0xeb9   :  { %6307 = vmatprep.subr.bf16.mxu0 %v7964_v56  ;;  %6338 = vmatprep.subr.bf16.mxu1 %v7056_v48 }
 0xf6e   :  { %v3315_v47 = vpop.f32.mrb[24].mxu0  ;;  %v3386_v25 = vpop.f32.mrb[44].mxu1 }
 0xf6f   :  { %v6474_v30 = vadd.f32 %v3315_v47, %v8097_v60  ;;  %v3317_v27 = vpop.f32.mrb[25].mxu0  ;;  %v5220_v10 = vpop.f32.mrb[45].mxu1  ;;  %v3404_v43 = vadd.f32 %v8105_v13, %v3386_v25 }
 0xf70   :  { %v6475_v53 = vadd.f32 %v3317_v27, %v8101_v38 }
 0xf71   :  { %v4259_v34 = vmul.f32 -1.442695, %v6474_v30 }
 0xf72   :  { %v4260_v21 = vmul.f32 -1.442695, %v6475_v53 }
 0xf73   :  { %6679 = vpow2.f32 %v4259_v34 }
 0xf74   :  { %6681 = vpow2.f32 %v4260_v21 }
 0xf7d   :  { %v6680_v4 = vpop.eup %6679 }
 0xf7e   :  { %v3394_v37 = vadd.f32 1.0, %v6680_v4  ;;  %v6682_v24 = vpop.eup %6681 }
 0xf7f   :  { %v3401_v12 = vadd.f32 1.0, %v6682_v24 }
 0xf80   :  { %6683 = vrcp.f32 %v3394_v37 }
 0xf81   :  { %6685 = vrcp.f32 %v3401_v12 }
 0xf8a   :  { %v6684_v3 = vpop.eup %6683 }
 0xf8b   :  { %v3405_v9 = vmul.f32 %v6684_v3, %v3404_v43  ;;  %v6686_v36 = vpop.eup %6685 }
 0xf8c   :  { %v3408_v41 = vsub.f32 1.0, %v6686_v36  ;;  %v3410_v44 = vmul.f32 %v6686_v36, %v8243_v15 }
 0xf8d   :  { %v3406_v23 = vadd.f32 %v3405_v9, %v7690_v59 }
 0xf8f   :  { %6687 = vtanh.f32 %v3406_v23 }
 0xf99   :  { %v6688_v39 = vpop.eup %6687 }
 0xf9a   :  { %v3409_v45 = vmul.f32 %v6688_v39, %v3408_v41  ;;  %v3914_v41 = vld [vmem:[#allocation19 + $0x20] sm:$0xff]  ;;  %v3915_v39 = vld [vmem:[#allocation19 + $0x28] sm:$0xff] }
 0xf9c   :  { %v8287_v31 = vadd.f32 %v3410_v44, %v3409_v45  ;;  %v3916_v45 = vld [vmem:[#allocation19 + $0x30] sm:$0xff]  ;;  %v3917_v44 = vld [vmem:[#allocation19 + $0x38] sm:$0xff] }
 0xf9e   :  { %3480 = vmatmul.mubr.f32.vlgmr.msra.gmra.mrb[26].mxu0 %v8287_v31  ;;  %5254 = vmatmul.mubr.f32.vlgmr.msra.gmra.mrb[46].mxu1 %v8287_v31 }
 0xf9f   :  { %6309 = vmatpush1.bf16.msra.mxu0 %v7992_v26  ;;  %6340 = vmatpush3.bf16.msra.mxu1 %v7966_v8 }
 0xfa0   :  { %6311 = vmatprep.subr.bf16.mxu0 %v7994_v7  ;;  %6341 = vmatprep.subr.bf16.mxu1 %v7056_v48 }
 0xfa1   :  { %3645 = vmatprep.mubr.f32.mxu0 %v7047_v16  ;;  %5288 = vmatprep.mubr.msk.f32.mxu1 %vm7055_vm2, %v7047_v16 }
 0xfa3   :  { %6313 = vmatpush1.bf16.msra.mxu0 %v7997_v28  ;;  %6343 = vmatpush3.bf16.msra.mxu1 %v7971_v17 }
 0xfa4   :  { %6315 = vmatprep.subr.bf16.mxu0 %v8001_v54  ;;  %6344 = vmatprep.subr.bf16.mxu1 %v7056_v48 }
 0xfa7   :  { %6317 = vmatpush1.bf16.msra.mxu0 %v8004_v14  ;;  %6346 = vmatpush3.bf16.msra.mxu1 %v7975_v29 }
 0xfa8   :  { %6319 = vmatprep.subr.bf16.mxu0 %v8007_v22  ;;  %6347 = vmatprep.subr.bf16.mxu1 %v7056_v48 }
 0xfab   :  { %6321 = vmatpush1.bf16.msra.mxu0 %v8010_v49  ;;  %6349 = vmatpush3.bf16.msra.mxu1 %v7979_v42 }
 0xfac   :  { %6323 = vmatprep.subr.bf16.mxu0 %v8013_v55  ;;  %6350 = vmatprep.subr.bf16.mxu1 %v7056_v48 }
 0xfaf   :  { %6325 = vmatpush1.bf16.msra.mxu0 %v8016_v0  ;;  %6352 = vmatpush3.bf16.msra.mxu1 %v7983_v51 }
 0xfb0   :  { %6327 = vmatprep.subr.bf16.mxu0 %v8020_v35  ;;  %6353 = vmatprep.subr.bf16.mxu1 %v7056_v48 }
 0xfb3   :  { %6329 = vmatpush1.bf16.msra.mxu0 %v8022_v52  ;;  %6355 = vmatpush3.bf16.msra.mxu1 %v8025_v40 }
 0xfb4   :  { %6331 = vmatprep.subr.bf16.mxu0 %v8028_v2  ;;  %6356 = vmatprep.subr.bf16.mxu1 %v7056_v48 }
 0xfb7   :  { %6333 = vmatpush1.bf16.msra.mxu0 %v8031_v19  ;;  %6358 = vmatpush3.bf16.msra.mxu1 %v8033_v50 }
 0xfb8   :  { %6335 = vmatprep.subr.bf16.mxu0 %v8037_v62  ;;  %6359 = vmatprep.subr.bf16.mxu1 %v7056_v48 }
 0xfbb   :  { %6337 = vmatpush1.bf16.msra.mxu0 %v8040_v33  ;;  %6361 = vmatpush3.bf16.msra.mxu1 %v8044_v6 }
 0xfbc   :  { %6394 = vmatprep.subr.bf16.mxu1 %v7056_v48  ;;  %6363 = vmatprep.subr.bf16.mxu0 %v7964_v56 }
0x1071   :  { %v3481_v59 = vpop.f32.mrb[26].mxu0  ;;  %v3552_v11 = vpop.f32.mrb[46].mxu1 }
0x1072   :  { %v6476_v1 = vadd.f32 %v3481_v59, %v8097_v60  ;;  %v3483_v46 = vpop.f32.mrb[27].mxu0  ;;  %v5255_v32 = vpop.f32.mrb[47].mxu1  ;;  %v3570_v53 = vadd.f32 %v8105_v13, %v3552_v11  ;;  %v6430_v59 = vpack.c.bf16 %v3917_v44, %v3916_v45  ;;  %v3918_v11 = vld [vmem:[#allocation19 + $0x40] sm:$0xff] }
0x1073   :  { %v6477_v47 = vadd.f32 %v3483_v46, %v8101_v38  ;;  %v3920_v32 = vld [vmem:[#allocation19 + $0x50] sm:$0xff] }
0x1074   :  { %v4261_v57 = vmul.f32 -1.442695, %v6476_v1  ;;  %v3919_v1 = vld [vmem:[#allocation19 + $0x48] sm:$0xff] }
0x1075   :  { %v4262_v25 = vmul.f32 -1.442695, %v6477_v47  ;;  %v6434_v46 = vpack.c.bf16 %v3919_v1, %v3918_v11 }
0x1076   :  { %6689 = vpow2.f32 %v4261_v57  ;;  %v3921_v57 = vld [vmem:[#allocation19 + $0x58] sm:$0xff] }
0x1077   :  { %6691 = vpow2.f32 %v4262_v25  ;;  %v6438_v47 = vpack.c.bf16 %v3921_v57, %v3920_v32  ;;  %v3922_v25 = vld [vmem:[#allocation19 + $0x60] sm:$0xff] }
0x1080   :  { %v6690_v30 = vpop.eup %6689 }
0x1081   :  { %v3560_v27 = vadd.f32 1.0, %v6690_v30  ;;  %v6692_v10 = vpop.eup %6691  ;;  %v3923_v30 = vld [vmem:[#allocation19 + $0x68] sm:$0xff] }
0x1082   :  { %v3567_v34 = vadd.f32 1.0, %v6692_v10  ;;  %v3925_v10 = vld [vmem:[#allocation19 + $0x78] sm:$0xff] }
0x1083   :  { %6693 = vrcp.f32 %v3560_v27  ;;  %v3924_v27 = vld [vmem:[#allocation19 + $0x70] sm:$0xff] }
0x1084   :  { %6695 = vrcp.f32 %v3567_v34  ;;  %v6446_v34 = vpack.c.bf16 %v3925_v10, %v3924_v27 }
0x108d   :  { %v6694_v56 = vpop.eup %6693 }
0x108e   :  { %v3571_v21 = vmul.f32 %v6694_v56, %v3570_v53  ;;  %v6696_v37 = vpop.eup %6695 }
0x108f   :  { %v3574_v24 = vsub.f32 1.0, %v6696_v37  ;;  %v3576_v3 = vmul.f32 %v6696_v37, %v8287_v31 }
0x1090   :  { %v3572_v4 = vadd.f32 %v3571_v21, %v7687_v58  ;;  %v3911_v58 = vld [vmem:[#allocation19 + $0x8] sm:$0xff] }
0x1092   :  { %6697 = vtanh.f32 %v3572_v4 }
0x109c   :  { %v6698_v12 = vpop.eup %6697 }
0x109d   :  { %v3575_v43 = vmul.f32 %v6698_v12, %v3574_v24 }
0x109f   :  { %v8331_v9 = vadd.f32 %v3576_v3, %v3575_v43 }
0x10a1   :  { %3646 = vmatmul.mubr.f32.vlgmr.msra.gmra.mrb[28].mxu0 %v8331_v9  ;;  %5289 = vmatmul.mubr.f32.vlgmr.msra.gmra.mrb[48].mxu1 %v8331_v9 }
0x10a2   :  { %6396 = vmatpush3.bf16.msra.mxu1 %v7966_v8  ;;  %6365 = vmatpush1.bf16.msra.mxu0 %v7992_v26 }
0x10a3   :  { %6397 = vmatprep.subr.bf16.mxu1 %v7056_v48  ;;  %6367 = vmatprep.subr.bf16.mxu0 %v7994_v7 }
0x10a4   :  { %3811 = vmatprep.mubr.f32.mxu0 %v7047_v16  ;;  %5323 = vmatprep.mubr.msk.f32.mxu1 %vm7055_vm2, %v7047_v16  ;;  %v3910_v16 = vld [vmem:[#allocation19] sm:$0xff] }
0x10a5   :  { %v6418_v8 = vpack.c.bf16 %v3911_v58, %v3910_v16  ;;  %v4267_v58 = vld [vmem:[#allocation21] ss:$0 sm:$0xff] }
0x10a6   :  { %6399 = vmatpush3.bf16.msra.mxu1 %v7971_v17  ;;  %6369 = vmatpush1.bf16.msra.mxu0 %v7997_v28 }
0x10a7   :  { %6400 = vmatprep.subr.bf16.mxu1 %v7056_v48  ;;  %6371 = vmatprep.subr.bf16.mxu0 %v8001_v54 }
0x10aa   :  { %6402 = vmatpush3.bf16.msra.mxu1 %v7975_v29  ;;  %6373 = vmatpush1.bf16.msra.mxu0 %v8004_v14 }
0x10ab   :  { %6403 = vmatprep.subr.bf16.mxu1 %v7056_v48  ;;  %6375 = vmatprep.subr.bf16.mxu0 %v8007_v22 }
0x10ae   :  { %6405 = vmatpush3.bf16.msra.mxu1 %v7979_v42  ;;  %6377 = vmatpush1.bf16.msra.mxu0 %v8010_v49 }
0x10af   :  { %6406 = vmatprep.subr.bf16.mxu1 %v7056_v48  ;;  %6379 = vmatprep.subr.bf16.mxu0 %v8013_v55 }
0x10b2   :  { %6408 = vmatpush3.bf16.msra.mxu1 %v7983_v51  ;;  %6381 = vmatpush1.bf16.msra.mxu0 %v8016_v0 }
0x10b3   :  { %6409 = vmatprep.subr.bf16.mxu1 %v7056_v48  ;;  %6383 = vmatprep.subr.bf16.mxu0 %v8020_v35 }
0x10b6   :  { %6411 = vmatpush3.bf16.msra.mxu1 %v8025_v40  ;;  %6385 = vmatpush1.bf16.msra.mxu0 %v8022_v52 }
0x10b7   :  { %6412 = vmatprep.subr.bf16.mxu1 %v7056_v48  ;;  %6387 = vmatprep.subr.bf16.mxu0 %v8028_v2 }
0x10ba   :  { %6414 = vmatpush3.bf16.msra.mxu1 %v8033_v50  ;;  %6389 = vmatpush1.bf16.msra.mxu0 %v8031_v19  ;;  %v3912_v50 = vld [vmem:[#allocation19 + $0x10] sm:$0xff] }
0x10bb   :  { %6415 = vmatprep.subr.bf16.mxu1 %v7056_v48  ;;  %6391 = vmatprep.subr.bf16.mxu0 %v8037_v62  ;;  %v3913_v62 = vld [vmem:[#allocation19 + $0x18] sm:$0xff] }
0x10bc   :  { %v6422_v36 = vpack.c.bf16 %v3913_v62, %v3912_v50 }
0x10be   :  { %6417 = vmatpush3.bf16.msra.mxu1 %v8044_v6  ;;  %6393 = vmatpush1.bf16.msra.mxu0 %v8040_v33 }
0x10bf   :  { %6419 = vmatprep.subr.bf16.mxu1 %v6418_v8 }
0x1174   :  { %v3647_v17 = vpop.f32.mrb[28].mxu0  ;;  %v3718_v29 = vpop.f32.mrb[48].mxu1 }
0x1175   :  { %v6478_v42 = vadd.f32 %v3647_v17, %v8097_v60  ;;  %v3649_v51 = vpop.f32.mrb[29].mxu0  ;;  %v5290_v26 = vpop.f32.mrb[49].mxu1  ;;  %v3736_v55 = vadd.f32 %v8105_v13, %v3718_v29 }
0x1176   :  { %v6479_v28 = vadd.f32 %v3649_v51, %v8101_v38 }
0x1177   :  { %v4263_v7 = vmul.f32 -1.442695, %v6478_v42 }
0x1178   :  { %v4264_v48 = vmul.f32 -1.442695, %v6479_v28 }
0x1179   :  { %6699 = vpow2.f32 %v4263_v7 }
0x117a   :  { %6701 = vpow2.f32 %v4264_v48 }
0x1183   :  { %v6700_v54 = vpop.eup %6699 }
0x1184   :  { %v3726_v14 = vadd.f32 1.0, %v6700_v54  ;;  %v6702_v22 = vpop.eup %6701 }
0x1185   :  { %v3733_v49 = vadd.f32 1.0, %v6702_v22 }
0x1186   :  { %6703 = vrcp.f32 %v3726_v14 }
0x1187   :  { %6705 = vrcp.f32 %v3733_v49 }
0x1190   :  { %v6704_v0 = vpop.eup %6703 }
0x1191   :  { %v3737_v35 = vmul.f32 %v6704_v0, %v3736_v55  ;;  %v6706_v40 = vpop.eup %6705 }
0x1192   :  { %v3740_v2 = vsub.f32 1.0, %v6706_v40  ;;  %v3742_v6 = vmul.f32 %v6706_v40, %v8331_v9 }
0x1193   :  { %v3738_v52 = vadd.f32 %v3737_v35, %v7696_v5  ;;  %v6426_v5 = vpack.c.bf16 %v3915_v39, %v3914_v41 }
0x1195   :  { %6707 = vtanh.f32 %v3738_v52 }
0x119f   :  { %v6708_v19 = vpop.eup %6707 }
0x11a0   :  { %v3741_v33 = vmul.f32 %v6708_v19, %v3740_v2 }
0x11a2   :  { %v8373_v23 = vadd.f32 %v3742_v6, %v3741_v33 }
0x11a4   :  { %3812 = vmatmul.mubr.f32.vlgmr.msra.gmra.mrb[30].mxu0 %v8373_v23  ;;  %5324 = vmatmul.mubr.f32.vlgmr.msra.gmra.mrb[50].mxu1 %v8373_v23 }
0x11a5   :  { %6421 = vmatpush3.bf16.msra.mxu1 %v6418_v8  ;;  %5358 = vmatprep.mubr.f32.mxu1 %v8111_v18  ;;  %v6442_v18 = vpack.c.bf16 %v3923_v30, %v3922_v25 }
0x11a6   :  { %6423 = vmatprep.subr.bf16.mxu1 %v6422_v36 }
0x11a9   :  { %6425 = vmatpush3.bf16.msra.mxu1 %v6422_v36 }
0x11aa   :  { %6427 = vmatprep.subr.bf16.mxu1 %v6426_v5 }
0x11ad   :  { %6429 = vmatpush3.bf16.msra.mxu1 %v6426_v5 }
0x11ae   :  { %6431 = vmatprep.subr.bf16.mxu1 %v6430_v59 }
0x11b1   :  { %6433 = vmatpush3.bf16.msra.mxu1 %v6430_v59 }
0x11b2   :  { %6435 = vmatprep.subr.bf16.mxu1 %v6434_v46 }
0x11b5   :  { %6437 = vmatpush3.bf16.msra.mxu1 %v6434_v46 }
0x11b6   :  { %6439 = vmatprep.subr.bf16.mxu1 %v6438_v47 }
0x11b9   :  { %6441 = vmatpush3.bf16.msra.mxu1 %v6438_v47 }
0x11ba   :  { %6443 = vmatprep.subr.bf16.mxu1 %v6442_v18 }
0x11bd   :  { %6445 = vmatpush3.bf16.msra.mxu1 %v6442_v18 }
0x11be   :  { %6447 = vmatprep.subr.bf16.mxu1 %v6446_v34 }
0x11c1   :  { %6449 = vmatpush3.bf16.msra.mxu1 %v6446_v34 }
0x11c4   :  { %5359 = vmatmul.mubr.f32.vlgmr.msra.gmra.mrb[52].mxu1 %v8155_v61 }
0x11c5   :  { %5361 = vmatprep.mubr.f32.mxu1 %v8199_v20 }
0x11c8   :  { %5362 = vmatmul.mubr.f32.gmra.mrb[54].mxu1 %v8243_v15 }
0x11c9   :  { %5364 = vmatprep.mubr.f32.mxu1 %v8287_v31 }
0x11cc   :  { %5365 = vmatmul.mubr.f32.gmra.mrb[56].mxu1 %v8331_v9 }
0x11cd   :  { %5367 = vmatprep.mubr.f32.mxu1 %v8373_v23 }
0x1277   :  { %v3813_v53 = vpop.f32.mrb[30].mxu0  ;;  %v3884_v56 = vpop.f32.mrb[50].mxu1 }
0x1278   :  { %v6480_v21 = vadd.f32 %v3813_v53, %v8097_v60  ;;  %v3815_v4 = vpop.f32.mrb[31].mxu0  ;;  %v5325_v37 = vpop.f32.mrb[51].mxu1  ;;  %v3902_v3 = vadd.f32 %v8105_v13, %v3884_v56 }
0x1279   :  { %v6481_v12 = vadd.f32 %v3815_v4, %v8101_v38 }
0x127a   :  { %v4265_v24 = vmul.f32 -1.442695, %v6480_v21 }
0x127b   :  { %v4266_v61 = vmul.f32 -1.442695, %v6481_v12 }
0x127c   :  { %6709 = vpow2.f32 %v4265_v24 }
0x127d   :  { %6711 = vpow2.f32 %v4266_v61 }
0x1286   :  { %v6710_v20 = vpop.eup %6709 }
0x1287   :  { %v3892_v15 = vadd.f32 1.0, %v6710_v20  ;;  %v6712_v31 = vpop.eup %6711 }
0x1288   :  { %v3899_v43 = vadd.f32 1.0, %v6712_v31 }
0x1289   :  { %6713 = vrcp.f32 %v3892_v15 }
0x128a   :  { %6715 = vrcp.f32 %v3899_v43 }
0x1293   :  { %v6714_v9 = vpop.eup %6713 }
0x1294   :  { %v3903_v16 = vmul.f32 %v6714_v9, %v3902_v3  ;;  %v6716_v28 = vpop.eup %6715 }
0x1295   :  { %v3906_v22 = vsub.f32 1.0, %v6716_v28  ;;  %v3908_v55 = vmul.f32 %v6716_v28, %v8373_v23 }
0x1296   :  { %v3904_v60 = vadd.f32 %v3903_v16, %v7693_v63 }
0x1297   :  { %v5360_v8 = vpop.f32.mrb[52].mxu1 }
0x1298   :  { %6717 = vtanh.f32 %v3904_v60  ;;  %v4005_v17 = vadd.f32 %v5360_v8, %v4267_v58  ;;  %v3999_v38 = vpop.f32.mrb[53].mxu1 }
0x1299   :  { %v4000_v29 = vadd.f32 %v4267_v58, %v3999_v38 }
0x129a   :  { %4040 = vmax.xlane.f32.xlu0 %v4005_v17 }
0x129b   :  { %v5363_v42 = vpop.f32.mrb[54].mxu1  ;;  %4038 = vmax.xlane.f32.xlu1 %v4000_v29 }
0x129c   :  { %v4015_v51 = vadd.f32 %v5363_v42, %v4267_v58  ;;  %v4009_v26 = vpop.f32.mrb[55].mxu1 }
0x129d   :  { %v4010_v7 = vadd.f32 %v4267_v58, %v4009_v26 }
0x129e   :  { %4044 = vmax.xlane.f32.xlu0 %v4015_v51 }
0x129f   :  { %v5366_v13 = vpop.f32.mrb[56].mxu1  ;;  %4042 = vmax.xlane.f32.xlu1 %v4010_v7 }
0x12a0   :  { %v4025_v48 = vadd.f32 %v5366_v13, %v4267_v58  ;;  %v4019_v54 = vpop.f32.mrb[57].mxu1 }
0x12a1   :  { %v4020_v14 = vadd.f32 %v4267_v58, %v4019_v54 }
0x12a2   :  { %v6718_v63 = vpop.eup %6717  ;;  %4048 = vmax.xlane.f32.xlu0 %v4025_v48 }
0x12a3   :  { %4046 = vmax.xlane.f32.xlu1 %v4020_v14  ;;  %v3907_v49 = vmul.f32 %v6718_v63, %v3906_v22 }
0x12a5   :  { %v3909_v0 = vadd.f32 %v3908_v55, %v3907_v49 }
0x12a7   :  { %5368 = vmatmul.mubr.f32.gmra.mrb[58].mxu1 %v3909_v0 }
0x1327   :  { %v4041_v35 = vpop.xlane.xlu0 %4040 }
0x1328   :  { %v4039_v52 = vpop.xlane.xlu1 %4038  ;;  %v8389_v2 = vsub.f32 %v4005_v17, %v4041_v35 }
0x1329   :  { %v8391_v50 = vsub.f32 %v4000_v29, %v4039_v52 }
0x132a   :  { %v4064_v62 = vmul.f32 1.442695, %v8389_v2 }
0x132b   :  { %v4045_v40 = vpop.xlane.xlu0 %4044  ;;  %v4062_v6 = vmul.f32 1.442695, %v8391_v50 }
0x132c   :  { %v4043_v19 = vpop.xlane.xlu1 %4042  ;;  %v8394_v33 = vsub.f32 %v4015_v51, %v4045_v40  ;;  %6719 = vpow2.f32 %v4064_v62 }
0x132d   :  { %v8397_v36 = vsub.f32 %v4010_v7, %v4043_v19  ;;  %6721 = vpow2.f32 %v4062_v6 }
0x132e   :  { %v4068_v39 = vmul.f32 1.442695, %v8394_v33 }
0x132f   :  { %v4049_v41 = vpop.xlane.xlu0 %4048  ;;  %v4066_v45 = vmul.f32 1.442695, %v8397_v36 }
0x1330   :  { %v4047_v23 = vpop.xlane.xlu1 %4046  ;;  %v8400_v5 = vsub.f32 %v4025_v48, %v4049_v41  ;;  %6723 = vpow2.f32 %v4068_v39 }
0x1331   :  { %v8403_v44 = vsub.f32 %v4020_v14, %v4047_v23  ;;  %6725 = vpow2.f32 %v4066_v45 }
0x1332   :  { %v4072_v59 = vmul.f32 1.442695, %v8400_v5 }
0x1333   :  { %v4070_v1 = vmul.f32 1.442695, %v8403_v44 }
0x1334   :  { %6727 = vpow2.f32 %v4072_v59 }
0x1335   :  { %6729 = vpow2.f32 %v4070_v1 }
0x1336   :  { %v6720_v47 = vpop.eup %6719 }
0x1337   :  { %v6722_v25 = vpop.eup %6721 }
0x133a   :  { %v6724_v30 = vpop.eup %6723 }
0x133b   :  { %v6726_v18 = vpop.eup %6725 }
0x133e   :  { %v6728_v27 = vpop.eup %6727 }
0x133f   :  { %v6730_v10 = vpop.eup %6729 }
0x137a   :  { %v5369_v11 = vpop.f32.mrb[58].mxu1 }
0x137b   :  { %v4035_v46 = vadd.f32 %v5369_v11, %v4267_v58  ;;  %v4029_v32 = vpop.f32.mrb[59].mxu1 }
0x137c   :  { %v4030_v57 = vadd.f32 %v4267_v58, %v4029_v32 }
0x137d   :  { %4052 = vmax.xlane.f32.xlu0 %v4035_v46 }
0x137e   :  { %4050 = vmax.xlane.f32.xlu1 %v4030_v57 }
0x1381   :  { %4080 = vadd.xlane.f32.xlu0 %v6720_v47 }
0x1382   :  { %4078 = vadd.xlane.f32.xlu1 %v6722_v25 }
0x1385   :  { %4084 = vadd.xlane.f32.xlu0 %v6724_v30 }
0x1386   :  { %4082 = vadd.xlane.f32.xlu1 %v6726_v18 }
0x1389   :  { %4088 = vadd.xlane.f32.xlu0 %v6728_v27 }
0x138a   :  { %4086 = vadd.xlane.f32.xlu1 %v6730_v10 }
0x140a   :  { %v4053_v34 = vpop.xlane.xlu0 %4052 }
0x140b   :  { %v8407_v53 = vsub.f32 %v4035_v46, %v4053_v34  ;;  %v4051_v56 = vpop.xlane.xlu1 %4050 }
0x140c   :  { %v8409_v21 = vsub.f32 %v4030_v57, %v4051_v56 }
0x140d   :  { %v4076_v4 = vmul.f32 1.442695, %v8407_v53 }
0x140e   :  { %v4074_v37 = vmul.f32 1.442695, %v8409_v21  ;;  %v4081_v20 = vpop.xlane.xlu0 %4080 }
0x140f   :  { %6731 = vpow2.f32 %v4076_v4  ;;  %v4079_v61 = vpop.xlane.xlu1 %4078 }
0x1410   :  { %6733 = vpow2.f32 %v4074_v37 }
0x1411   :  { %6735 = vlog2.f32 %v4081_v20 }
0x1412   :  { %6737 = vlog2.f32 %v4079_v61  ;;  %v4085_v31 = vpop.xlane.xlu0 %4084 }
0x1413   :  { %v4083_v15 = vpop.xlane.xlu1 %4082 }
0x1414   :  { %6739 = vlog2.f32 %v4083_v15 }
0x1416   :  { %v4089_v3 = vpop.xlane.xlu0 %4088 }
0x1417   :  { %v4087_v43 = vpop.xlane.xlu1 %4086 }
0x1418   :  { %6741 = vlog2.f32 %v4087_v43 }
0x1419   :  { %v6732_v24 = vpop.eup %6731  ;;  %6743 = vlog2.f32 %v4085_v31 }
0x141a   :  { %v6734_v12 = vpop.eup %6733  ;;  %4092 = vadd.xlane.f32.xlu0 %v6732_v24  ;;  %6745 = vlog2.f32 %v4089_v3 }
0x141b   :  { %4090 = vadd.xlane.f32.xlu1 %v6734_v12  ;;  %v6736_v9 = vpop.eup %6735 }
0x141c   :  { %v6738_v16 = vpop.eup %6737  ;;  %v4097_v60 = vmul.f32 0.6931472, %v6736_v9 }
0x141d   :  { %v4095_v8 = vmul.f32 0.6931472, %v6738_v16 }
0x141e   :  { %v6740_v58 = vpop.eup %6739  ;;  %v4111_v26 = vsub.f32 %v8389_v2, %v4097_v60 }
0x141f   :  { %v4099_v17 = vmul.f32 0.6931472, %v6740_v58  ;;  %v4110_v7 = vsub.f32 %v8391_v50, %v4095_v8 }
0x1420   :  { %v4119_v14 = vrot.slane %v4111_v26, 7 }
0x1421   :  { %v4112_v28 = vsub.f32 %v8397_v36, %v4099_v17  ;;  %v4154_v22 = vrot.slane %v4110_v7, 1 }
0x1422   :  { %v6742_v38 = vpop.eup %6741  ;;  %v4140_v52 = vsel %vm4139_vm4, %v4110_v7, %v4119_v14 }
0x1423   :  { %v6744_v42 = vpop.eup %6743  ;;  %v4103_v13 = vmul.f32 0.6931472, %v6742_v38  ;;  %v4122_v63 = vrot.slane %v4112_v28, 6  ;;  %v4156_v49 = vrot.slane %v4112_v28, 7  ;;  %v4168_v40 = vsel %vm4139_vm4, %v4154_v22, %v4111_v26 }
0x1424   :  { %v4101_v48 = vmul.f32 0.6931472, %v6744_v42  ;;  %v6746_v54 = vpop.eup %6745 }
0x1425   :  { %v4114_v55 = vsub.f32 %v8403_v44, %v4103_v13  ;;  %v4105_v35 = vmul.f32 0.6931472, %v6746_v54  ;;  %v4141_v19 = vsel %vm202_vm0, %v4140_v52, %v4122_v63  ;;  %v4169_v50 = vsel %vm202_vm0, %v4168_v40, %v4156_v49 }
0x1426   :  { %v4113_v0 = vsub.f32 %v8394_v33, %v4101_v48  ;;  %vm4148_vm0 = vcmask 1045504  }
0x1427   :  { %v4128_v62 = vrot.slane %v4114_v55, 4  ;;  %v4160_v6 = vrot.slane %v4114_v55, 5  ;;  %v4115_v39 = vsub.f32 %v8400_v5, %v4105_v35 }
0x1428   :  { %v4125_v41 = vrot.slane %v4113_v0, 5  ;;  %v4158_v23 = vrot.slane %v4113_v0, 6 }
0x1429   :  { %v4131_v57 = vrot.slane %v4115_v39, 3  ;;  %v4162_v47 = vrot.slane %v4115_v39, 4 }
0x142a   :  { %v4143_v59 = vsel %vm4142_vm5, %v4141_v19, %v4125_v41  ;;  %v4170_v11 = vsel %vm4142_vm5, %v4169_v50, %v4158_v23 }
0x142b   :  { %v4145_v46 = vsel %vm4144_vm6, %v4143_v59, %v4128_v62  ;;  %v4171_v32 = vsel %vm4144_vm6, %v4170_v11, %v4160_v6 }
0x142c   :  { %v4147_v27 = vsel %vm4146_vm7, %v4145_v46, %v4131_v57  ;;  %v4172_v10 = vsel %vm4146_vm7, %v4171_v32, %v4162_v47 }
0x14a7   :  { %v4093_v29 = vpop.xlane.xlu0 %4092 }
0x14a8   :  { %6747 = vlog2.f32 %v4093_v29  ;;  %v4091_v51 = vpop.xlane.xlu1 %4090 }
0x14a9   :  { %6749 = vlog2.f32 %v4091_v51 }
0x14b2   :  { %v6748_v2 = vpop.eup %6747 }
0x14b3   :  { %v6750_v36 = vpop.eup %6749  ;;  %v4109_v45 = vmul.f32 0.6931472, %v6748_v2 }
0x14b4   :  { %v4107_v44 = vmul.f32 0.6931472, %v6750_v36 }
0x14b5   :  { %v4117_v33 = vsub.f32 %v8407_v53, %v4109_v45 }
0x14b6   :  { %v4116_v1 = vsub.f32 %v8409_v21, %v4107_v44 }
0x14b7   :  { %v4137_v30 = vrot.slane %v4117_v33, 1  ;;  %v4166_v18 = vrot.slane %v4117_v33, 2 }
0x14b8   :  { %v4134_v25 = vrot.slane %v4116_v1, 2  ;;  %v4164_v5 = vrot.slane %v4116_v1, 3 }
0x14ba   :  { %v4149_v34 = vsel %vm4148_vm0, %v4147_v27, %v4134_v25  ;;  %v4173_v53 = vsel %vm4148_vm0, %v4172_v10, %v4164_v5 }
0x14bb   :  { %v4151_v56 = vsel %vm4150_vm8, %v4149_v34, %v4137_v30  ;;  %v4174_v21 = vsel %vm4150_vm8, %v4173_v53, %v4166_v18 }
0x14bc   :  { %4152 = vst [vmem:[#allocation22] sm:$0xff] %v4151_v56  ;;  %4175 = vst [vmem:[#allocation22 + $0x8] sm:$0xff] %v4174_v21 }
0x14bd   :  { %7005 = shalt.err (!%p7002_p8)
}
0x14be   :  { %s7006_s8 = scalar_lea.hbm %s8458_s18, 256 }
0x14bf   :  { %p7007_p9 = scmp.ne.s32.totalorder %s8458_s18, %s7006_s8  ;;  %p7010_p10 = scmp.lt.u32.totalorder %s7006_s8, %s8458_s18 }
0x14c1   :  { %p7012_p11 = pnand %p7010_p10, %p7007_p9 }
0x14c3   :  { %7015 = shalt.err (!%p7012_p11)
}
0x14c4   :  { %4187 = dma.vmem_to_hbm [thread:$0]  %s4182_s16, 256, %s8458_s18, [#allocation6], %s7038_s0, %s7038_s0, %s7039_s22  }
0x14c5   :  { %7028 = dma.done.wait [#allocation6], 256  }
0x14c6   :  { %7029 = vsyncadd [#allocation6], 4294967040 }
0x14c7   :  { %4191 = vsyncpa [#allocation5], 1 }
0x14c8   :  { %4192 = vsyncpa [#allocation8], 1 }
0x14c9   :  { %4193 = vsyncpa [#allocation11], 1 }
0x14ca   :  { %4194 = vsyncpa [#allocation14], 1 }
0x14cb   :  { %4195 = vsyncpa [#allocation17], 1 }
0x14cc   :  { %4196 = vsyncpa [#allocation20], 1 }
0x14cd   :  { %4197 = vsyncpa [#allocation6], 1 }

</bundles_post_ra>
